<compile_context>
chip_gen: v7x
topology: tpu7x:2x2x1
jax: 0.10.0
libtpu: 0.0.40
codegen_flags: <defaults>
</compile_context>

<pallas_src>
import functools

import jax
import jax.numpy as jnp
from jax.experimental import pallas as pl
from jax.experimental.pallas import tpu as pltpu

# ---------------- config (stands in for cfg.MODEL.*) ----------------
PIXEL_MEAN = (103.530, 116.280, 123.675)   # cfg.MODEL.PIXEL_MEAN (len == C == 3)
PIXEL_STD = (57.375, 57.120, 58.395)       # cfg.MODEL.PIXEL_STD
NUM_CLASSES = 5
BACKBONE_OUT = 32
BACKBONE_STRIDE = 2                        # backbone.size_divisibility handled: H,W divisible
RPN_ANCHOR_SIZES = (4.0, 8.0, 16.0)
NUM_ANCHORS = len(RPN_ANCHOR_SIZES)
TOPK_PROPOSALS = 8                         # RPN post-NMS top-k stand-in
POOL = 4                                   # ROI pooler resolution
BOX_HEAD_DIM = 64
RPN_HEAD_OUT = NUM_ANCHORS + 4 * NUM_ANCHORS        # fused obj + deltas = 15
PRED_OUT = (NUM_CLASSES + 1) + 4 * NUM_CLASSES       # fused cls + box    = 26


# ======================= Pallas kernels =======================

def _stem_kernel(cols_ref, w_ref, b_ref, o_ref):
    """Backbone stem: im2col-matmul + bias + ReLU.  Pixel normalization is
    already folded into w/b, so the raw image patches go straight to the MXU."""
    acc = jnp.dot(cols_ref[...], w_ref[...], preferred_element_type=jnp.float32)
    acc = jnp.maximum(acc + b_ref[...], 0.0)
    o_ref[...] = acc.astype(o_ref.dtype)


def stem_conv(cols, w, b):
    """(M, 27) @ (27, Cout) + b, ReLU, bf16 out.  M tiled; no pad/slice copies."""
    m, k = cols.shape
    n = w.shape[1]
    tm = 128 if m % 128 == 0 else m
    return pl.pallas_call(
        _stem_kernel,
        out_shape=jax.ShapeDtypeStruct((m, n), jnp.bfloat16),
        grid_spec=pltpu.PrefetchScalarGridSpec(
            num_scalar_prefetch=0,
            grid=(m // tm,),
            in_specs=[
                pl.BlockSpec((tm, k), lambda i: (i, 0)),
                pl.BlockSpec((k, n), lambda i: (0, 0)),
                pl.BlockSpec((1, n), lambda i: (0, 0)),
            ],
            out_specs=pl.BlockSpec((tm, n), lambda i: (i, 0)),
        ),
        compiler_params=pltpu.CompilerParams(dimension_semantics=("parallel",)),
    )(cols, w, b)


def _rpn_fused_kernel(x_ref, wc_ref, bc_ref, wh_ref, bh_ref, o_ref, *, H, W, C):
    """Fused RPN per image: 3x3 conv (9 shifted matmuls, f32 accumulator)
    + bias + ReLU, then the fused (objectness | anchor-deltas) 1x1 head,
    all without the intermediate activation leaving VMEM."""
    acc = jnp.zeros((H * W, C), jnp.float32)
    for di in range(3):
        for dj in range(3):
            tile = x_ref[0, di:di + H, dj:dj + W, :].reshape(H * W, C)
            acc = acc + jnp.dot(tile, wc_ref[di * 3 + dj],
                                preferred_element_type=jnp.float32)
    t = jnp.maximum(acc + bc_ref[...], 0.0).astype(wh_ref.dtype)
    head = jnp.dot(t, wh_ref[...], preferred_element_type=jnp.float32) + bh_ref[...]
    o_ref[0] = head


def rpn_fused(feat_pad, wc, bc, wh, bh, H, W):
    n = feat_pad.shape[0]
    C = feat_pad.shape[-1]
    nout = wh.shape[1]
    return pl.pallas_call(
        functools.partial(_rpn_fused_kernel, H=H, W=W, C=C),
        out_shape=jax.ShapeDtypeStruct((n, H * W, nout), jnp.float32),
        grid_spec=pltpu.PrefetchScalarGridSpec(
            num_scalar_prefetch=0,
            grid=(n,),
            in_specs=[
                pl.BlockSpec((1, H + 2, W + 2, C), lambda i: (i, 0, 0, 0)),
                pl.BlockSpec((9, C, C), lambda i: (0, 0, 0)),
                pl.BlockSpec((1, C), lambda i: (0, 0)),
                pl.BlockSpec((C, nout), lambda i: (0, 0)),
                pl.BlockSpec((1, nout), lambda i: (0, 0)),
            ],
            out_specs=pl.BlockSpec((1, H * W, nout), lambda i: (i, 0, 0)),
        ),
        compiler_params=pltpu.CompilerParams(dimension_semantics=("parallel",)),
    )(feat_pad, wc, bc, wh, bh)


def _box_head_kernel(x_ref, w1_ref, b1_ref, w2_ref, b2_ref, wp_ref, bp_ref, o_ref):
    """Fused ROI box head: fc1 -> ReLU -> fc2 -> ReLU -> (cls | box) predictor.
    All weights (<200 KiB) live in VMEM; intermediates never round-trip HBM."""
    h = jnp.dot(x_ref[...], w1_ref[...], preferred_element_type=jnp.float32)
    h = jnp.maximum(h + b1_ref[...], 0.0).astype(w2_ref.dtype)
    h = jnp.dot(h, w2_ref[...], preferred_element_type=jnp.float32)
    h = jnp.maximum(h + b2_ref[...], 0.0).astype(wp_ref.dtype)
    o_ref[...] = (jnp.dot(h, wp_ref[...], preferred_element_type=jnp.float32)
                  + bp_ref[...])


def box_head(x, w1, b1, w2, b2, wp, bp):
    m, k = x.shape
    n = wp.shape[1]
    return pl.pallas_call(
        _box_head_kernel,
        out_shape=jax.ShapeDtypeStruct((m, n), jnp.float32),
        grid_spec=pltpu.PrefetchScalarGridSpec(
            num_scalar_prefetch=0,
            grid=(1,),
            in_specs=[
                pl.BlockSpec((m, k), lambda i: (0, 0)),
                pl.BlockSpec(w1.shape, lambda i: (0, 0)),
                pl.BlockSpec((1, w1.shape[1]), lambda i: (0, 0)),
                pl.BlockSpec(w2.shape, lambda i: (0, 0)),
                pl.BlockSpec((1, w2.shape[1]), lambda i: (0, 0)),
                pl.BlockSpec(wp.shape, lambda i: (0, 0)),
                pl.BlockSpec((1, n), lambda i: (0, 0)),
            ],
            out_specs=pl.BlockSpec((m, n), lambda i: (0, 0)),
        ),
        compiler_params=pltpu.CompilerParams(dimension_semantics=("arbitrary",)),
    )(x, w1, b1, w2, b2, wp, bp)


# ======================= glue (plain JAX) =======================

def im2col_stem(x_nhwc, kh, kw, stride, pad):
    """NHWC -> (N*Ho*Wo, kh*kw*C).  Only used for the stem where C == 3, so the
    expansion is tiny; the RPN 3x3 conv uses in-kernel shifted matmuls instead."""
    x = jnp.pad(x_nhwc, ((0, 0), (pad, pad), (pad, pad), (0, 0)))
    n, hp, wp, c = x.shape
    ho = (hp - kh) // stride + 1
    wo = (wp - kw) // stride + 1
    patches = [x[:, i:i + stride * ho:stride, j:j + stride * wo:stride, :]
               for i in range(kh) for j in range(kw)]
    cols = jnp.concatenate(patches, axis=-1)
    return cols.reshape(n * ho * wo, kh * kw * c), ho, wo


def make_anchors(hf, wf, stride):
    ys = (jnp.arange(hf, dtype=jnp.float32) + 0.5) * stride
    xs = (jnp.arange(wf, dtype=jnp.float32) + 0.5) * stride
    cy, cx = jnp.meshgrid(ys, xs, indexing="ij")
    half = jnp.asarray(RPN_ANCHOR_SIZES, jnp.float32) / 2.0
    x1 = cx[..., None] - half
    y1 = cy[..., None] - half
    x2 = cx[..., None] + half
    y2 = cy[..., None] + half
    return jnp.stack([x1, y1, x2, y2], axis=-1).reshape(-1, 4)   # (hf*wf*A, 4)


def apply_deltas(boxes, deltas):
    # TODO(synk): Box2BoxTransform weights (10,10,5,5) and log(1000/16) clamp omitted.
    w = boxes[..., 2] - boxes[..., 0]
    h = boxes[..., 3] - boxes[..., 1]
    cx = boxes[..., 0] + 0.5 * w
    cy = boxes[..., 1] + 0.5 * h
    dx, dy, dw, dh = (deltas[..., i] for i in range(4))
    ncx = dx * w + cx
    ncy = dy * h + cy
    nw = jnp.exp(jnp.clip(dw, -4.0, 4.0)) * w
    nh = jnp.exp(jnp.clip(dh, -4.0, 4.0)) * h
    return jnp.stack(
        [ncx - 0.5 * nw, ncy - 0.5 * nh, ncx + 0.5 * nw, ncy + 0.5 * nh], axis=-1)


def clip_boxes(boxes, h, w):
    return jnp.stack(
        [jnp.clip(boxes[..., 0], 0.0, w),
         jnp.clip(boxes[..., 1], 0.0, h),
         jnp.clip(boxes[..., 2], 0.0, w),
         jnp.clip(boxes[..., 3], 0.0, h)], axis=-1)


def roi_pool(feat, boxes, stride, p):
    # TODO(synk): ROIAlign bilinear sampling (data-dependent gather) kept in plain
    # JAX; a scalar-prefetch DMA gather would be the Pallas path at real scale.
    n, hf, wf, c = feat.shape
    x1, y1, x2, y2 = (boxes[..., i] for i in range(4))              # (N, K)
    grid = (jnp.arange(p, dtype=jnp.float32) + 0.5) / p
    ys = y1[..., None] + grid * (y2 - y1)[..., None]                # (N, K, P)
    xs = x1[..., None] + grid * (x2 - x1)[..., None]
    yi = jnp.clip(jnp.floor(ys / stride), 0, hf - 1).astype(jnp.int32)
    xi = jnp.clip(jnp.floor(xs / stride), 0, wf - 1).astype(jnp.int32)

    def per_image(f, yy, xx):
        return f[yy[:, :, None], xx[:, None, :], :]                 # (K, P, P, C)

    return jax.vmap(per_image)(feat, yi, xi)                        # (N, K, P, P, C)


# ======================= model components =======================

def init_params(key):
    """Raw PyTorch-equivalent parameters, then one-time folding / fusion:
    normalization folded into the stem, RPN heads fused, predictors fused,
    kernel-ready reshapes and bf16 casts -- nothing of this runs per forward."""
    ks = jax.random.split(key, 8)
    w = lambda k, s: 0.05 * jax.random.normal(k, s, jnp.float32)
    fc_in = BACKBONE_OUT * POOL * POOL

    bb_w = w(ks[0], (3, 3, 3, BACKBONE_OUT))
    bb_b = jnp.zeros((BACKBONE_OUT,), jnp.float32)
    rpn_w = w(ks[1], (3, 3, BACKBONE_OUT, BACKBONE_OUT))
    rpn_b = jnp.zeros((BACKBONE_OUT,), jnp.float32)
    rpn_obj_w = w(ks[2], (BACKBONE_OUT, NUM_ANCHORS))
    rpn_obj_b = jnp.zeros((NUM_ANCHORS,), jnp.float32)
    rpn_delta_w = w(ks[3], (BACKBONE_OUT, 4 * NUM_ANCHORS))
    rpn_delta_b = jnp.zeros((4 * NUM_ANCHORS,), jnp.float32)
    fc1_w = w(ks[4], (fc_in, BOX_HEAD_DIM))
    fc1_b = jnp.zeros((BOX_HEAD_DIM,), jnp.float32)
    fc2_w = w(ks[5], (BOX_HEAD_DIM, BOX_HEAD_DIM))
    fc2_b = jnp.zeros((BOX_HEAD_DIM,), jnp.float32)
    cls_w = w(ks[6], (BOX_HEAD_DIM, NUM_CLASSES + 1))
    cls_b = jnp.zeros((NUM_CLASSES + 1,), jnp.float32)
    box_w = w(ks[7], (BOX_HEAD_DIM, 4 * NUM_CLASSES))
    box_b = jnp.zeros((4 * NUM_CLASSES,), jnp.float32)

    # fold  conv((x - mean)/std)  ==  conv_folded(x)
    mean = jnp.asarray(PIXEL_MEAN, jnp.float32)
    std = jnp.asarray(PIXEL_STD, jnp.float32)
    bb_w_folded = bb_w / std[None, None, :, None]
    bb_b_folded = bb_b - jnp.einsum("hwco,c->o", bb_w, mean / std)

    return {
        # stem (im2col layout: kh-major, kw, Cin)
        "stem_w": bb_w_folded.reshape(9 * 3, BACKBONE_OUT),
        "stem_b": bb_b_folded.reshape(1, BACKBONE_OUT),
        # fused RPN
        "rpn_conv_w": rpn_w.reshape(9, BACKBONE_OUT, BACKBONE_OUT).astype(jnp.bfloat16),
        "rpn_conv_b": rpn_b.reshape(1, BACKBONE_OUT),
        "rpn_head_w": jnp.concatenate([rpn_obj_w, rpn_delta_w], axis=1).astype(jnp.bfloat16),
        "rpn_head_b": jnp.concatenate([rpn_obj_b, rpn_delta_b]).reshape(1, RPN_HEAD_OUT),
        # fused box head
        "fc1_w": fc1_w.astype(jnp.bfloat16), "fc1_b": fc1_b.reshape(1, BOX_HEAD_DIM),
        "fc2_w": fc2_w.astype(jnp.bfloat16), "fc2_b": fc2_b.reshape(1, BOX_HEAD_DIM),
        "pred_w": jnp.concatenate([cls_w, box_w], axis=1).astype(jnp.bfloat16),
        "pred_b": jnp.concatenate([cls_b, box_b]).reshape(1, PRED_OUT),
    }


def backbone(params, images_nchw):
    """Stem conv (stride 2) with pixel normalization folded in; bf16 features out."""
    n = images_nchw.shape[0]
    x = jnp.transpose(images_nchw, (0, 2, 3, 1))                    # NCHW -> NHWC
    cols, ho, wo = im2col_stem(x, 3, 3, stride=BACKBONE_STRIDE, pad=1)
    y = stem_conv(cols, params["stem_w"], params["stem_b"])         # (n*ho*wo, C) bf16
    return y.reshape(n, ho, wo, BACKBONE_OUT)


def proposal_generator(params, feat, img_h, img_w):
    n, hf, wf, c = feat.shape
    feat_pad = jnp.pad(feat, ((0, 0), (1, 1), (1, 1), (0, 0)))
    rpn_out = rpn_fused(feat_pad, params["rpn_conv_w"], params["rpn_conv_b"],
                        params["rpn_head_w"], params["rpn_head_b"], hf, wf)
    obj = rpn_out[..., :NUM_ANCHORS].reshape(n, hf * wf * NUM_ANCHORS)
    deltas = rpn_out[..., NUM_ANCHORS:].reshape(n, hf * wf * NUM_ANCHORS, 4)
    anchors = make_anchors(hf, wf, BACKBONE_STRIDE)
    boxes = clip_boxes(apply_deltas(anchors[None], deltas), img_h, img_w)
    # TODO(synk): RPN NMS has no clean Pallas equivalent; plain top-k by objectness.
    scores, idx = jax.lax.top_k(obj, TOPK_PROPOSALS)
    idx3 = jnp.broadcast_to(idx[..., None], (n, TOPK_PROPOSALS, 4))
    proposals = jnp.take_along_axis(boxes, idx3, axis=1)            # (n, K, 4)
    return proposals, scores


def roi_heads(params, feat, proposals, img_h, img_w):
    n, hf, wf, c = feat.shape
    pooled = roi_pool(feat, proposals, BACKBONE_STRIDE, POOL)       # (n, K, P, P, C) bf16
    x = pooled.reshape(n * TOPK_PROPOSALS, POOL * POOL * c)
    out = box_head(x, params["fc1_w"], params["fc1_b"],
                   params["fc2_w"], params["fc2_b"],
                   params["pred_w"], params["pred_b"])              # (nK, 26) f32
    logits = out[:, :NUM_CLASSES + 1]
    box_deltas = out[:, NUM_CLASSES + 1:]
    scores = jax.nn.softmax(logits, axis=-1)
    fg = scores[:, :NUM_CLASSES]                                    # last class = background
    pred_cls = jnp.argmax(fg, axis=-1)
    pred_score = jnp.max(fg, axis=-1)
    bd = box_deltas.reshape(-1, NUM_CLASSES, 4)
    sel = jnp.take_along_axis(
        bd, jnp.broadcast_to(pred_cls[:, None, None], (bd.shape[0], 1, 4)), axis=1)[:, 0]
    pred_boxes = clip_boxes(apply_deltas(proposals.reshape(-1, 4), sel), img_h, img_w)
    # TODO(synk): per-class NMS / score thresholding of FastRCNNOutputs.inference omitted.
    return (pred_boxes.reshape(n, TOPK_PROPOSALS, 4),
            pred_score.reshape(n, TOPK_PROPOSALS),
            pred_cls.reshape(n, TOPK_PROPOSALS))


def generalized_rcnn_inference(params, images_nchw):
    """GeneralizedRCNN.forward in eval mode (== .inference, do_postprocess=True).
    preprocess_image's normalization is folded into the stem weights; images are
    already same-sized and divisible by the backbone stride, so no padding."""
    n, c, h, w = images_nchw.shape
    feat = backbone(params, images_nchw)
    proposals, _ = proposal_generator(params, feat, float(h), float(w))
    boxes, scores, classes = roi_heads(params, feat, proposals, float(h), float(w))
    # detector_postprocess: rescale to requested (height, width) == input size here.
    return {"pred_boxes": boxes, "scores": scores, "pred_classes": classes}


if __name__ == "__main__":
    key = jax.random.PRNGKey(0)
    k_img, k_par = jax.random.split(key)
    # batched_inputs: 2 images, each (C=3, H=32, W=32), pixel values in [0, 255).
    images = jax.random.uniform(k_img, (2, 3, 32, 32), jnp.float32, 0.0, 255.0)
    params = init_params(k_par)
    out = jax.jit(generalized_rcnn_inference)(params, images)
    jax.block_until_ready(out)
    assert out["pred_boxes"].shape == (2, TOPK_PROPOSALS, 4)
    assert out["scores"].shape == (2, TOPK_PROPOSALS)
    assert out["pred_classes"].shape == (2, TOPK_PROPOSALS)
    print("KERNEL_OK")
</pallas_src>

<mosaic_0001>
module attributes {stable_mosaic.version = 11 : i64} {
  func.func @_stem_kernel(%arg0: i32, %arg1: memref<128x27xf32, #tpu.memory_space<vmem>>, %arg2: memref<27x32xf32, #tpu.memory_space<vmem>>, %arg3: memref<1x32xf32, #tpu.memory_space<vmem>>, %arg4: memref<128x32xbf16, #tpu.memory_space<vmem>>) attributes {dimension_semantics = [#tpu.dimension_semantics<parallel>], iteration_bounds = array<i64: 4>, scalar_prefetch = 0 : i64, scratch_operands = 0 : i64, tpu.core_type = #tpu.core_type<tc>, window_params = [{transform_indices = @transform_0, window_bounds = array<i64: 128, 27>}, {pipeline_mode = #tpu.pipeline_mode<synchronous>, transform_indices = @transform_1, window_bounds = array<i64: 27, 32>}, {pipeline_mode = #tpu.pipeline_mode<synchronous>, transform_indices = @transform_2, window_bounds = array<i64: 1, 32>}, {transform_indices = @transform_3, window_bounds = array<i64: 128, 32>}]} {
    %c0 = arith.constant 0 : index
    %c0_0 = arith.constant 0 : index
    %0 = vector.load %arg1[%c0, %c0_0] : memref<128x27xf32, #tpu.memory_space<vmem>>, vector<128x27xf32>
    %c0_1 = arith.constant 0 : index
    %c0_2 = arith.constant 0 : index
    %1 = vector.load %arg2[%c0_1, %c0_2] : memref<27x32xf32, #tpu.memory_space<vmem>>, vector<27x32xf32>
    %cst = arith.constant dense<0.000000e+00> : vector<128x32xf32>
    %2 = tpu.matmul %0, %1, %cst {dimension_numbers = #tpu.dot_dimension_numbers<[1], [0], [0], [1], [0, 0, 1, 1], [], []>} : vector<128x27xf32>, vector<27x32xf32>, vector<128x32xf32> -> vector<128x32xf32>
    %c0_3 = arith.constant 0 : index
    %c0_4 = arith.constant 0 : index
    %3 = vector.load %arg3[%c0_3, %c0_4] : memref<1x32xf32, #tpu.memory_space<vmem>>, vector<1x32xf32>
    %4 = vector.broadcast %3 : vector<1x32xf32> to vector<128x32xf32>
    %5 = arith.addf %2, %4 : vector<128x32xf32>
    %cst_5 = arith.constant 0.000000e+00 : f32
    %6 = vector.broadcast %cst_5 : f32 to vector<128x32xf32>
    %7 = arith.maximumf %5, %6 : vector<128x32xf32>
    %8 = arith.truncf %7 : vector<128x32xf32> to vector<128x32xbf16>
    %c0_6 = arith.constant 0 : index
    %c0_7 = arith.constant 0 : index
    %9 = vector.load %arg4[%c0_6, %c0_7] : memref<128x32xbf16, #tpu.memory_space<vmem>>, vector<128x32xbf16>
    tpu.vector_store %arg4[%c0_6, %c0_7], %8 {strides = array<i32>} : memref<128x32xbf16, #tpu.memory_space<vmem>>, vector<128x32xbf16>,
    return
  }
  func.func @transform_0(%arg0: i32) -> (i32, i32) {
    %c0_i32 = arith.constant 0 : i32
    %c0_i32_0 = arith.constant 0 : i32
    return %arg0, %c0_i32 : i32, i32
  }
  func.func @transform_1(%arg0: i32) -> (i32, i32) {
    %c0_i32 = arith.constant 0 : i32
    %c0_i32_0 = arith.constant 0 : i32
    %c0_i32_1 = arith.constant 0 : i32
    return %c0_i32, %c0_i32_0 : i32, i32
  }
  func.func @transform_2(%arg0: i32) -> (i32, i32) {
    %c0_i32 = arith.constant 0 : i32
    %c0_i32_0 = arith.constant 0 : i32
    %c0_i32_1 = arith.constant 0 : i32
    return %c0_i32, %c0_i32_0 : i32, i32
  }
  func.func @transform_3(%arg0: i32) -> (i32, i32) {
    %c0_i32 = arith.constant 0 : i32
    %c0_i32_0 = arith.constant 0 : i32
    return %arg0, %c0_i32 : i32, i32
  }
}

module attributes {stable_mosaic.version = 11 : i64} {
  func.func @_rpn_fused_kernel(%arg0: i32, %arg1: memref<1x18x18x32xbf16, #tpu.memory_space<vmem>>, %arg2: memref<9x32x32xbf16, #tpu.memory_space<vmem>>, %arg3: memref<1x32xf32, #tpu.memory_space<vmem>>, %arg4: memref<32x15xbf16, #tpu.memory_space<vmem>>, %arg5: memref<1x15xf32, #tpu.memory_space<vmem>>, %arg6: memref<1x256x15xf32, #tpu.memory_space<vmem>>) attributes {dimension_semantics = [#tpu.dimension_semantics<parallel>], iteration_bounds = array<i64: 2>, scalar_prefetch = 0 : i64, scratch_operands = 0 : i64, tpu.core_type = #tpu.core_type<tc>, window_params = [{transform_indices = @transform_0, window_bounds = array<i64: 1, 18, 18, 32>}, {pipeline_mode = #tpu.pipeline_mode<synchronous>, transform_indices = @transform_1, window_bounds = array<i64: 9, 32, 32>}, {pipeline_mode = #tpu.pipeline_mode<synchronous>, transform_indices = @transform_2, window_bounds = array<i64: 1, 32>}, {pipeline_mode = #tpu.pipeline_mode<synchronous>, transform_indices = @transform_3, window_bounds = array<i64: 32, 15>}, {pipeline_mode = #tpu.pipeline_mode<synchronous>, transform_indices = @transform_4, window_bounds = array<i64: 1, 15>}, {transform_indices = @transform_5, window_bounds = array<i64: 1, 256, 15>}]} {
    %cst = arith.constant 0.000000e+00 : f32
    %0 = vector.broadcast %cst : f32 to vector<256x32xf32>
    %c0 = arith.constant 0 : index
    %c0_0 = arith.constant 0 : index
    %c0_1 = arith.constant 0 : index
    %c0_2 = arith.constant 0 : index
    %1 = vector.load %arg1[%c0, %c0_0, %c0_1, %c0_2] : memref<1x18x18x32xbf16, #tpu.memory_space<vmem>>, vector<1x16x16x32xbf16>
    %2 = vector.shape_cast %1 : vector<1x16x16x32xbf16> to vector<16x16x32xbf16>
    %3 = vector.shape_cast %2 : vector<16x16x32xbf16> to vector<256x32xbf16>
    %c0_3 = arith.constant 0 : index
    %c0_4 = arith.constant 0 : index
    %c0_5 = arith.constant 0 : index
    %4 = vector.load %arg2[%c0_3, %c0_4, %c0_5] : memref<9x32x32xbf16, #tpu.memory_space<vmem>>, vector<1x32x32xbf16>
    %5 = vector.shape_cast %4 : vector<1x32x32xbf16> to vector<32x32xbf16>
    %cst_6 = arith.constant dense<0.000000e+00> : vector<256x32xf32>
    %6 = tpu.matmul %3, %5, %cst_6 {dimension_numbers = #tpu.dot_dimension_numbers<[1], [0], [0], [1], [0, 0, 1, 1], [], []>} : vector<256x32xbf16>, vector<32x32xbf16>, vector<256x32xf32> -> vector<256x32xf32>
    %7 = arith.addf %0, %6 : vector<256x32xf32>
    %c0_7 = arith.constant 0 : index
    %c0_8 = arith.constant 0 : index
    %c1 = arith.constant 1 : index
    %c0_9 = arith.constant 0 : index
    %8 = vector.load %arg1[%c0_7, %c0_8, %c1, %c0_9] : memref<1x18x18x32xbf16, #tpu.memory_space<vmem>>, vector<1x16x16x32xbf16>
    %9 = vector.shape_cast %8 : vector<1x16x16x32xbf16> to vector<16x16x32xbf16>
    %10 = vector.shape_cast %9 : vector<16x16x32xbf16> to vector<256x32xbf16>
    %c1_10 = arith.constant 1 : index
    %c0_11 = arith.constant 0 : index
    %c0_12 = arith.constant 0 : index
    %11 = vector.load %arg2[%c1_10, %c0_11, %c0_12] : memref<9x32x32xbf16, #tpu.memory_space<vmem>>, vector<1x32x32xbf16>
    %12 = vector.shape_cast %11 : vector<1x32x32xbf16> to vector<32x32xbf16>
    %cst_13 = arith.constant dense<0.000000e+00> : vector<256x32xf32>
    %13 = tpu.matmul %10, %12, %cst_13 {dimension_numbers = #tpu.dot_dimension_numbers<[1], [0], [0], [1], [0, 0, 1, 1], [], []>} : vector<256x32xbf16>, vector<32x32xbf16>, vector<256x32xf32> -> vector<256x32xf32>
    %14 = arith.addf %7, %13 : vector<256x32xf32>
    %c0_14 = arith.constant 0 : index
    %c0_15 = arith.constant 0 : index
    %c2 = arith.constant 2 : index
    %c0_16 = arith.constant 0 : index
    %15 = vector.load %arg1[%c0_14, %c0_15, %c2, %c0_16] : memref<1x18x18x32xbf16, #tpu.memory_space<vmem>>, vector<1x16x16x32xbf16>
    %16 = vector.shape_cast %15 : vector<1x16x16x32xbf16> to vector<16x16x32xbf16>
    %17 = vector.shape_cast %16 : vector<16x16x32xbf16> to vector<256x32xbf16>
    %c2_17 = arith.constant 2 : index
    %c0_18 = arith.constant 0 : index
    %c0_19 = arith.constant 0 : index
    %18 = vector.load %arg2[%c2_17, %c0_18, %c0_19] : memref<9x32x32xbf16, #tpu.memory_space<vmem>>, vector<1x32x32xbf16>
    %19 = vector.shape_cast %18 : vector<1x32x32xbf16> to vector<32x32xbf16>
    %cst_20 = arith.constant dense<0.000000e+00> : vector<256x32xf32>
    %20 = tpu.matmul %17, %19, %cst_20 {dimension_numbers = #tpu.dot_dimension_numbers<[1], [0], [0], [1], [0, 0, 1, 1], [], []>} : vector<256x32xbf16>, vector<32x32xbf16>, vector<256x32xf32> -> vector<256x32xf32>
    %21 = arith.addf %14, %20 : vector<256x32xf32>
    %c0_21 = arith.constant 0 : index
    %c1_22 = arith.constant 1 : index
    %c0_23 = arith.constant 0 : index
    %c0_24 = arith.constant 0 : index
    %22 = vector.load %arg1[%c0_21, %c1_22, %c0_23, %c0_24] : memref<1x18x18x32xbf16, #tpu.memory_space<vmem>>, vector<1x16x16x32xbf16>
    %23 = vector.shape_cast %22 : vector<1x16x16x32xbf16> to vector<16x16x32xbf16>
    %24 = vector.shape_cast %23 : vector<16x16x32xbf16> to vector<256x32xbf16>
    %c3 = arith.constant 3 : index
    %c0_25 = arith.constant 0 : index
    %c0_26 = arith.constant 0 : index
    %25 = vector.load %arg2[%c3, %c0_25, %c0_26] : memref<9x32x32xbf16, #tpu.memory_space<vmem>>, vector<1x32x32xbf16>
    %26 = vector.shape_cast %25 : vector<1x32x32xbf16> to vector<32x32xbf16>
    %cst_27 = arith.constant dense<0.000000e+00> : vector<256x32xf32>
    %27 = tpu.matmul %24, %26, %cst_27 {dimension_numbers = #tpu.dot_dimension_numbers<[1], [0], [0], [1], [0, 0, 1, 1], [], []>} : vector<256x32xbf16>, vector<32x32xbf16>, vector<256x32xf32> -> vector<256x32xf32>
    %28 = arith.addf %21, %27 : vector<256x32xf32>
    %c0_28 = arith.constant 0 : index
    %c1_29 = arith.constant 1 : index
    %c1_30 = arith.constant 1 : index
    %c0_31 = arith.constant 0 : index
    %29 = vector.load %arg1[%c0_28, %c1_29, %c1_30, %c0_31] : memref<1x18x18x32xbf16, #tpu.memory_space<vmem>>, vector<1x16x16x32xbf16>
    %30 = vector.shape_cast %29 : vector<1x16x16x32xbf16> to vector<16x16x32xbf16>
    %31 = vector.shape_cast %30 : vector<16x16x32xbf16> to vector<256x32xbf16>
    %c4 = arith.constant 4 : index
    %c0_32 = arith.constant 0 : index
    %c0_33 = arith.constant 0 : index
    %32 = vector.load %arg2[%c4, %c0_32, %c0_33] : memref<9x32x32xbf16, #tpu.memory_space<vmem>>, vector<1x32x32xbf16>
    %33 = vector.shape_cast %32 : vector<1x32x32xbf16> to vector<32x32xbf16>
    %cst_34 = arith.constant dense<0.000000e+00> : vector<256x32xf32>
    %34 = tpu.matmul %31, %33, %cst_34 {dimension_numbers = #tpu.dot_dimension_numbers<[1], [0], [0], [1], [0, 0, 1, 1], [], []>} : vector<256x32xbf16>, vector<32x32xbf16>, vector<256x32xf32> -> vector<256x32xf32>
    %35 = arith.addf %28, %34 : vector<256x32xf32>
    %c0_35 = arith.constant 0 : index
    %c1_36 = arith.constant 1 : index
    %c2_37 = arith.constant 2 : index
    %c0_38 = arith.constant 0 : index
    %36 = vector.load %arg1[%c0_35, %c1_36, %c2_37, %c0_38] : memref<1x18x18x32xbf16, #tpu.memory_space<vmem>>, vector<1x16x16x32xbf16>
    %37 = vector.shape_cast %36 : vector<1x16x16x32xbf16> to vector<16x16x32xbf16>
    %38 = vector.shape_cast %37 : vector<16x16x32xbf16> to vector<256x32xbf16>
    %c5 = arith.constant 5 : index
    %c0_39 = arith.constant 0 : index
    %c0_40 = arith.constant 0 : index
    %39 = vector.load %arg2[%c5, %c0_39, %c0_40] : memref<9x32x32xbf16, #tpu.memory_space<vmem>>, vector<1x32x32xbf16>
    %40 = vector.shape_cast %39 : vector<1x32x32xbf16> to vector<32x32xbf16>
    %cst_41 = arith.constant dense<0.000000e+00> : vector<256x32xf32>
    %41 = tpu.matmul %38, %40, %cst_41 {dimension_numbers = #tpu.dot_dimension_numbers<[1], [0], [0], [1], [0, 0, 1, 1], [], []>} : vector<256x32xbf16>, vector<32x32xbf16>, vector<256x32xf32> -> vector<256x32xf32>
    %42 = arith.addf %35, %41 : vector<256x32xf32>
    %c0_42 = arith.constant 0 : index
    %c2_43 = arith.constant 2 : index
    %c0_44 = arith.constant 0 : index
    %c0_45 = arith.constant 0 : index
    %43 = vector.load %arg1[%c0_42, %c2_43, %c0_44, %c0_45] : memref<1x18x18x32xbf16, #tpu.memory_space<vmem>>, vector<1x16x16x32xbf16>
    %44 = vector.shape_cast %43 : vector<1x16x16x32xbf16> to vector<16x16x32xbf16>
    %45 = vector.shape_cast %44 : vector<16x16x32xbf16> to vector<256x32xbf16>
    %c6 = arith.constant 6 : index
    %c0_46 = arith.constant 0 : index
    %c0_47 = arith.constant 0 : index
    %46 = vector.load %arg2[%c6, %c0_46, %c0_47] : memref<9x32x32xbf16, #tpu.memory_space<vmem>>, vector<1x32x32xbf16>
    %47 = vector.shape_cast %46 : vector<1x32x32xbf16> to vector<32x32xbf16>
    %cst_48 = arith.constant dense<0.000000e+00> : vector<256x32xf32>
    %48 = tpu.matmul %45, %47, %cst_48 {dimension_numbers = #tpu.dot_dimension_numbers<[1], [0], [0], [1], [0, 0, 1, 1], [], []>} : vector<256x32xbf16>, vector<32x32xbf16>, vector<256x32xf32> -> vector<256x32xf32>
    %49 = arith.addf %42, %48 : vector<256x32xf32>
    %c0_49 = arith.constant 0 : index
    %c2_50 = arith.constant 2 : index
    %c1_51 = arith.constant 1 : index
    %c0_52 = arith.constant 0 : index
    %50 = vector.load %arg1[%c0_49, %c2_50, %c1_51, %c0_52] : memref<1x18x18x32xbf16, #tpu.memory_space<vmem>>, vector<1x16x16x32xbf16>
    %51 = vector.shape_cast %50 : vector<1x16x16x32xbf16> to vector<16x16x32xbf16>
    %52 = vector.shape_cast %51 : vector<16x16x32xbf16> to vector<256x32xbf16>
    %c7 = arith.constant 7 : index
    %c0_53 = arith.constant 0 : index
    %c0_54 = arith.constant 0 : index
    %53 = vector.load %arg2[%c7, %c0_53, %c0_54] : memref<9x32x32xbf16, #tpu.memory_space<vmem>>, vector<1x32x32xbf16>
    %54 = vector.shape_cast %53 : vector<1x32x32xbf16> to vector<32x32xbf16>
    %cst_55 = arith.constant dense<0.000000e+00> : vector<256x32xf32>
    %55 = tpu.matmul %52, %54, %cst_55 {dimension_numbers = #tpu.dot_dimension_numbers<[1], [0], [0], [1], [0, 0, 1, 1], [], []>} : vector<256x32xbf16>, vector<32x32xbf16>, vector<256x32xf32> -> vector<256x32xf32>
    %56 = arith.addf %49, %55 : vector<256x32xf32>
    %c0_56 = arith.constant 0 : index
    %c2_57 = arith.constant 2 : index
    %c2_58 = arith.constant 2 : index
    %c0_59 = arith.constant 0 : index
    %57 = vector.load %arg1[%c0_56, %c2_57, %c2_58, %c0_59] : memref<1x18x18x32xbf16, #tpu.memory_space<vmem>>, vector<1x16x16x32xbf16>
    %58 = vector.shape_cast %57 : vector<1x16x16x32xbf16> to vector<16x16x32xbf16>
    %59 = vector.shape_cast %58 : vector<16x16x32xbf16> to vector<256x32xbf16>
    %c8 = arith.constant 8 : index
    %c0_60 = arith.constant 0 : index
    %c0_61 = arith.constant 0 : index
    %60 = vector.load %arg2[%c8, %c0_60, %c0_61] : memref<9x32x32xbf16, #tpu.memory_space<vmem>>, vector<1x32x32xbf16>
    %61 = vector.shape_cast %60 : vector<1x32x32xbf16> to vector<32x32xbf16>
    %cst_62 = arith.constant dense<0.000000e+00> : vector<256x32xf32>
    %62 = tpu.matmul %59, %61, %cst_62 {dimension_numbers = #tpu.dot_dimension_numbers<[1], [0], [0], [1], [0, 0, 1, 1], [], []>} : vector<256x32xbf16>, vector<32x32xbf16>, vector<256x32xf32> -> vector<256x32xf32>
    %63 = arith.addf %56, %62 : vector<256x32xf32>
    %c0_63 = arith.constant 0 : index
    %c0_64 = arith.constant 0 : index
    %64 = vector.load %arg3[%c0_63, %c0_64] : memref<1x32xf32, #tpu.memory_space<vmem>>, vector<1x32xf32>
    %65 = vector.broadcast %64 : vector<1x32xf32> to vector<256x32xf32>
    %66 = arith.addf %63, %65 : vector<256x32xf32>
    %cst_65 = arith.constant 0.000000e+00 : f32
    %67 = vector.broadcast %cst_65 : f32 to vector<256x32xf32>
    %68 = arith.maximumf %66, %67 : vector<256x32xf32>
    %69 = arith.truncf %68 : vector<256x32xf32> to vector<256x32xbf16>
    %c0_66 = arith.constant 0 : index
    %c0_67 = arith.constant 0 : index
    %70 = vector.load %arg4[%c0_66, %c0_67] : memref<32x15xbf16, #tpu.memory_space<vmem>>, vector<32x15xbf16>
    %cst_68 = arith.constant dense<0.000000e+00> : vector<256x15xf32>
    %71 = tpu.matmul %69, %70, %cst_68 {dimension_numbers = #tpu.dot_dimension_numbers<[1], [0], [0], [1], [0, 0, 1, 1], [], []>} : vector<256x32xbf16>, vector<32x15xbf16>, vector<256x15xf32> -> vector<256x15xf32>
    %c0_69 = arith.constant 0 : index
    %c0_70 = arith.constant 0 : index
    %72 = vector.load %arg5[%c0_69, %c0_70] : memref<1x15xf32, #tpu.memory_space<vmem>>, vector<1x15xf32>
    %73 = vector.broadcast %72 : vector<1x15xf32> to vector<256x15xf32>
    %74 = arith.addf %71, %73 : vector<256x15xf32>
    %c0_71 = arith.constant 0 : index
    %c0_72 = arith.constant 0 : index
    %c0_73 = arith.constant 0 : index
    %75 = vector.load %arg6[%c0_71, %c0_72, %c0_73] : memref<1x256x15xf32, #tpu.memory_space<vmem>>, vector<1x256x15xf32>
    %76 = vector.shape_cast %75 : vector<1x256x15xf32> to vector<256x15xf32>
    %77 = vector.shape_cast %74 : vector<256x15xf32> to vector<1x256x15xf32>
    tpu.vector_store %arg6[%c0_71, %c0_72, %c0_73], %77 {strides = array<i32>} : memref<1x256x15xf32, #tpu.memory_space<vmem>>, vector<1x256x15xf32>,
    return
  }
  func.func @transform_0(%arg0: i32) -> (i32, i32, i32, i32) {
    %c0_i32 = arith.constant 0 : i32
    %c0_i32_0 = arith.constant 0 : i32
    %c0_i32_1 = arith.constant 0 : i32
    %c0_i32_2 = arith.constant 0 : i32
    return %arg0, %c0_i32, %c0_i32_0, %c0_i32_1 : i32, i32, i32, i32
  }
  func.func @transform_1(%arg0: i32) -> (i32, i32, i32) {
    %c0_i32 = arith.constant 0 : i32
    %c0_i32_0 = arith.constant 0 : i32
    %c0_i32_1 = arith.constant 0 : i32
    %c0_i32_2 = arith.constant 0 : i32
    return %c0_i32, %c0_i32_0, %c0_i32_1 : i32, i32, i32
  }
  func.func @transform_2(%arg0: i32) -> (i32, i32) {
    %c0_i32 = arith.constant 0 : i32
    %c0_i32_0 = arith.constant 0 : i32
    %c0_i32_1 = arith.constant 0 : i32
    return %c0_i32, %c0_i32_0 : i32, i32
  }
  func.func @transform_3(%arg0: i32) -> (i32, i32) {
    %c0_i32 = arith.constant 0 : i32
    %c0_i32_0 = arith.constant 0 : i32
    %c0_i32_1 = arith.constant 0 : i32
    return %c0_i32, %c0_i32_0 : i32, i32
  }
  func.func @transform_4(%arg0: i32) -> (i32, i32) {
    %c0_i32 = arith.constant 0 : i32
    %c0_i32_0 = arith.constant 0 : i32
    %c0_i32_1 = arith.constant 0 : i32
    return %c0_i32, %c0_i32_0 : i32, i32
  }
  func.func @transform_5(%arg0: i32) -> (i32, i32, i32) {
    %c0_i32 = arith.constant 0 : i32
    %c0_i32_0 = arith.constant 0 : i32
    %c0_i32_1 = arith.constant 0 : i32
    return %arg0, %c0_i32, %c0_i32_0 : i32, i32, i32
  }
}

module attributes {stable_mosaic.version = 11 : i64} {
  func.func @_box_head_kernel(%arg0: i32, %arg1: memref<16x512xbf16, #tpu.memory_space<vmem>>, %arg2: memref<512x64xbf16, #tpu.memory_space<vmem>>, %arg3: memref<1x64xf32, #tpu.memory_space<vmem>>, %arg4: memref<64x64xbf16, #tpu.memory_space<vmem>>, %arg5: memref<1x64xf32, #tpu.memory_space<vmem>>, %arg6: memref<64x26xbf16, #tpu.memory_space<vmem>>, %arg7: memref<1x26xf32, #tpu.memory_space<vmem>>, %arg8: memref<16x26xf32, #tpu.memory_space<vmem>>) attributes {dimension_semantics = [#tpu.dimension_semantics<arbitrary>], iteration_bounds = array<i64: 1>, scalar_prefetch = 0 : i64, scratch_operands = 0 : i64, tpu.core_type = #tpu.core_type<tc>, window_params = [{pipeline_mode = #tpu.pipeline_mode<synchronous>, transform_indices = @transform_0, window_bounds = array<i64: 16, 512>}, {pipeline_mode = #tpu.pipeline_mode<synchronous>, transform_indices = @transform_1, window_bounds = array<i64: 512, 64>}, {pipeline_mode = #tpu.pipeline_mode<synchronous>, transform_indices = @transform_2, window_bounds = array<i64: 1, 64>}, {pipeline_mode = #tpu.pipeline_mode<synchronous>, transform_indices = @transform_3, window_bounds = array<i64: 64, 64>}, {pipeline_mode = #tpu.pipeline_mode<synchronous>, transform_indices = @transform_4, window_bounds = array<i64: 1, 64>}, {pipeline_mode = #tpu.pipeline_mode<synchronous>, transform_indices = @transform_5, window_bounds = array<i64: 64, 26>}, {pipeline_mode = #tpu.pipeline_mode<synchronous>, transform_indices = @transform_6, window_bounds = array<i64: 1, 26>}, {pipeline_mode = #tpu.pipeline_mode<synchronous>, transform_indices = @transform_7, window_bounds = array<i64: 16, 26>}]} {
    %c0 = arith.constant 0 : index
    %c0_0 = arith.constant 0 : index
    %0 = vector.load %arg1[%c0, %c0_0] : memref<16x512xbf16, #tpu.memory_space<vmem>>, vector<16x512xbf16>
    %c0_1 = arith.constant 0 : index
    %c0_2 = arith.constant 0 : index
    %1 = vector.load %arg2[%c0_1, %c0_2] : memref<512x64xbf16, #tpu.memory_space<vmem>>, vector<512x64xbf16>
    %cst = arith.constant dense<0.000000e+00> : vector<16x64xf32>
    %2 = tpu.matmul %0, %1, %cst {dimension_numbers = #tpu.dot_dimension_numbers<[1], [0], [0], [1], [0, 0, 1, 1], [], []>} : vector<16x512xbf16>, vector<512x64xbf16>, vector<16x64xf32> -> vector<16x64xf32>
    %c0_3 = arith.constant 0 : index
    %c0_4 = arith.constant 0 : index
    %3 = vector.load %arg3[%c0_3, %c0_4] : memref<1x64xf32, #tpu.memory_space<vmem>>, vector<1x64xf32>
    %4 = vector.broadcast %3 : vector<1x64xf32> to vector<16x64xf32>
    %5 = arith.addf %2, %4 : vector<16x64xf32>
    %cst_5 = arith.constant 0.000000e+00 : f32
    %6 = vector.broadcast %cst_5 : f32 to vector<16x64xf32>
    %7 = arith.maximumf %5, %6 : vector<16x64xf32>
    %8 = arith.truncf %7 : vector<16x64xf32> to vector<16x64xbf16>
    %c0_6 = arith.constant 0 : index
    %c0_7 = arith.constant 0 : index
    %9 = vector.load %arg4[%c0_6, %c0_7] : memref<64x64xbf16, #tpu.memory_space<vmem>>, vector<64x64xbf16>
    %cst_8 = arith.constant dense<0.000000e+00> : vector<16x64xf32>
    %10 = tpu.matmul %8, %9, %cst_8 {dimension_numbers = #tpu.dot_dimension_numbers<[1], [0], [0], [1], [0, 0, 1, 1], [], []>} : vector<16x64xbf16>, vector<64x64xbf16>, vector<16x64xf32> -> vector<16x64xf32>
    %c0_9 = arith.constant 0 : index
    %c0_10 = arith.constant 0 : index
    %11 = vector.load %arg5[%c0_9, %c0_10] : memref<1x64xf32, #tpu.memory_space<vmem>>, vector<1x64xf32>
    %12 = vector.broadcast %11 : vector<1x64xf32> to vector<16x64xf32>
    %13 = arith.addf %10, %12 : vector<16x64xf32>
    %cst_11 = arith.constant 0.000000e+00 : f32
    %14 = vector.broadcast %cst_11 : f32 to vector<16x64xf32>
    %15 = arith.maximumf %13, %14 : vector<16x64xf32>
    %16 = arith.truncf %15 : vector<16x64xf32> to vector<16x64xbf16>
    %c0_12 = arith.constant 0 : index
    %c0_13 = arith.constant 0 : index
    %17 = vector.load %arg6[%c0_12, %c0_13] : memref<64x26xbf16, #tpu.memory_space<vmem>>, vector<64x26xbf16>
    %cst_14 = arith.constant dense<0.000000e+00> : vector<16x26xf32>
    %18 = tpu.matmul %16, %17, %cst_14 {dimension_numbers = #tpu.dot_dimension_numbers<[1], [0], [0], [1], [0, 0, 1, 1], [], []>} : vector<16x64xbf16>, vector<64x26xbf16>, vector<16x26xf32> -> vector<16x26xf32>
    %c0_15 = arith.constant 0 : index
    %c0_16 = arith.constant 0 : index
    %19 = vector.load %arg7[%c0_15, %c0_16] : memref<1x26xf32, #tpu.memory_space<vmem>>, vector<1x26xf32>
    %20 = vector.broadcast %19 : vector<1x26xf32> to vector<16x26xf32>
    %21 = arith.addf %18, %20 : vector<16x26xf32>
    %c0_17 = arith.constant 0 : index
    %c0_18 = arith.constant 0 : index
    %22 = vector.load %arg8[%c0_17, %c0_18] : memref<16x26xf32, #tpu.memory_space<vmem>>, vector<16x26xf32>
    tpu.vector_store %arg8[%c0_17, %c0_18], %21 {strides = array<i32>} : memref<16x26xf32, #tpu.memory_space<vmem>>, vector<16x26xf32>,
    return
  }
  func.func @transform_0(%arg0: i32) -> (i32, i32) {
    %c0_i32 = arith.constant 0 : i32
    %c0_i32_0 = arith.constant 0 : i32
    %c0_i32_1 = arith.constant 0 : i32
    return %c0_i32, %c0_i32_0 : i32, i32
  }
  func.func @transform_1(%arg0: i32) -> (i32, i32) {
    %c0_i32 = arith.constant 0 : i32
    %c0_i32_0 = arith.constant 0 : i32
    %c0_i32_1 = arith.constant 0 : i32
    return %c0_i32, %c0_i32_0 : i32, i32
  }
  func.func @transform_2(%arg0: i32) -> (i32, i32) {
    %c0_i32 = arith.constant 0 : i32
    %c0_i32_0 = arith.constant 0 : i32
    %c0_i32_1 = arith.constant 0 : i32
    return %c0_i32, %c0_i32_0 : i32, i32
  }
  func.func @transform_3(%arg0: i32) -> (i32, i32) {
    %c0_i32 = arith.constant 0 : i32
    %c0_i32_0 = arith.constant 0 : i32
    %c0_i32_1 = arith.constant 0 : i32
    return %c0_i32, %c0_i32_0 : i32, i32
  }
  func.func @transform_4(%arg0: i32) -> (i32, i32) {
    %c0_i32 = arith.constant 0 : i32
    %c0_i32_0 = arith.constant 0 : i32
    %c0_i32_1 = arith.constant 0 : i32
    return %c0_i32, %c0_i32_0 : i32, i32
  }
  func.func @transform_5(%arg0: i32) -> (i32, i32) {
    %c0_i32 = arith.constant 0 : i32
    %c0_i32_0 = arith.constant 0 : i32
    %c0_i32_1 = arith.constant 0 : i32
    return %c0_i32, %c0_i32_0 : i32, i32
  }
  func.func @transform_6(%arg0: i32) -> (i32, i32) {
    %c0_i32 = arith.constant 0 : i32
    %c0_i32_0 = arith.constant 0 : i32
    %c0_i32_1 = arith.constant 0 : i32
    return %c0_i32, %c0_i32_0 : i32, i32
  }
  func.func @transform_7(%arg0: i32) -> (i32, i32) {
    %c0_i32 = arith.constant 0 : i32
    %c0_i32_0 = arith.constant 0 : i32
    %c0_i32_1 = arith.constant 0 : i32
    return %c0_i32, %c0_i32_0 : i32, i32
  }
}

</mosaic_0001>

<bundles_post_ra>
// kernel: generalized_rcnn_inference.3
= control target key start
LH: loop header
LB: loop body
LE: loop exit
PB: predicated region body
PF: predicated region fallthrough
CT: control target
= control target key end

     0   :  { %s717_s12 = smov 0   ;;  %s839_s0 = inlined_call_operand.vmem [shape: f32[512,27], index: 0, kind: input, shape index: {}]   ;;  %s840_s1 = inlined_call_operand.vmem [shape: f32[27,32], index: 1, kind: input, shape index: {}]   ;;  %s841_s2 = inlined_call_operand.vmem [shape: f32[1,32], index: 2, kind: input, shape index: {}]   ;;  %s842_s3 = inlined_call_operand.vmem [shape: bf16[512,32], index: 3, kind: output, shape index: {}]  }
   0x1 LB: > { %s552_s13 = sadd.s32 4294967295, %s694_s12   ;;  %p556_p0 = scmp.ge.s32.totalorder %s694_s12, 1  ;;  %s694_s12 = sphi %s717_s12, %s13_s12  }
   0x2   : > { %p138_p1 = scmp.lt.s32.totalorder %s694_s12, 5 }
   0x4   : > { %p139_p2 = pnand %p556_p0, %p138_p1 }
   0x5   : > { %v190_v0 = vld [vmem:[%s840_s1] sm:$0xff] (!%p139_p2)  ;;  %v191_v1 = vld [vmem:[%s840_s1 + $0x8] sm:$0xff] (!%p139_p2)  ;;  %v192_v2 = vld [vmem:[%s840_s1 + $0x10] sm:$0xff] (!%p139_p2)  ;;  %vm250_vm0 = vcmask (!%p139_p2), 1042432   ;;  %s557_s20 = sshll.u32 (!%p139_p2), %s552_s13, 4  ;;  %vm696_vm1 = vmmov (!%p139_p2), 1  }
   0x6   : > { %142 = sbr.rel (%p139_p2) target bundleno = 251 (0xfb), region = 32  ;;  %v665_v3 = vpack.c.bf16 (!%p139_p2), %v191_v1, %v190_v0  ;;  %v193_v4 = vld [vmem:[%s840_s1 + $0x18] sm:$0x7] (!%p139_p2)  ;;  %p163_p3 = scmp.lt.s32.totalorder (!%p139_p2), %s557_s20, 63  ;;  %vm670_vm2 = vmpackc.low (!%p139_p2), %vm250_vm0, %vm696_vm1  ;;  %vm201_vm3 = vcmask (!%p139_p2), 220160   ;;  %vm479_vm4 = vcmask (!%p139_p2), 257024  }
   0x7   : > { %v669_v5 = vpack.c.bf16 (!%p139_p2), %v193_v4, %v192_v2  ;;  %v780_v22 = vld [vmem:[%s841_s2] ss:$0 sm:$0xff] (!%p139_p2) }
   0x8   : > { %666 = vmatprep.subr.bf16.mxu0 (!%p139_p2), %v665_v3  ;;  %675 = vmatprep.subr.bf16.mxu1 (!%p139_p2), %v665_v3 }
   0x9   : > { %668 = vmatpush3.bf16.msra.mxu0 (!%p139_p2), %v665_v3  ;;  %677 = vmatpush3.bf16.msra.mxu1 (!%p139_p2), %v665_v3 }
   0xa   : > { %671 = vmatprep.subr.msk.bf16.mxu0 (!%p139_p2), %vm670_vm2, %v669_v5  ;;  %676 = vmatprep.subr.msk.bf16.mxu1 (!%p139_p2), %vm670_vm2, %v669_v5 }
   0xd   : > { %s844_s20 = smov (!%p163_p3, %s557_s20), 63  ;;  %674 = vmatpush3.bf16.msk.msra.mxu0 %vm670_vm2, %v669_v5  ;;  %678 = vmatpush3.bf16.msk.msra.mxu1 %vm670_vm2, %v669_v5 }
   0xe   : > { %s558_s23 = sshll.u32 %s844_s20, 3  ;;  %s560_s29 = sshll.u32 %s844_s20, 2 }
   0xf   : > { %s743_s26 = scalar_lea.vmem %s839_s0, %s558_s23  ;;  %s790_s5 = scalar_lea.vmem %s842_s3, %s560_s29 }
  0x10   : > { %v174_v6 = vld [vmem:[%s743_s26] sm:$0xff]  ;;  %v175_v8 = vld [vmem:[%s743_s26 + $0x8] sm:$0xff]  ;;  %v176_v10 = vld [vmem:[%s743_s26 + $0x10] sm:$0xff] }
  0x11   : > { %v182_v7 = vld [vmem:[%s743_s26 + $0x40] sm:$0xff]  ;;  %v183_v9 = vld [vmem:[%s743_s26 + $0x48] sm:$0xff]  ;;  %641 = vmatprep.mubr.msk.f32.mxu0 %vm201_vm3, %v174_v6  ;;  %v184_v11 = vld [vmem:[%s743_s26 + $0x50] sm:$0xff] }
  0x12   : > { %653 = vmatprep.mubr.msk.f32.mxu1 %vm201_vm3, %v182_v7  ;;  %642 = vmatmul.mubr.msk.f32.vlgmr.msra.gmra.mrb[0].mxu0 %vm201_vm3, %v175_v8  ;;  %v177_v12 = vld [vmem:[%s743_s26 + $0x18] sm:$0xff]  ;;  %v178_v14 = vld [vmem:[%s743_s26 + $0x20] sm:$0xff]  ;;  %v179_v16 = vld [vmem:[%s743_s26 + $0x28] sm:$0xff] }
  0x13   : > { %654 = vmatmul.mubr.msk.f32.vlgmr.msra.gmra.mrb[0].mxu1 %vm201_vm3, %v183_v9  ;;  %644 = vmatprep.mubr.msk.f32.mxu0 %vm201_vm3, %v176_v10  ;;  %v185_v13 = vld [vmem:[%s743_s26 + $0x58] sm:$0xff]  ;;  %v186_v15 = vld [vmem:[%s743_s26 + $0x60] sm:$0xff]  ;;  %v187_v17 = vld [vmem:[%s743_s26 + $0x68] sm:$0xff] }
  0x14   : > { %656 = vmatprep.mubr.msk.f32.mxu1 %vm201_vm3, %v184_v11  ;;  %v180_v18 = vld [vmem:[%s743_s26 + $0x30] sm:$0xff]  ;;  %v181_v20 = vld [vmem:[%s743_s26 + $0x38] sm:$0xff] }
  0x15   : > { %v188_v19 = vld [vmem:[%s743_s26 + $0x70] sm:$0xff]  ;;  %v189_v21 = vld [vmem:[%s743_s26 + $0x78] sm:$0xff] }
  0x16   : > { %645 = vmatmul.mubr.msk.f32.gmra.mrb[2].mxu0 %vm201_vm3, %v177_v12 }
  0x17   : > { %657 = vmatmul.mubr.msk.f32.gmra.mrb[2].mxu1 %vm201_vm3, %v185_v13  ;;  %647 = vmatprep.mubr.msk.f32.mxu0 %vm201_vm3, %v178_v14 }
  0x18   : > { %659 = vmatprep.mubr.msk.f32.mxu1 %vm201_vm3, %v186_v15 }
  0x1a   : > { %648 = vmatmul.mubr.msk.f32.gmra.mrb[4].mxu0 %vm201_vm3, %v179_v16 }
  0x1b   : > { %660 = vmatmul.mubr.msk.f32.gmra.mrb[4].mxu1 %vm201_vm3, %v187_v17  ;;  %650 = vmatprep.mubr.msk.f32.mxu0 %vm201_vm3, %v180_v18 }
  0x1c   : > { %662 = vmatprep.mubr.msk.f32.mxu1 %vm201_vm3, %v188_v19 }
  0x1e   : > { %651 = vmatmul.mubr.msk.f32.gmra.mrb[6].mxu0 %vm201_vm3, %v181_v20 }
  0x1f   : > { %663 = vmatmul.mubr.msk.f32.gmra.mrb[6].mxu1 %vm201_vm3, %v189_v21 }
  0xe5   : > { %v643_v23 = vpop.f32.mrb[0].mxu0 }
  0xe6   : > { %v655_v24 = vpop.f32.mrb[0].mxu1  ;;  %v326_v25 = vadd.f32 %v643_v23, %v780_v22  ;;  %v320_v27 = vpop.f32.mrb[1].mxu0 }
  0xe7   : > { %v366_v26 = vadd.f32 %v655_v24, %v780_v22  ;;  %v360_v28 = vpop.f32.mrb[1].mxu1  ;;  %v321_v29 = vadd.f32 %v780_v22, %v320_v27 }
  0xe8   : > { %v361_v30 = vadd.f32 %v780_v22, %v360_v28  ;;  %v400_v31 = vmax.f32 %v326_v25, 0.0 }
  0xe9   : > { %v408_v32 = vmax.f32 %v366_v26, 0.0  ;;  %v399_v33 = vmax.f32 %v321_v29, 0.0  ;;  %v646_v35 = vpop.f32.mrb[2].mxu0 }
  0xea   : > { %v407_v34 = vmax.f32 %v361_v30, 0.0  ;;  %v658_v36 = vpop.f32.mrb[2].mxu1  ;;  %v598_v37 = vpack.c.bf16 %v400_v31, %v400_v31  ;;  %v336_v39 = vadd.f32 %v646_v35, %v780_v22  ;;  %v330_v41 = vpop.f32.mrb[3].mxu0 }
  0xeb   : > { %v606_v38 = vpack.c.bf16 %v408_v32, %v408_v32  ;;  %v376_v40 = vadd.f32 %v658_v36, %v780_v22  ;;  %v370_v42 = vpop.f32.mrb[3].mxu1  ;;  %v597_v43 = vpack.c.bf16 %v399_v33, %v399_v33  ;;  %v331_v45 = vadd.f32 %v780_v22, %v330_v41 }
  0xec   : > { %v605_v44 = vpack.c.bf16 %v407_v34, %v407_v34  ;;  %v371_v46 = vadd.f32 %v780_v22, %v370_v42  ;;  %481 = vst.msk [vmem:[%s790_s5 + $0x4] sm:$0xf] %vm479_vm4, %v598_v37  ;;  %v402_v47 = vmax.f32 %v336_v39, 0.0 }
  0xed   : > { %489 = vst.msk [vmem:[%s790_s5 + $0x24] sm:$0xf] %vm479_vm4, %v606_v38  ;;  %v410_v48 = vmax.f32 %v376_v40, 0.0  ;;  %480 = vst.msk [vmem:[%s790_s5] sm:$0xf] %vm479_vm4, %v597_v43  ;;  %v401_v49 = vmax.f32 %v331_v45, 0.0 }
  0xee   : > { %488 = vst.msk [vmem:[%s790_s5 + $0x20] sm:$0xf] %vm479_vm4, %v605_v44  ;;  %v409_v50 = vmax.f32 %v371_v46, 0.0  ;;  %v649_v51 = vpop.f32.mrb[4].mxu0  ;;  %v661_v52 = vpop.f32.mrb[4].mxu1  ;;  %v600_v53 = vpack.c.bf16 %v402_v47, %v402_v47 }
  0xef   : > { %v608_v54 = vpack.c.bf16 %v410_v48, %v410_v48  ;;  %v346_v55 = vadd.f32 %v649_v51, %v780_v22  ;;  %v386_v56 = vadd.f32 %v661_v52, %v780_v22  ;;  %v340_v57 = vpop.f32.mrb[5].mxu0  ;;  %v380_v58 = vpop.f32.mrb[5].mxu1  ;;  %v599_v59 = vpack.c.bf16 %v401_v49, %v401_v49 }
  0xf0   : > { %v607_v60 = vpack.c.bf16 %v409_v50, %v409_v50  ;;  %v341_v61 = vadd.f32 %v780_v22, %v340_v57  ;;  %v381_v62 = vadd.f32 %v780_v22, %v380_v58  ;;  %483 = vst.msk [vmem:[%s790_s5 + $0xc] sm:$0xf] %vm479_vm4, %v600_v53 }
  0xf1   : > { %491 = vst.msk [vmem:[%s790_s5 + $0x2c] sm:$0xf] %vm479_vm4, %v608_v54  ;;  %v404_v63 = vmax.f32 %v346_v55, 0.0  ;;  %v412_v0 = vmax.f32 %v386_v56, 0.0  ;;  %482 = vst.msk [vmem:[%s790_s5 + $0x8] sm:$0xf] %vm479_vm4, %v599_v59 }
  0xf2   : > { %490 = vst.msk [vmem:[%s790_s5 + $0x28] sm:$0xf] %vm479_vm4, %v607_v60  ;;  %v403_v1 = vmax.f32 %v341_v61, 0.0  ;;  %v411_v2 = vmax.f32 %v381_v62, 0.0  ;;  %v652_v3 = vpop.f32.mrb[6].mxu0  ;;  %v664_v4 = vpop.f32.mrb[6].mxu1 }
  0xf3   : > { %v602_v5 = vpack.c.bf16 %v404_v63, %v404_v63  ;;  %v610_v6 = vpack.c.bf16 %v412_v0, %v412_v0  ;;  %v356_v7 = vadd.f32 %v652_v3, %v780_v22  ;;  %v396_v8 = vadd.f32 %v664_v4, %v780_v22  ;;  %v350_v9 = vpop.f32.mrb[7].mxu0  ;;  %v390_v10 = vpop.f32.mrb[7].mxu1 }
  0xf4   : > { %v601_v11 = vpack.c.bf16 %v403_v1, %v403_v1  ;;  %v609_v12 = vpack.c.bf16 %v411_v2, %v411_v2  ;;  %v351_v13 = vadd.f32 %v780_v22, %v350_v9  ;;  %v391_v14 = vadd.f32 %v780_v22, %v390_v10 }
  0xf5   : > { %485 = vst.msk [vmem:[%s790_s5 + $0x14] sm:$0xf] %vm479_vm4, %v602_v5  ;;  %493 = vst.msk [vmem:[%s790_s5 + $0x34] sm:$0xf] %vm479_vm4, %v610_v6  ;;  %v406_v15 = vmax.f32 %v356_v7, 0.0  ;;  %v414_v16 = vmax.f32 %v396_v8, 0.0 }
  0xf6   : > { %484 = vst.msk [vmem:[%s790_s5 + $0x10] sm:$0xf] %vm479_vm4, %v601_v11  ;;  %492 = vst.msk [vmem:[%s790_s5 + $0x30] sm:$0xf] %vm479_vm4, %v609_v12  ;;  %v405_v17 = vmax.f32 %v351_v13, 0.0  ;;  %v413_v18 = vmax.f32 %v391_v14, 0.0 }
  0xf7   : > { %v604_v19 = vpack.c.bf16 %v406_v15, %v406_v15  ;;  %v612_v20 = vpack.c.bf16 %v414_v16, %v414_v16 }
  0xf8   : > { %v603_v21 = vpack.c.bf16 %v405_v17, %v405_v17  ;;  %v611_v23 = vpack.c.bf16 %v413_v18, %v413_v18 }
  0xf9   : > { %487 = vst.msk [vmem:[%s790_s5 + $0x1c] sm:$0xf] %vm479_vm4, %v604_v19  ;;  %495 = vst.msk [vmem:[%s790_s5 + $0x3c] sm:$0xf] %vm479_vm4, %v612_v20 }
  0xfa   : > { %486 = vst.msk [vmem:[%s790_s5 + $0x18] sm:$0xf] %vm479_vm4, %v603_v21  ;;  %494 = vst.msk [vmem:[%s790_s5 + $0x38] sm:$0xf] %vm479_vm4, %v611_v23 }
  0xfb PF: > { %s13_s12 = sadd.s32 1, %s694_s12  }
  0xfc   : > { %p10_p4 = scmp.ge.s32.totalorder %s13_s12, 6  }
  0xfe   :  { %12 = sbr.rel (!%p10_p4) target bundleno = 1 (0x1), region = 62 }

// kernel: custom-call
= control target key start
LH: loop header
LB: loop body
LE: loop exit
PB: predicated region body
PF: predicated region fallthrough
CT: control target
= control target key end

     0   :  { %5 = vsyncpa [#allocation9], 0  ;;  %v1086_v0 = vmov 2147483648   ;;  %v1087_v1 = vmov 2147483647   ;;  %s1221_s0 = inlined_call_operand.vmem [shape: f32[2,768], index: 0, kind: input, shape index: {}]   ;;  %s1222_s1 = inlined_call_operand.hbm [shape: f32[2,8], index: 1, kind: output, shape index: {0}]   ;;  %s1223_s2 = inlined_call_operand.vmem [shape: s32[2,8], index: 2, kind: output, shape index: {1}]  }
   0x1   :  { %7 = vst [vmem:[#allocation12] sm:$0xff] %v1086_v0  ;;  %8 = vst [vmem:[#allocation14] sm:$0xff] %v1087_v1 }
   0x2   :  { %v1022_v2 = vld [vmem:[%s1221_s0 + $0x8] sm:$0xf]  ;;  %v43_v3 = vlaneseq  ;;  %v27_v4 = vld [vmem:[%s1221_s0] sm:$0xff]  ;;  %v1088_v5 = vmov 2147483648   ;;  %v1089_v6 = vmov 2147483647  }
   0x3   :  { %39 = vst [vmem:[#allocation16 + $0x8] sm:$0xf] %v1022_v2  ;;  %84 = vst [vmem:[#allocation13] sm:$0xff] %v1088_v5  ;;  %v54_v10 = vsub.s32 2147483647, %v27_v4  ;;  %vm53_vm0 = vcmp.lt.s32.totalorder %v27_v4, 0 }
   0x4   :  { %85 = vst [vmem:[#allocation15] sm:$0xff] %v1089_v6  ;;  %v1118_v7 = vshrl.u32 %v43_v3, 7  ;;  %v44_v8 = vand.u32 127, %v43_v3  ;;  %s1122_s0 = smov 0  }
   0x5   :  { %v55_v13 = vsel %vm53_vm0, %v54_v10, %v27_v4 }
   0x6   :  { %v47_v9 = vshrl.u32 %v1118_v7, 1 }
   0x8   :  { %v49_v11 = vmul.u32 128, %v47_v9 }
   0xa   :  { %v50_v12 = vadd.s32 %v49_v11, %v44_v8  ;;  %v61_v14 = vld [vmem:[#allocation16 + $0x8] sm:$0xff] }
   0xb   :  { %vm62_vm1 = vcmp.lt.s32.totalorder %v61_v14, 0  ;;  %v63_v15 = vsub.s32 2147483647, %v61_v14 }
   0xc   :  { %vm57_vm2 = vcmp.lt.s32.totalorder %v50_v12, 768  ;;  %v65_v16 = vadd.s32 512, %v50_v12  ;;  %79 = vst [vmem:[#allocation17] sm:$0xff] %v50_v12 }
   0xd   :  { %v58_v17 = vsel %vm57_vm2, %v55_v13, 2147483648  ;;  %v64_v18 = vsel %vm62_vm1, %v63_v15, %v61_v14 }
   0xe   :  { %59 = vst [vmem:[#allocation16] sm:$0xff] %v58_v17  ;;  %vm66_vm3 = vcmp.lt.s32.totalorder %v65_v16, 768  ;;  %82 = vst [vmem:[#allocation17 + $0x8] sm:$0xff] %v65_v16 }
   0xf   :  { %v67_v19 = vsel %vm66_vm3, %v64_v18, 2147483648 }
  0x10   :  { %68 = vst [vmem:[#allocation16 + $0x8] sm:$0xff] %v67_v19 }
  0x11 LB: > { %s419_s13 = scalar_lea.vmem [#allocation13], %s1084_s0  ;;  %s421_s14 = scalar_lea.vmem [#allocation15], %s1084_s0  ;;  %s1084_s0 = sphi %s1122_s0, %s92_s0  }
  0x12   : > { %s92_s0 = sadd.s32 1, %s1084_s0  }
  0x13   : > { %v94_v21 = vld [vmem:[#allocation17] sm:$0xff]  ;;  %p89_p2 = scmp.ge.s32.totalorder %s92_s0, 8  }
  0x14   :  { %s1095_s0 = smov (%p89_p2), [#allocation8]  }
  0x15   : > { %v93_v20 = vld [vmem:[#allocation16] sm:$0xff]  ;;  %v99_v23 = vld [vmem:[#allocation17 + $0x8] sm:$0xff] }
  0x16   : > { %vm103_vm6 = vcmp.lt.s32.totalorder %v99_v23, %v94_v21 }
  0x17   : > { %v97_v22 = vld [vmem:[#allocation16 + $0x8] sm:$0xff] }
  0x18   : > { %vm101_vm4 = vcmp.gt.s32.totalorder %v97_v22, %v93_v20  ;;  %vm102_vm5 = vcmp.eq.s32.totalorder %v97_v22, %v93_v20 }
  0x19   : > { %vm104_vm7 = vmand %vm102_vm5, %vm103_vm6 }
  0x1a   : > { %vm105_vm8 = vmor %vm101_vm4, %vm104_vm7 }
  0x1b   : > { %v106_v24 = vsel %vm105_vm8, %v97_v22, %v93_v20  ;;  %v107_v25 = vsel %vm105_vm8, %v99_v23, %v94_v21 }
  0x1c   : > { %v109_v26 = vrot.slane %v106_v24, 2  ;;  %v110_v27 = vrot.slane %v107_v25, 2 }
  0x1e   : > { %vm112_vm9 = vcmp.gt.s32.totalorder %v109_v26, %v106_v24  ;;  %vm113_vm10 = vcmp.eq.s32.totalorder %v109_v26, %v106_v24  ;;  %vm114_vm11 = vcmp.lt.s32.totalorder %v110_v27, %v107_v25 }
  0x1f   : > { %vm115_vm12 = vmand %vm113_vm10, %vm114_vm11 }
  0x20   : > { %vm116_vm13 = vmor %vm112_vm9, %vm115_vm12 }
  0x21   : > { %v117_v28 = vsel %vm116_vm13, %v109_v26, %v106_v24  ;;  %v118_v29 = vsel %vm116_vm13, %v110_v27, %v107_v25 }
  0x22   : > { %v120_v30 = vrot.slane %v117_v28, 2  ;;  %v121_v31 = vrot.slane %v118_v29, 2 }
  0x24   : > { %vm123_vm14 = vcmp.gt.s32.totalorder %v120_v30, %v117_v28  ;;  %vm124_vm15 = vcmp.eq.s32.totalorder %v120_v30, %v117_v28  ;;  %vm125_vm0 = vcmp.lt.s32.totalorder %v121_v31, %v118_v29 }
  0x25   : > { %vm126_vm1 = vmand %vm124_vm15, %vm125_vm0 }
  0x26   : > { %vm127_vm2 = vmor %vm123_vm14, %vm126_vm1 }
  0x27   : > { %v128_v32 = vsel %vm127_vm2, %v120_v30, %v117_v28  ;;  %v129_v33 = vsel %vm127_vm2, %v121_v31, %v118_v29 }
  0x28   : > { %v131_v34 = vrot.slane %v128_v32, 2  ;;  %v132_v35 = vrot.slane %v129_v33, 2 }
  0x2a   : > { %vm134_vm3 = vcmp.gt.s32.totalorder %v131_v34, %v128_v32  ;;  %vm135_vm4 = vcmp.eq.s32.totalorder %v131_v34, %v128_v32  ;;  %vm136_vm5 = vcmp.lt.s32.totalorder %v132_v35, %v129_v33 }
  0x2b   : > { %vm137_vm6 = vmand %vm135_vm4, %vm136_vm5 }
  0x2c   : > { %vm138_vm7 = vmor %vm134_vm3, %vm137_vm6 }
  0x2d   : > { %v140_v36 = vsel %vm138_vm7, %v132_v35, %v129_v33  ;;  %v139_v37 = vsel %vm138_vm7, %v131_v34, %v128_v32 }
  0x2e   : > { %174 = vxpose.xlu1.b32.start [1/16] %v140_v36, 128  ;;  %142 = vxpose.xlu0.b32.start [1/16] %v139_v37, 128 }
  0x32   : > { %175 = vxpose.xlu1.b32.cont [2/16] %v140_v36, 128  ;;  %143 = vxpose.xlu0.b32.cont [2/16] %v139_v37, 128 }
  0x36   : > { %176 = vxpose.xlu1.b32.cont [3/16] %v140_v36, 128  ;;  %144 = vxpose.xlu0.b32.cont [3/16] %v139_v37, 128 }
  0x3a   : > { %177 = vxpose.xlu1.b32.cont [4/16] %v140_v36, 128  ;;  %145 = vxpose.xlu0.b32.cont [4/16] %v139_v37, 128 }
  0x3e   : > { %178 = vxpose.xlu1.b32.cont [5/16] %v140_v36, 128  ;;  %146 = vxpose.xlu0.b32.cont [5/16] %v139_v37, 128 }
  0x42   : > { %179 = vxpose.xlu1.b32.cont [6/16] %v140_v36, 128  ;;  %147 = vxpose.xlu0.b32.cont [6/16] %v139_v37, 128 }
  0x46   : > { %180 = vxpose.xlu1.b32.cont [7/16] %v140_v36, 128  ;;  %148 = vxpose.xlu0.b32.cont [7/16] %v139_v37, 128 }
  0x4a   : > { %181 = vxpose.xlu1.b32.cont [8/16] %v140_v36, 128  ;;  %149 = vxpose.xlu0.b32.cont [8/16] %v139_v37, 128 }
  0x4e   : > { %182 = vxpose.xlu1.b32.cont [9/16] %v140_v36, 128  ;;  %150 = vxpose.xlu0.b32.cont [9/16] %v139_v37, 128 }
  0x52   : > { %183 = vxpose.xlu1.b32.cont [10/16] %v140_v36, 128  ;;  %151 = vxpose.xlu0.b32.cont [10/16] %v139_v37, 128 }
  0x56   : > { %184 = vxpose.xlu1.b32.cont [11/16] %v140_v36, 128  ;;  %152 = vxpose.xlu0.b32.cont [11/16] %v139_v37, 128 }
  0x5a   : > { %185 = vxpose.xlu1.b32.cont [12/16] %v140_v36, 128  ;;  %153 = vxpose.xlu0.b32.cont [12/16] %v139_v37, 128 }
  0x5e   : > { %186 = vxpose.xlu1.b32.cont [13/16] %v140_v36, 128  ;;  %154 = vxpose.xlu0.b32.cont [13/16] %v139_v37, 128 }
  0x62   : > { %187 = vxpose.xlu1.b32.cont [14/16] %v140_v36, 128  ;;  %155 = vxpose.xlu0.b32.cont [14/16] %v139_v37, 128 }
  0x66   : > { %188 = vxpose.xlu1.b32.cont [15/16] %v140_v36, 128  ;;  %156 = vxpose.xlu0.b32.cont [15/16] %v139_v37, 128 }
  0x6a   : > { %189 = vxpose.xlu1.b32.end [16/16] %v140_v36, 128  ;;  %157 = vxpose.xlu0.b32.end [16/16] %v139_v37, 128 }
  0xae   : > { %v190_v38 = vpop.trf.xlu1  ;;  %v158_v39 = vpop.trf.xlu0 }
  0xb2   : > { %v191_v40 = vpop.trf.xlu1  ;;  %v159_v41 = vpop.trf.xlu0 }
  0xb3   : > { %vm210_vm8 = vcmp.lt.s32.totalorder %v191_v40, %v190_v38  ;;  %vm208_vm9 = vcmp.gt.s32.totalorder %v159_v41, %v158_v39  ;;  %vm209_vm10 = vcmp.eq.s32.totalorder %v159_v41, %v158_v39 }
  0xb4   : > { %vm211_vm11 = vmand %vm209_vm10, %vm210_vm8 }
  0xb5   : > { %vm212_vm12 = vmor %vm208_vm9, %vm211_vm11 }
  0xb6   : > { %v213_v42 = vsel %vm212_vm12, %v159_v41, %v158_v39  ;;  %v192_v43 = vpop.trf.xlu1  ;;  %v214_v44 = vsel %vm212_vm12, %v191_v40, %v190_v38  ;;  %v160_v45 = vpop.trf.xlu0 }
  0xb7   : > { %vm219_vm13 = vcmp.lt.s32.totalorder %v192_v43, %v214_v44  ;;  %vm217_vm14 = vcmp.gt.s32.totalorder %v160_v45, %v213_v42  ;;  %vm218_vm15 = vcmp.eq.s32.totalorder %v160_v45, %v213_v42 }
  0xb8   : > { %vm220_vm0 = vmand %vm218_vm15, %vm219_vm13 }
  0xb9   : > { %vm221_vm1 = vmor %vm217_vm14, %vm220_vm0 }
  0xba   : > { %v222_v46 = vsel %vm221_vm1, %v160_v45, %v213_v42  ;;  %v193_v47 = vpop.trf.xlu1  ;;  %v223_v48 = vsel %vm221_vm1, %v192_v43, %v214_v44  ;;  %v161_v49 = vpop.trf.xlu0 }
  0xbb   : > { %vm228_vm2 = vcmp.lt.s32.totalorder %v193_v47, %v223_v48  ;;  %vm226_vm3 = vcmp.gt.s32.totalorder %v161_v49, %v222_v46  ;;  %vm227_vm4 = vcmp.eq.s32.totalorder %v161_v49, %v222_v46 }
  0xbc   : > { %vm229_vm5 = vmand %vm227_vm4, %vm228_vm2 }
  0xbd   : > { %vm230_vm6 = vmor %vm226_vm3, %vm229_vm5 }
  0xbe   : > { %v231_v50 = vsel %vm230_vm6, %v161_v49, %v222_v46  ;;  %v194_v51 = vpop.trf.xlu1  ;;  %v232_v52 = vsel %vm230_vm6, %v193_v47, %v223_v48  ;;  %v162_v53 = vpop.trf.xlu0 }
  0xbf   : > { %vm237_vm7 = vcmp.lt.s32.totalorder %v194_v51, %v232_v52  ;;  %vm235_vm8 = vcmp.gt.s32.totalorder %v162_v53, %v231_v50  ;;  %vm236_vm9 = vcmp.eq.s32.totalorder %v162_v53, %v231_v50 }
  0xc0   : > { %vm238_vm10 = vmand %vm236_vm9, %vm237_vm7 }
  0xc1   : > { %vm239_vm11 = vmor %vm235_vm8, %vm238_vm10 }
  0xc2   : > { %v240_v54 = vsel %vm239_vm11, %v162_v53, %v231_v50  ;;  %v195_v55 = vpop.trf.xlu1  ;;  %v241_v56 = vsel %vm239_vm11, %v194_v51, %v232_v52  ;;  %v163_v57 = vpop.trf.xlu0 }
  0xc3   : > { %vm246_vm12 = vcmp.lt.s32.totalorder %v195_v55, %v241_v56  ;;  %vm244_vm13 = vcmp.gt.s32.totalorder %v163_v57, %v240_v54  ;;  %vm245_vm14 = vcmp.eq.s32.totalorder %v163_v57, %v240_v54 }
  0xc4   : > { %vm247_vm15 = vmand %vm245_vm14, %vm246_vm12 }
  0xc5   : > { %vm248_vm0 = vmor %vm244_vm13, %vm247_vm15 }
  0xc6   : > { %v249_v58 = vsel %vm248_vm0, %v163_v57, %v240_v54  ;;  %v196_v59 = vpop.trf.xlu1  ;;  %v250_v60 = vsel %vm248_vm0, %v195_v55, %v241_v56  ;;  %v164_v61 = vpop.trf.xlu0 }
  0xc7   : > { %vm255_vm1 = vcmp.lt.s32.totalorder %v196_v59, %v250_v60  ;;  %vm253_vm2 = vcmp.gt.s32.totalorder %v164_v61, %v249_v58  ;;  %vm254_vm3 = vcmp.eq.s32.totalorder %v164_v61, %v249_v58 }
  0xc8   : > { %vm256_vm4 = vmand %vm254_vm3, %vm255_vm1 }
  0xc9   : > { %vm257_vm5 = vmor %vm253_vm2, %vm256_vm4 }
  0xca   : > { %v258_v62 = vsel %vm257_vm5, %v164_v61, %v249_v58  ;;  %v197_v63 = vpop.trf.xlu1  ;;  %v259_v0 = vsel %vm257_vm5, %v196_v59, %v250_v60  ;;  %v165_v1 = vpop.trf.xlu0 }
  0xcb   : > { %vm264_vm6 = vcmp.lt.s32.totalorder %v197_v63, %v259_v0  ;;  %vm262_vm7 = vcmp.gt.s32.totalorder %v165_v1, %v258_v62  ;;  %vm263_vm8 = vcmp.eq.s32.totalorder %v165_v1, %v258_v62 }
  0xcc   : > { %vm265_vm9 = vmand %vm263_vm8, %vm264_vm6 }
  0xcd   : > { %vm266_vm10 = vmor %vm262_vm7, %vm265_vm9 }
  0xce   : > { %v267_v2 = vsel %vm266_vm10, %v165_v1, %v258_v62  ;;  %v198_v4 = vpop.trf.xlu1  ;;  %v268_v5 = vsel %vm266_vm10, %v197_v63, %v259_v0  ;;  %v166_v6 = vpop.trf.xlu0 }
  0xcf   : > { %vm273_vm11 = vcmp.lt.s32.totalorder %v198_v4, %v268_v5  ;;  %vm271_vm12 = vcmp.gt.s32.totalorder %v166_v6, %v267_v2  ;;  %vm272_vm13 = vcmp.eq.s32.totalorder %v166_v6, %v267_v2 }
  0xd0   : > { %vm274_vm14 = vmand %vm272_vm13, %vm273_vm11 }
  0xd1   : > { %vm275_vm15 = vmor %vm271_vm12, %vm274_vm14 }
  0xd2   : > { %v276_v8 = vsel %vm275_vm15, %v166_v6, %v267_v2  ;;  %v199_v9 = vpop.trf.xlu1  ;;  %v277_v10 = vsel %vm275_vm15, %v198_v4, %v268_v5  ;;  %v167_v11 = vpop.trf.xlu0  ;;  %v1090_v6 = vmov 2147483648  }
  0xd3   : > { %vm282_vm0 = vcmp.lt.s32.totalorder %v199_v9, %v277_v10  ;;  %vm280_vm1 = vcmp.gt.s32.totalorder %v167_v11, %v276_v8  ;;  %vm281_vm2 = vcmp.eq.s32.totalorder %v167_v11, %v276_v8 }
  0xd4   : > { %vm283_vm3 = vmand %vm281_vm2, %vm282_vm0 }
  0xd5   : > { %vm284_vm4 = vmor %vm280_vm1, %vm283_vm3 }
  0xd6   : > { %v285_v12 = vsel %vm284_vm4, %v167_v11, %v276_v8  ;;  %v200_v13 = vpop.trf.xlu1  ;;  %v286_v14 = vsel %vm284_vm4, %v199_v9, %v277_v10  ;;  %v168_v15 = vpop.trf.xlu0  ;;  %v1091_v8 = vmov 2147483647  }
  0xd7   : > { %vm291_vm5 = vcmp.lt.s32.totalorder %v200_v13, %v286_v14  ;;  %vm289_vm6 = vcmp.gt.s32.totalorder %v168_v15, %v285_v12  ;;  %vm290_vm7 = vcmp.eq.s32.totalorder %v168_v15, %v285_v12 }
  0xd8   : > { %vm292_vm8 = vmand %vm290_vm7, %vm291_vm5 }
  0xd9   : > { %vm293_vm9 = vmor %vm289_vm6, %vm292_vm8 }
  0xda   : > { %v294_v16 = vsel %vm293_vm9, %v168_v15, %v285_v12  ;;  %v201_v17 = vpop.trf.xlu1  ;;  %v295_v18 = vsel %vm293_vm9, %v200_v13, %v286_v14  ;;  %v169_v19 = vpop.trf.xlu0  ;;  %v517_v13 = vld [vmem:[#allocation12] sm:$0xff] (%p89_p2)  ;;  %v518_v14 = vld [vmem:[#allocation14] sm:$0xff] (%p89_p2)  ;;  %v1092_v15 = vmov (%p89_p2), 839939668  }
  0xdb   : > { %vm300_vm10 = vcmp.lt.s32.totalorder %v201_v17, %v295_v18  ;;  %vm298_vm11 = vcmp.gt.s32.totalorder %v169_v19, %v294_v16  ;;  %vm299_vm12 = vcmp.eq.s32.totalorder %v169_v19, %v294_v16 }
  0xdc   : > { %vm301_vm13 = vmand %vm299_vm12, %vm300_vm10 }
  0xdd   : > { %vm302_vm14 = vmor %vm298_vm11, %vm301_vm13 }
  0xde   : > { %v303_v20 = vsel %vm302_vm14, %v169_v19, %v294_v16  ;;  %v202_v21 = vpop.trf.xlu1  ;;  %v304_v22 = vsel %vm302_vm14, %v201_v17, %v295_v18  ;;  %v170_v23 = vpop.trf.xlu0  ;;  %v542_v16 = vunpack.c.l.s4 (%p89_p2), %v1092_v15  ;;  %v1093_v17 = vmov (%p89_p2), 1417023538  }
  0xdf   : > { %vm309_vm15 = vcmp.lt.s32.totalorder %v202_v21, %v304_v22  ;;  %vm307_vm0 = vcmp.gt.s32.totalorder %v170_v23, %v303_v20  ;;  %vm308_vm1 = vcmp.eq.s32.totalorder %v170_v23, %v303_v20  ;;  %v570_v18 = vunpack.c.l.s4 (%p89_p2), %v1093_v17 }
  0xe0   : > { %vm310_vm2 = vmand %vm308_vm1, %vm309_vm15  ;;  %v543_v19 = vunpack.c.0.s8 (%p89_p2), %v542_v16 }
  0xe1   : > { %vm311_vm3 = vmor %vm307_vm0, %vm310_vm2 }
  0xe2   : > { %v312_v24 = vsel %vm311_vm3, %v170_v23, %v303_v20  ;;  %v203_v25 = vpop.trf.xlu1  ;;  %v313_v26 = vsel %vm311_vm3, %v202_v21, %v304_v22  ;;  %v171_v27 = vpop.trf.xlu0  ;;  %v563_v23 = vand.u32 (%p89_p2), 4, %v1118_v7 }
  0xe3   : > { %vm318_vm4 = vcmp.lt.s32.totalorder %v203_v25, %v313_v26  ;;  %vm316_vm5 = vcmp.gt.s32.totalorder %v171_v27, %v312_v24  ;;  %vm317_vm6 = vcmp.eq.s32.totalorder %v171_v27, %v312_v24 }
  0xe4   : > { %vm319_vm7 = vmand %vm317_vm6, %vm318_vm4 }
  0xe5   : > { %vm320_vm8 = vmor %vm316_vm5, %vm319_vm7 }
  0xe6   : > { %v321_v28 = vsel %vm320_vm8, %v171_v27, %v312_v24  ;;  %v204_v29 = vpop.trf.xlu1  ;;  %v322_v30 = vsel %vm320_vm8, %v203_v25, %v313_v26  ;;  %v172_v31 = vpop.trf.xlu0  ;;  %v571_v25 = vunpack.c.0.s8 (%p89_p2), %v570_v18 }
  0xe7   : > { %vm327_vm9 = vcmp.lt.s32.totalorder %v204_v29, %v322_v30  ;;  %vm325_vm10 = vcmp.gt.s32.totalorder %v172_v31, %v321_v28  ;;  %vm326_vm11 = vcmp.eq.s32.totalorder %v172_v31, %v321_v28 }
  0xe8   : > { %vm328_vm12 = vmand %vm326_vm11, %vm327_vm9 }
  0xe9   : > { %vm329_vm13 = vmor %vm325_vm10, %vm328_vm12 }
  0xea   : > { %v330_v32 = vsel %vm329_vm13, %v172_v31, %v321_v28  ;;  %v205_v33 = vpop.trf.xlu1  ;;  %v331_v34 = vsel %vm329_vm13, %v204_v29, %v322_v30  ;;  %v173_v35 = vpop.trf.xlu0  ;;  %v1094_v31 = vmov (%p89_p2), 1732584193  }
  0xeb   : > { %vm336_vm14 = vcmp.lt.s32.totalorder %v205_v33, %v331_v34  ;;  %vm334_vm15 = vcmp.gt.s32.totalorder %v173_v35, %v330_v32  ;;  %vm335_vm0 = vcmp.eq.s32.totalorder %v173_v35, %v330_v32 }
  0xec   : > { %vm337_vm1 = vmand %vm335_vm0, %vm336_vm14 }
  0xed   : > { %vm338_vm2 = vmor %vm334_vm15, %vm337_vm1 }
  0xee   : > { %v339_v36 = vsel %vm338_vm2, %v173_v35, %v330_v32  ;;  %v340_v37 = vsel %vm338_vm2, %v205_v33, %v331_v34  ;;  %v598_v32 = vunpack.c.l.s4 (%p89_p2), %v1094_v31  ;;  %v1147_v33 = vsub.s32 (%p89_p2), %v571_v25, %v1118_v7 }
  0xef   : > { %v342_v38 = vrot.slane %v339_v36, 1  ;;  %v343_v39 = vrot.slane %v340_v37, 1  ;;  %v591_v34 = vand.u32 (%p89_p2), 2, %v1118_v7 }
  0xf1   : > { %vm345_vm3 = vcmp.gt.s32.totalorder %v342_v38, %v339_v36  ;;  %vm346_vm4 = vcmp.eq.s32.totalorder %v342_v38, %v339_v36  ;;  %vm347_vm5 = vcmp.lt.s32.totalorder %v343_v39, %v340_v37 }
  0xf2   : > { %vm348_vm6 = vmand %vm346_vm4, %vm347_vm5 }
  0xf3   : > { %vm349_vm7 = vmor %vm345_vm3, %vm348_vm6 }
  0xf4   : > { %v350_v40 = vsel %vm349_vm7, %v342_v38, %v339_v36  ;;  %v351_v41 = vsel %vm349_vm7, %v343_v39, %v340_v37  ;;  %v599_v37 = vunpack.c.0.s8 (%p89_p2), %v598_v32 }
  0xf5   : > { %v353_v42 = vrot.slane %v350_v40, 1  ;;  %v354_v43 = vrot.slane %v351_v41, 1 }
  0xf7   : > { %vm356_vm8 = vcmp.gt.s32.totalorder %v353_v42, %v350_v40  ;;  %vm357_vm9 = vcmp.eq.s32.totalorder %v353_v42, %v350_v40  ;;  %vm358_vm10 = vcmp.lt.s32.totalorder %v354_v43, %v351_v41 }
  0xf8   : > { %vm359_vm11 = vmand %vm357_vm9, %vm358_vm10 }
  0xf9   : > { %vm360_vm12 = vmor %vm356_vm8, %vm359_vm11 }
  0xfa   : > { %v361_v44 = vsel %vm360_vm12, %v353_v42, %v350_v40  ;;  %v362_v45 = vsel %vm360_vm12, %v354_v43, %v351_v41  ;;  %v1161_v42 = vsub.s32 (%p89_p2), %v599_v37, %v1118_v7 }
  0xfb   : > { %v364_v46 = vrot.slane %v361_v44, 1  ;;  %v365_v47 = vrot.slane %v362_v45, 1 }
  0xfd   : > { %vm369_vm13 = vcmp.lt.s32.totalorder %v365_v47, %v362_v45  ;;  %vm367_vm14 = vcmp.gt.s32.totalorder %v364_v46, %v361_v44  ;;  %vm368_vm15 = vcmp.eq.s32.totalorder %v364_v46, %v361_v44 }
  0xfe   : > { %vm370_vm0 = vmand %vm368_vm15, %vm369_vm13 }
  0xff   : > { %vm371_vm1 = vmor %vm367_vm14, %vm370_vm0 }
 0x100   : > { %v372_v48 = vsel %vm371_vm1, %v364_v46, %v361_v44  ;;  %v373_v49 = vsel %vm371_vm1, %v365_v47, %v362_v45  ;;  %v619_v46 = vand.u32 (%p89_p2), 1, %v1118_v7 }
 0x101   : > { %v375_v50 = vrot.slane %v372_v48, 1  ;;  %v376_v51 = vrot.slane %v373_v49, 1 }
 0x103   : > { %vm378_vm2 = vcmp.gt.s32.totalorder %v375_v50, %v372_v48  ;;  %vm379_vm3 = vcmp.eq.s32.totalorder %v375_v50, %v372_v48  ;;  %vm380_vm4 = vcmp.lt.s32.totalorder %v376_v51, %v373_v49 }
 0x104   : > { %vm381_vm5 = vmand %vm379_vm3, %vm380_vm4 }
 0x105   : > { %vm382_vm6 = vmor %vm378_vm2, %vm381_vm5 }
 0x106   : > { %v383_v52 = vsel %vm382_vm6, %v375_v50, %v372_v48  ;;  %v384_v53 = vsel %vm382_vm6, %v376_v51, %v373_v49 }
 0x107   : > { %v386_v54 = vrot.slane %v383_v52, 1  ;;  %v387_v55 = vrot.slane %v384_v53, 1 }
 0x109   : > { %vm389_vm7 = vcmp.gt.s32.totalorder %v386_v54, %v383_v52  ;;  %vm390_vm8 = vcmp.eq.s32.totalorder %v386_v54, %v383_v52  ;;  %vm391_vm9 = vcmp.lt.s32.totalorder %v387_v55, %v384_v53 }
 0x10a   : > { %vm392_vm10 = vmand %vm390_vm8, %vm391_vm9 }
 0x10b   : > { %vm393_vm11 = vmor %vm389_vm7, %vm392_vm10 }
 0x10c   : > { %v394_v56 = vsel %vm393_vm11, %v386_v54, %v383_v52  ;;  %v395_v57 = vsel %vm393_vm11, %v387_v55, %v384_v53 }
 0x10d   : > { %v397_v58 = vrot.slane %v394_v56, 1  ;;  %v398_v59 = vrot.slane %v395_v57, 1 }
 0x10f   : > { %vm400_vm12 = vcmp.gt.s32.totalorder %v397_v58, %v394_v56  ;;  %vm401_vm13 = vcmp.eq.s32.totalorder %v397_v58, %v394_v56  ;;  %vm402_vm14 = vcmp.lt.s32.totalorder %v398_v59, %v395_v57 }
 0x110   : > { %vm403_vm15 = vmand %vm401_vm13, %vm402_vm14  ;;  %vm1141_vm13 = vcmp.ne.s32.totalorder (%p89_p2), %v563_v23, 0 }
 0x111   : > { %vm404_vm0 = vmor %vm400_vm12, %vm403_vm15 }
 0x112   : > { %v405_v60 = vsel %vm404_vm0, %v397_v58, %v394_v56  ;;  %v406_v61 = vsel %vm404_vm0, %v398_v59, %v395_v57 }
 0x113   : > { %v408_v62 = vrot.slane %v405_v60, 1  ;;  %v409_v63 = vrot.slane %v406_v61, 1 }
 0x115   : > { %vm411_vm1 = vcmp.gt.s32.totalorder %v408_v62, %v405_v60  ;;  %vm412_vm2 = vcmp.eq.s32.totalorder %v408_v62, %v405_v60  ;;  %vm413_vm3 = vcmp.lt.s32.totalorder %v409_v63, %v406_v61 }
 0x116   : > { %vm414_vm4 = vmand %vm412_vm2, %vm413_vm3 }
 0x117   : > { %vm415_vm5 = vmor %vm411_vm1, %vm414_vm4 }
 0x118   : > { %v417_v0 = vsel %vm415_vm5, %v409_v63, %v406_v61  ;;  %v416_v1 = vsel %vm415_vm5, %v408_v62, %v405_v60 }
 0x119   : > { %424 = vxpose.xlu0.b32.start.end [1/1] (short) (narrow) %v417_v0, 8  ;;  %420 = vst [vmem:[%s419_s13] sm:$0x1] %v416_v1  ;;  %422 = vst [vmem:[%s421_s14] sm:$0x1] %v417_v0  ;;  %s958_s13 = sshll.u32 (%p89_p2), %s1095_s0, 4  ;;  %s959_s13 = int_to_ptr.vmem [resolvable:$true] %s958_s13 }
 0x11a   :  { %s1054_s14 = scalar_lea.vmem (%p89_p2), %s959_s13, 32  ;;  %p1059_p4 = scmp.lt.s32.totalorder (%p89_p2), %s959_s13, %s959_s13 }
 0x11b   :  { %p1055_p3 = scmp.ne.s32.totalorder (%p89_p2), %s959_s13, %s1054_s14  ;;  %p1060_p5 = scmp.lt.s32.totalorder (%p89_p2), %s1054_s14, %s1054_s14 }
 0x11d   :  { %p1061_p6 = por (%p89_p2), %p1060_p5, %p1059_p4 }
 0x11f   :  { %p1062_p7 = pnand (%p89_p2), %p1061_p6, %p1055_p3 }
 0x120   :  { %v505_v11 = vld [vmem:[#allocation13 + $0x7] ss:$-1 sm:$0xff] (%p89_p2)  ;;  %v511_v12 = vld [vmem:[#allocation15 + $0x7] ss:$-1 sm:$0xff] (%p89_p2) }
 0x121   :  { %vm523_vm8 = vcmp.gt.s32.totalorder (%p89_p2), %v517_v13, %v505_v11  ;;  %vm524_vm9 = vcmp.eq.s32.totalorder (%p89_p2), %v517_v13, %v505_v11  ;;  %vm525_vm10 = vcmp.lt.s32.totalorder (%p89_p2), %v518_v14, %v511_v12 }
 0x122   :  { %vm526_vm11 = vmand (%p89_p2), %vm524_vm9, %vm525_vm10  ;;  %vm1154_vm9 = vcmp.ne.s32.totalorder (%p89_p2), %v591_v34, 0 }
 0x123   :  { %vm527_vm12 = vmor (%p89_p2), %vm523_vm8, %vm526_vm11 }
 0x124   :  { %v528_v20 = vsel (%p89_p2), %vm527_vm12, %v517_v13, %v505_v11  ;;  %v530_v21 = vsel (%p89_p2), %vm527_vm12, %v505_v11, %v517_v13  ;;  %v532_v22 = vsel (%p89_p2), %vm527_vm12, %v518_v14, %v511_v12  ;;  %v534_v24 = vsel (%p89_p2), %vm527_vm12, %v511_v12, %v518_v14 }
 0x199   : > { %v440_v2 = vpop.trf.xlu0 }
 0x19a   : > { %v479_v4 = vrot.slane %v440_v2, 1  ;;  %1031 = vpush %v440_v2 }
 0x19c   : > { %1033 = vpush %v479_v4 }
 0x1cb   : > { %s1032_s15 = spop %1031 }
 0x1cc   : > { %s457_s16 = sshrl.u32 %s1032_s15, 9  ;;  %s459_s17 = ssub.s32 0, %s1032_s15 }
 0x1cd   : > { %p458_p0 = scmp.lt.s32.totalorder %s1032_s15, 0  ;;  %s1023_s18 = smin.u32 %s1032_s15, %s459_s17 }
 0x1ce   : > { %s461_s19 = sand.u32 511, %s1023_s18   ;;  %s1025_s20 = sshll.u32 %s457_s16, 3 }
 0x1cf   : > { %s462_s21 = ssub.s32 0, %s461_s19  ;;  %s1034_s22 = spop %1033 }
 0x1d0   : > { %s1231_s21 = smov (!%p458_p0, %s462_s21), %s461_s19  ;;  %s483_s26 = ssub.s32 0, %s1034_s22 }
 0x1d1   : > { %s464_s23 = sshrl.u32 %s1231_s21, 7  ;;  %s466_s24 = sand.u32 127, %s1231_s21  }
 0x1d2   : > { %s1024_s25 = sshll.u32 %s464_s23, 8  ;;  %s1027_s28 = smin.u32 %s1034_s22, %s483_s26 }
 0x1d3   : > { %s467_s27 = sadd.s32 %s1024_s25, %s466_s24  ;;  %p482_p1 = scmp.lt.s32.totalorder %s1034_s22, 0 }
 0x1d4   : > { %v469_v5 = vstv %s467_s27  ;;  %s485_s29 = sand.u32 511, %s1027_s28   ;;  %s473_s3 = scalar_lea.vmem [#allocation16], %s1025_s20 }
 0x1d5   : > { %vm471_vm6 = vcmp.eq.s32.totalorder %v43_v3, %v469_v5  ;;  %s486_s30 = ssub.s32 0, %s485_s29  ;;  %s476_s4 = scalar_lea.vmem [#allocation17], %s1025_s20 }
 0x1d6   : > { %474 = vst.msk [vmem:[%s473_s3] sm:$0xff] %vm471_vm6, %v1090_v6  ;;  %477 = vst.msk [vmem:[%s476_s4] sm:$0xff] %vm471_vm6, %v1091_v8  ;;  %s1233_s30 = smov (!%p482_p1, %s486_s30), %s485_s29  ;;  %s481_s5 = sshrl.u32 %s1034_s22, 9 }
 0x1d7   : > { %s488_s6 = sshrl.u32 %s1233_s30, 7  ;;  %s490_s7 = sand.u32 127, %s1233_s30  }
 0x1d8   : > { %s1028_s8 = sshll.u32 %s488_s6, 8  ;;  %s1029_s10 = sshll.u32 %s481_s5, 3 }
 0x1d9   : > { %s491_s9 = sadd.s32 %s1028_s8, %s490_s7  ;;  %s497_s11 = scalar_lea.vmem [#allocation16], %s1029_s10 }
 0x1da   : > { %v493_v9 = vstv %s491_s9  ;;  %s500_s12 = scalar_lea.vmem [#allocation17], %s1029_s10  ;;  %91 = sbr.rel (!%p89_p2) target bundleno = 17 (0x11), region = 107 }
 0x1db   : > { %v494_v10 = vadd.s32 128, %v493_v9 }
 0x1dd   : > { %vm495_vm7 = vcmp.eq.s32.totalorder %v43_v3, %v494_v10  ;;  %v1136_v3 = vsub.s32 (%p89_p2), %v543_v19, %v1118_v7 }
 0x1de   : > { %498 = vst.msk [vmem:[%s497_s11] sm:$0xff] %vm495_vm7, %v1090_v6  ;;  %501 = vst.msk [vmem:[%s500_s12] sm:$0xff] %vm495_vm7, %v1091_v8 }
 0x1df   :  { %v547_v26 = vrot.slane (%p89_p2), %v528_v20, %v1136_v3  ;;  %v554_v27 = vrot.slane (%p89_p2), %v532_v22, %v1136_v3  ;;  %v728_v28 = vrot.slane (%p89_p2), %v530_v21, %v1136_v3  ;;  %v735_v30 = vrot.slane (%p89_p2), %v534_v24, %v1136_v3 }
 0x1e1   :  { %vm556_vm14 = vcmp.gt.s32.totalorder %v528_v20, %v547_v26  ;;  %vm557_vm15 = vcmp.eq.s32.totalorder %v528_v20, %v547_v26  ;;  %vm558_vm0 = vcmp.lt.s32.totalorder %v532_v22, %v554_v27  ;;  %vm738_vm2 = vcmp.eq.s32.totalorder %v530_v21, %v728_v28 }
 0x1e2   :  { %vm559_vm1 = vmand %vm557_vm15, %vm558_vm0  ;;  %vm739_vm3 = vcmp.lt.s32.totalorder %v534_v24, %v735_v30  ;;  %vm737_vm5 = vcmp.gt.s32.totalorder %v530_v21, %v728_v28 }
 0x1e3   :  { %vm560_vm4 = vmor %vm556_vm14, %vm559_vm1 }
 0x1e4   :  { %vm565_vm6 = vmxor %vm560_vm4, %vm1141_vm13 }
 0x1e5   :  { %v566_v35 = vsel %vm565_vm6, %v528_v20, %v547_v26  ;;  %v567_v36 = vsel %vm565_vm6, %v532_v22, %v554_v27  ;;  %vm740_vm7 = vmand %vm738_vm2, %vm739_vm3 }
 0x1e6   :  { %v575_v38 = vrot.slane %v566_v35, %v1147_v33  ;;  %v582_v39 = vrot.slane %v567_v36, %v1147_v33  ;;  %vm741_vm8 = vmor %vm737_vm5, %vm740_vm7 }
 0x1e7   :  { %vm746_vm10 = vmxor %vm741_vm8, %vm1141_vm13 }
 0x1e8   :  { %vm584_vm11 = vcmp.gt.s32.totalorder %v566_v35, %v575_v38  ;;  %vm585_vm12 = vcmp.eq.s32.totalorder %v566_v35, %v575_v38  ;;  %vm586_vm14 = vcmp.lt.s32.totalorder %v567_v36, %v582_v39  ;;  %v747_v41 = vsel %vm746_vm10, %v530_v21, %v728_v28 }
 0x1e9   :  { %vm587_vm15 = vmand %vm585_vm12, %vm586_vm14  ;;  %v748_v43 = vsel %vm746_vm10, %v534_v24, %v735_v30  ;;  %v756_v44 = vrot.slane %v747_v41, %v1147_v33 }
 0x1ea   :  { %vm588_vm0 = vmor %vm584_vm11, %vm587_vm15  ;;  %v763_v45 = vrot.slane %v748_v43, %v1147_v33  ;;  %vm1170_vm11 = vcmp.ne.s32.totalorder %v619_v46, 0 }
 0x1eb   :  { %vm593_vm1 = vmxor %vm588_vm0, %vm1154_vm9  ;;  %vm765_vm2 = vcmp.gt.s32.totalorder %v747_v41, %v756_v44  ;;  %vm766_vm3 = vcmp.eq.s32.totalorder %v747_v41, %v756_v44 }
 0x1ec   :  { %v594_v47 = vsel %vm593_vm1, %v566_v35, %v575_v38  ;;  %v595_v48 = vsel %vm593_vm1, %v567_v36, %v582_v39  ;;  %vm767_vm4 = vcmp.lt.s32.totalorder %v748_v43, %v763_v45 }
 0x1ed   :  { %v603_v49 = vrot.slane %v594_v47, %v1161_v42  ;;  %v610_v50 = vrot.slane %v595_v48, %v1161_v42  ;;  %vm768_vm5 = vmand %vm766_vm3, %vm767_vm4 }
 0x1ee   :  { %vm769_vm6 = vmor %vm765_vm2, %vm768_vm5 }
 0x1ef   :  { %vm612_vm7 = vcmp.gt.s32.totalorder %v594_v47, %v603_v49  ;;  %vm613_vm8 = vcmp.eq.s32.totalorder %v594_v47, %v603_v49  ;;  %vm614_vm10 = vcmp.lt.s32.totalorder %v595_v48, %v610_v50  ;;  %vm774_vm12 = vmxor %vm769_vm6, %vm1154_vm9 }
 0x1f0   :  { %vm615_vm14 = vmand %vm613_vm8, %vm614_vm10  ;;  %v775_v7 = vsel %vm774_vm12, %v747_v41, %v756_v44  ;;  %v776_v52 = vsel %vm774_vm12, %v748_v43, %v763_v45 }
 0x1f1   :  { %vm616_vm15 = vmor %vm612_vm7, %vm615_vm14  ;;  %v784_v53 = vrot.slane %v775_v7, %v1161_v42  ;;  %v791_v54 = vrot.slane %v776_v52, %v1161_v42 }
 0x1f2   :  { %vm621_vm0 = vmxor %vm616_vm15, %vm1170_vm11 }
 0x1f3   :  { %v622_v55 = vsel %vm621_vm0, %v594_v47, %v603_v49  ;;  %v623_v56 = vsel %vm621_vm0, %v595_v48, %v610_v50  ;;  %vm793_vm1 = vcmp.gt.s32.totalorder %v775_v7, %v784_v53  ;;  %vm794_vm2 = vcmp.eq.s32.totalorder %v775_v7, %v784_v53 }
 0x1f4   :  { %v637_v57 = vrot.slane %v622_v55, %v1136_v3  ;;  %v644_v58 = vrot.slane %v623_v56, %v1136_v3  ;;  %vm795_vm3 = vcmp.lt.s32.totalorder %v776_v52, %v791_v54 }
 0x1f5   :  { %vm796_vm4 = vmand %vm794_vm2, %vm795_vm3 }
 0x1f6   :  { %vm646_vm5 = vcmp.gt.s32.totalorder %v622_v55, %v637_v57  ;;  %vm647_vm6 = vcmp.eq.s32.totalorder %v622_v55, %v637_v57  ;;  %vm648_vm7 = vcmp.lt.s32.totalorder %v623_v56, %v644_v58  ;;  %vm797_vm8 = vmor %vm793_vm1, %vm796_vm4 }
 0x1f7   :  { %vm649_vm10 = vmand %vm647_vm6, %vm648_vm7 }
 0x1f8   :  { %vm650_vm12 = vmor %vm646_vm5, %vm649_vm10 }
 0x1f9   :  { %vm655_vm14 = vmxor %vm650_vm12, %vm1141_vm13 }
 0x1fa   :  { %v656_v59 = vsel %vm655_vm14, %v622_v55, %v637_v57  ;;  %v657_v60 = vsel %vm655_vm14, %v623_v56, %v644_v58  ;;  %vm802_vm15 = vmxor %vm797_vm8, %vm1170_vm11 }
 0x1fb   :  { %v665_v61 = vrot.slane %v656_v59, %v1147_v33  ;;  %v672_v62 = vrot.slane %v657_v60, %v1147_v33  ;;  %v803_v63 = vsel %vm802_vm15, %v775_v7, %v784_v53  ;;  %v804_v0 = vsel %vm802_vm15, %v776_v52, %v791_v54 }
 0x1fc   :  { %v818_v1 = vrot.slane %v803_v63, %v1136_v3  ;;  %v825_v2 = vrot.slane %v804_v0, %v1136_v3 }
 0x1fd   :  { %vm674_vm0 = vcmp.gt.s32.totalorder %v656_v59, %v665_v61  ;;  %vm675_vm1 = vcmp.eq.s32.totalorder %v656_v59, %v665_v61  ;;  %vm676_vm2 = vcmp.lt.s32.totalorder %v657_v60, %v672_v62 }
 0x1fe   :  { %vm677_vm3 = vmand %vm675_vm1, %vm676_vm2  ;;  %vm828_vm4 = vcmp.eq.s32.totalorder %v803_v63, %v818_v1  ;;  %vm829_vm5 = vcmp.lt.s32.totalorder %v804_v0, %v825_v2  ;;  %vm827_vm7 = vcmp.gt.s32.totalorder %v803_v63, %v818_v1 }
 0x1ff   :  { %vm678_vm6 = vmor %vm674_vm0, %vm677_vm3 }
 0x200   :  { %vm683_vm8 = vmxor %vm678_vm6, %vm1154_vm9 }
 0x201   :  { %v684_v4 = vsel %vm683_vm8, %v656_v59, %v665_v61  ;;  %v685_v5 = vsel %vm683_vm8, %v657_v60, %v672_v62  ;;  %vm830_vm10 = vmand %vm828_vm4, %vm829_vm5 }
 0x202   :  { %v693_v6 = vrot.slane %v684_v4, %v1161_v42  ;;  %v700_v8 = vrot.slane %v685_v5, %v1161_v42  ;;  %vm831_vm12 = vmor %vm827_vm7, %vm830_vm10 }
 0x203   :  { %vm836_vm14 = vmxor %vm831_vm12, %vm1141_vm13 }
 0x204   :  { %vm702_vm15 = vcmp.gt.s32.totalorder %v684_v4, %v693_v6  ;;  %vm703_vm1 = vcmp.eq.s32.totalorder %v684_v4, %v693_v6  ;;  %vm704_vm2 = vcmp.lt.s32.totalorder %v685_v5, %v700_v8  ;;  %v837_v9 = vsel %vm836_vm14, %v803_v63, %v818_v1 }
 0x205   :  { %vm705_vm0 = vmand %vm703_vm1, %vm704_vm2  ;;  %v838_v10 = vsel %vm836_vm14, %v804_v0, %v825_v2  ;;  %v846_v11 = vrot.slane %v837_v9, %v1147_v33 }
 0x206   :  { %vm706_vm3 = vmor %vm702_vm15, %vm705_vm0  ;;  %v853_v12 = vrot.slane %v838_v10, %v1147_v33 }
 0x207   :  { %vm711_vm4 = vmxor %vm706_vm3, %vm1170_vm11  ;;  %vm855_vm5 = vcmp.gt.s32.totalorder %v837_v9, %v846_v11  ;;  %vm856_vm6 = vcmp.eq.s32.totalorder %v837_v9, %v846_v11 }
 0x208   :  { %v712_v13 = vsel %vm711_vm4, %v684_v4, %v693_v6  ;;  %v713_v14 = vsel %vm711_vm4, %v685_v5, %v700_v8  ;;  %vm857_vm7 = vcmp.lt.s32.totalorder %v838_v10, %v853_v12 }
 0x209   :  { %715 = vst [vmem:[#allocation12] sm:$0xff] %v712_v13  ;;  %716 = vst [vmem:[#allocation14] sm:$0xff] %v713_v14 }
 0x20a   :  { %vm858_vm13 = vmand %vm856_vm6, %vm857_vm7 }
 0x20b   :  { %vm859_vm8 = vmor %vm855_vm5, %vm858_vm13 }
 0x20c   :  { %vm864_vm10 = vmxor %vm859_vm8, %vm1154_vm9 }
 0x20d   :  { %v865_v15 = vsel %vm864_vm10, %v837_v9, %v846_v11  ;;  %v866_v16 = vsel %vm864_vm10, %v838_v10, %v853_v12 }
 0x20e   :  { %v874_v17 = vrot.slane %v865_v15, %v1161_v42  ;;  %v881_v18 = vrot.slane %v866_v16, %v1161_v42 }
 0x210   :  { %vm883_vm12 = vcmp.gt.s32.totalorder %v865_v15, %v874_v17  ;;  %vm884_vm14 = vcmp.eq.s32.totalorder %v865_v15, %v874_v17  ;;  %vm885_vm15 = vcmp.lt.s32.totalorder %v866_v16, %v881_v18  ;;  %v923_v21 = vld [vmem:[#allocation14] sm:$0xff]  ;;  %v899_v22 = vld [vmem:[#allocation12] sm:$0xff] }
 0x211   :  { %vm886_vm1 = vmand %vm884_vm14, %vm885_vm15  ;;  %924 = vxpose.xlu0.b32.start.end [1/1] (short) (narrow) %v923_v21, 8  ;;  %vm900_vm9 = vcmp.lt.s32.totalorder %v899_v22, 0  ;;  %v901_v23 = vsub.s32 2147483647, %v899_v22 }
 0x212   :  { %vm887_vm2 = vmor %vm883_vm12, %vm886_vm1 }
 0x213   :  { %vm892_vm0 = vmxor %vm887_vm2, %vm1170_vm11  ;;  %v902_v24 = vsel %vm900_vm9, %v901_v23, %v899_v22 }
 0x214   :  { %v893_v19 = vsel %vm892_vm0, %v865_v15, %v874_v17  ;;  %v894_v20 = vsel %vm892_vm0, %v866_v16, %v881_v18  ;;  %903 = vst [vmem:[#allocation12] sm:$0xff] %v902_v24 }
 0x215   :  { %896 = vst [vmem:[#allocation13] sm:$0xff] %v893_v19  ;;  %897 = vst [vmem:[#allocation15] sm:$0xff] %v894_v20  ;;  %905 = vxpose.xlu0.b32.start.end [1/1] (short) (narrow) %v902_v24, 8 }
 0x291   :  { %v925_v3 = vpop.trf.xlu0 }
 0x292   :  { %941 = vst [vmem:[#allocation10] sm:$0xff] %v925_v3 }
 0x295   :  { %v906_v25 = vpop.trf.xlu0 }
 0x296   :  { %922 = vst [vmem:[#allocation7] sm:$0xff] %v906_v25 }
 0x299   :  { %v951_v26 = vld [vmem:[#allocation10] sm:$0x3] }
 0x29a   :  { %953 = vst [vmem:[#allocation11] sm:$0x3] %v951_v26 }
 0x29d   :  { %v945_v27 = vld [vmem:[#allocation7] sm:$0x3] }
 0x29e   :  { %947 = vst [vmem:[#allocation8] sm:$0x3] %v945_v27 }
 0x29f   :  { %1065 = shalt.err (!%p1062_p7)
}
 0x2a0   :  { %s1066_s17 = scalar_lea.hbm %s1222_s1, 32 }
 0x2a1   :  { %p1067_p8 = scmp.ne.s32.totalorder %s1222_s1, %s1066_s17  ;;  %p1070_p9 = scmp.lt.u32.totalorder %s1066_s17, %s1222_s1 }
 0x2a3   :  { %p1072_p10 = pnand %p1070_p9, %p1067_p8 }
 0x2a5   :  { %1075 = shalt.err (!%p1072_p10)
}
 0x2a6   :  { %961 = dma.vmem_to_hbm [thread:$0]  %s959_s13, 32, %s1222_s1, [#allocation9]   ;;  %v977_v28 = vld [vmem:[#allocation11] sm:$0x3] }
 0x2a7   :  { %978 = vst [vmem:[%s1223_s2] sm:$0x3] %v977_v28 }
 0x2a8   :  { %1080 = dma.done.wait [#allocation9], 32  }
 0x2a9   :  { %1081 = vsyncadd [#allocation9], 4294967264 }
 0x2aa   :  { %994 = vsyncpa [#allocation9], 1 }

// kernel: generalized_rcnn_inference.4
= control target key start
LH: loop header
LB: loop body
LE: loop exit
PB: predicated region body
PF: predicated region fallthrough
CT: control target
= control target key end

     0   :  { %s6876_s18 = smov 0   ;;  %s8849_s0 = inlined_call_operand.vmem [shape: bf16[2,18,18,32], index: 0, kind: input, shape index: {}]   ;;  %s8850_s1 = inlined_call_operand.vmem [shape: bf16[9,32,32], index: 1, kind: input, shape index: {}]   ;;  %s8851_s2 = inlined_call_operand.vmem [shape: f32[1,32], index: 2, kind: input, shape index: {}]   ;;  %s8852_s3 = inlined_call_operand.vmem [shape: bf16[32,15], index: 3, kind: input, shape index: {}]   ;;  %s8853_s4 = inlined_call_operand.vmem [shape: f32[1,15], index: 4, kind: input, shape index: {}]   ;;  %s8854_s5 = inlined_call_operand.vmem [shape: f32[2,256,15], index: 5, kind: output, shape index: {}]  }
   0x1 LB: > { %s5299_s19 = sadd.s32 4294967295, %s6844_s18   ;;  %p5303_p0 = scmp.ge.s32.totalorder %s6844_s18, 1  ;;  %s6844_s18 = sphi %s6876_s18, %s15_s18  }
   0x2   : > { %p187_p1 = scmp.lt.s32.totalorder %s6844_s18, 3 }
   0x4   : > { %p188_p2 = pnand %p5303_p0, %p187_p1 }
   0x6   : > { %191 = sbr.rel (%p188_p2) target bundleno = 861 (0x35d), region = 40 }
   0xd   : > { %v6713_v0 = vld [vmem:[%s8850_s1 + $0x40] sm:$0xff]   ;;  %p215_p3 = scmp.lt.s32.totalorder %s5299_s19, 1  ;;  %v6714_v1 = vld [vmem:[%s8850_s1 + $0x10] sm:$0xff]   ;;  %v6715_v2 = vld [vmem:[%s8850_s1 + $0x48] sm:$0xff]   ;;  %vm278_vm0 = vsmask.f32 3328 }
   0xe   : > { %6232 = vmatprep.subr.bf16.mxu0 %v6713_v0  ;;  %6088 = vmatprep.subr.bf16.mxu1 %v6714_v1  ;;  %v6716_v3 = vld [vmem:[%s8850_s1 + $0x18] sm:$0xff]   ;;  %v6902_v4 = vld [vmem:[%s8850_s1 + $0x50] sm:$0xff]   ;;  %vm279_vm1 = vsmask.f32 7440  ;;  %v8868_v29 = vmov 0  ;;  %vm730_vm3 = vcmask 261120  }
   0xf   : > { %s8927_s19 = smov (!%p215_p3, %s5299_s19), 1  ;;  %6233 = vmatpush3.bf16.msra.mxu0 %v6713_v0  ;;  %6089 = vmatpush3.bf16.msra.mxu1 %v6714_v1  ;;  %vm6926_vm2 = vmor %vm278_vm0, %vm279_vm1  ;;  %v6719_v1 = vld [vmem:[%s8850_s1] sm:$0xff]   ;;  %vm1289_vm4 = vcmask 1042432   ;;  %vm1290_vm5 = vcmask 1046532   ;;  %vm5211_vm7 = vcmask 121856  }
  0x10   : > { %6234 = vmatprep.subr.bf16.mxu0 %v6715_v2  ;;  %s6704_s28 = smul.u32 216, %s8927_s19  ;;  %6090 = vmatprep.subr.bf16.mxu1 %v6716_v3  ;;  %v8869_v29 = vsel %vm6926_vm2, 4294967295, %v8868_v29  ;;  %vm7305_vm6 = vmor %vm1289_vm4, %vm1290_vm5  ;;  %s5907_s22 = sshll.u32 %s8927_s19, 8 }
  0x11   : > { %8870 = vst [vmem:[#allocation2_spill] sm:$0xff] %v8869_v29  ;;  %s8748_s27 = scalar_lea.vmem %s8854_s5, %s5907_s22 }
  0x12   : > { %s6907_s8 = scalar_lea.vmem %s8849_s0, %s6704_s28 }
  0x13   : > { %6235 = vmatpush3.bf16.msra.mxu0 %v6715_v2  ;;  %v226_v5 = vld [vmem:[%s6907_s8] sm:$0xf]  ;;  %v227_v6 = vld [vmem:[%s6907_s8 + $0x4] sm:$0xf]  ;;  %v262_v7 = vld [vmem:[%s6907_s8 + $0x8] sm:$0x1]  ;;  %6091 = vmatpush3.bf16.msra.mxu1 %v6716_v3 }
  0x14   : > { %v282_v8 = vshrl.u32 %v226_v5, 16  ;;  %v285_v9 = vshll.u32 %v226_v5, 16  ;;  %v291_v10 = vshll.u32 %v227_v6, 16  ;;  %v295_v11 = vshrl.u32 %v227_v6, 16  ;;  %v5503_v12 = vld [vmem:[%s6907_s8 + $0xc] sm:$0xf]  ;;  %6268 = vmatprep.subr.bf16.mxu0 %v6902_v4  ;;  %6124 = vmatprep.subr.bf16.mxu1 %v6719_v1 }
  0x15   : > { %v301_v13 = vshll.u32 %v262_v7, 16  ;;  %v6915_v14 = vld [vmem:[%s6907_s8 + $0x10] sm:$0xf]  ;;  %v6918_v15 = vld [vmem:[%s6907_s8 + $0x14] sm:$0x1]  ;;  %v2130_v21 = vshrl.u32 %v5503_v12, 16 }
  0x16   : > { %v284_v16 = vrot.slane %v282_v8, 4  ;;  %v287_v17 = vrot.slane %v285_v9, 5  ;;  %v293_v18 = vrot.slane %v291_v10, 5  ;;  %v297_v19 = vrot.slane %v295_v11, 4  ;;  %v228_v28 = vld [vmem:[%s6907_s8 + $0xc] sm:$0xf] }
  0x17   : > { %v303_v20 = vrot.slane %v301_v13, 5  ;;  %v2133_v22 = vshll.u32 %v5503_v12, 16  ;;  %v2139_v23 = vshll.u32 %v6915_v14, 16  ;;  %v2143_v26 = vshrl.u32 %v6915_v14, 16  ;;  %v229_v33 = vld [vmem:[%s6907_s8 + $0x10] sm:$0xf] }
  0x18   : > { %v288_v24 = vor.u32 %v287_v17, %v284_v16  ;;  %v298_v25 = vor.u32 %v297_v19, %v293_v18  ;;  %v2149_v27 = vshll.u32 %v6918_v15, 16  ;;  %v2132_v30 = vrot.slane %v2130_v21, 4  ;;  %v263_v39 = vld [vmem:[%s6907_s8 + $0x14] sm:$0x1]  ;;  %v5506_v50 = vld [vmem:[%s6907_s8 + $0x18] sm:$0xf] }
  0x19   : > { %v2135_v31 = vrot.slane %v2133_v22, 5  ;;  %v2141_v32 = vrot.slane %v2139_v23, 5  ;;  %v2145_v36 = vrot.slane %v2143_v26, 4  ;;  %v306_v40 = vshrl.u32 %v228_v28, 16  ;;  %v6938_v55 = vld [vmem:[%s6907_s8 + $0x1c] sm:$0xf] }
  0x1a   : > { %v289_v34 = vrot.slane %v288_v24, 4  ;;  %v299_v35 = vrot.slane %v298_v25, 4  ;;  %v2151_v38 = vrot.slane %v2149_v27, 5  ;;  %v309_v41 = vshll.u32 %v228_v28, 16  ;;  %v6946_v60 = vld [vmem:[%s6907_s8 + $0x20] sm:$0x1] }
  0x1b   : > { %v2136_v37 = vor.u32 %v2135_v31, %v2132_v30  ;;  %v2146_v44 = vor.u32 %v2145_v36, %v2141_v32  ;;  %v315_v45 = vshll.u32 %v229_v33, 16  ;;  %v308_v48 = vrot.slane %v306_v40, 4  ;;  %v230_v11 = vld [vmem:[%s6907_s8 + $0x18] sm:$0xf]  ;;  %v264_v25 = vld [vmem:[%s6907_s8 + $0x20] sm:$0x1] }
  0x1c   : > { %v294_v42 = vsel %vm6926_vm2, %v289_v34, %v293_v18  ;;  %v304_v43 = vsel %vm6926_vm2, %v299_v35, %v303_v20  ;;  %v311_v49 = vrot.slane %v309_v41, 5  ;;  %v319_v53 = vshrl.u32 %v229_v33, 16  ;;  %v231_v18 = vld [vmem:[%s6907_s8 + $0x1c] sm:$0xf]  ;;  %v5509_v33 = vld [vmem:[%s6907_s8 + $0x24] sm:$0xf] }
  0x1d   : > { %v5311_v46 = vcombine.low %v294_v42, %v304_v43  ;;  %v2137_v47 = vrot.slane %v2136_v37, 4  ;;  %v2147_v51 = vrot.slane %v2146_v44, 4  ;;  %v317_v52 = vrot.slane %v315_v45, 5 }
  0x1e   : > { %v325_v54 = vshll.u32 %v263_v39, 16  ;;  %v2885_v57 = vrot.slane %v6915_v14, 5  ;;  %v2888_v58 = vrot.slane %v6918_v15, 5  ;;  %v312_v59 = vor.u32 %v311_v49, %v308_v48  ;;  %v6720_v39 = vld [vmem:[%s8850_s1 + $0x8] sm:$0xff]  }
  0x1f   : > { %6092 = vmatprep.mubr.msk.bf16.mxu1 %vm730_vm3, %v5311_v46  ;;  %v2142_v56 = vsel %vm6926_vm2, %v2137_v47, %v2141_v32  ;;  %v2152_v61 = vsel %vm6926_vm2, %v2147_v51, %v2151_v38  ;;  %v321_v62 = vrot.slane %v319_v53, 4  ;;  %v2154_v0 = vshrl.u32 %v5506_v50, 16  ;;  %v5510_v38 = vld [vmem:[%s6907_s8 + $0x28] sm:$0xf]  ;;  %v5511_v46 = vld [vmem:[%s6907_s8 + $0x2c] sm:$0x1] }
  0x20   : > { %v327_v63 = vrot.slane %v325_v54, 5  ;;  %v5555_v2 = vcombine.low %v2142_v56, %v2152_v61  ;;  %v313_v3 = vrot.slane %v312_v59, 4  ;;  %v2157_v5 = vshll.u32 %v5506_v50, 16  ;;  %v232_v53 = vld [vmem:[%s6907_s8 + $0x24] sm:$0xf] }
  0x21   : > { %v2163_v6 = vshll.u32 %v6938_v55, 16  ;;  %v322_v7 = vor.u32 %v321_v62, %v317_v52  ;;  %v2156_v8 = vrot.slane %v2154_v0, 4  ;;  %v2167_v9 = vshrl.u32 %v6938_v55, 16  ;;  %v233_v62 = vld [vmem:[%s6907_s8 + $0x28] sm:$0xf] }
  0x22   : > { %v2173_v10 = vshll.u32 %v6946_v60, 16  ;;  %6236 = vmatprep.mubr.msk.bf16.mxu0 %vm730_vm3, %v5555_v2  ;;  %v318_v12 = vsel %vm6926_vm2, %v313_v3, %v317_v52  ;;  %v2159_v13 = vrot.slane %v2157_v5, 5  ;;  %v2892_v17 = vrot.slane %v6938_v55, 5 }
  0x23   : > { %v2165_v16 = vrot.slane %v2163_v6, 5  ;;  %v323_v19 = vrot.slane %v322_v7, 4  ;;  %v2169_v20 = vrot.slane %v2167_v9, 4  ;;  %v2895_v22 = vrot.slane %v6946_v60, 5  ;;  %v265_v7 = vld [vmem:[%s6907_s8 + $0x2c] sm:$0x1] }
  0x24   : > { %v2175_v21 = vrot.slane %v2173_v10, 5  ;;  %v2160_v23 = vor.u32 %v2159_v13, %v2156_v8  ;;  %v6965_v24 = vrot.slane %v2892_v17, 4  ;;  %v330_v26 = vshrl.u32 %v230_v11, 16  ;;  %v6783_v60 = vld [vmem:[%s6907_s8 + $0x28] sm:$0xf] }
  0x25   : > { %v333_v27 = vshll.u32 %v230_v11, 16  ;;  %v328_v28 = vsel %vm6926_vm2, %v323_v19, %v327_v63  ;;  %v2170_v30 = vor.u32 %v2169_v20, %v2165_v16  ;;  %v339_v31 = vshll.u32 %v231_v18, 16  ;;  %v6718_v63 = vld [vmem:[%s8850_s1 + $0x58] sm:$0xff]  }
  0x26   : > { %v343_v32 = vshrl.u32 %v231_v18, 16  ;;  %v5312_v34 = vcombine.low %v318_v12, %v328_v28  ;;  %v2161_v35 = vrot.slane %v2160_v23, 4  ;;  %v332_v36 = vrot.slane %v330_v26, 4  ;;  %v5513_v23 = vld [vmem:[%s6907_s8 + $0x34] sm:$0xf] }
  0x27   : > { %v335_v37 = vrot.slane %v333_v27, 5  ;;  %v2171_v40 = vrot.slane %v2170_v30, 4  ;;  %v341_v41 = vrot.slane %v339_v31, 5  ;;  %v349_v43 = vshll.u32 %v264_v25, 16  ;;  %v6722_v25 = vld [vmem:[%s8850_s1 + $0x60] sm:$0xff]  }
  0x28   : > { %v345_v42 = vrot.slane %v343_v32, 4  ;;  %6093 = vmatmul.mubr.msk.bf16.vlgmr.msra.gmra.mrb[0].mxu1 %vm730_vm3, %v5312_v34  ;;  %v2166_v44 = vsel %vm6926_vm2, %v2161_v35, %v2165_v16  ;;  %v2178_v47 = vshrl.u32 %v5509_v33, 16  ;;  %v2181_v48 = vshll.u32 %v5509_v33, 16  ;;  %v5512_v16 = vld [vmem:[%s6907_s8 + $0x30] sm:$0xf] }
  0x29   : > { %v336_v45 = vor.u32 %v335_v37, %v332_v36  ;;  %v2176_v49 = vsel %vm6926_vm2, %v2171_v40, %v2175_v21  ;;  %v351_v51 = vrot.slane %v349_v43, 5  ;;  %v2187_v52 = vshll.u32 %v5510_v38, 16  ;;  %6125 = vmatpush3.bf16.msra.mxu1 %v6719_v1  ;;  %v5514_v32 = vld [vmem:[%s6907_s8 + $0x38] sm:$0x1]  ;;  %v234_v43 = vld [vmem:[%s6907_s8 + $0x30] sm:$0xf] }
  0x2a   : > { %v346_v50 = vor.u32 %v345_v42, %v341_v41  ;;  %v5556_v54 = vcombine.low %v2166_v44, %v2176_v49  ;;  %v2180_v59 = vrot.slane %v2178_v47, 4  ;;  %v2183_v61 = vrot.slane %v2181_v48, 5  ;;  %6126 = vmatprep.subr.bf16.mxu1 %v6720_v39  ;;  %v235_v48 = vld [vmem:[%s6907_s8 + $0x34] sm:$0xf] }
  0x2b   : > { %v337_v56 = vrot.slane %v336_v45, 4  ;;  %v2189_v2 = vrot.slane %v2187_v52, 5  ;;  %v2191_v3 = vshrl.u32 %v5510_v38, 16  ;;  %v2197_v5 = vshll.u32 %v5511_v46, 16 }
  0x2c   : > { %v347_v0 = vrot.slane %v346_v50, 4  ;;  %6237 = vmatmul.mubr.msk.bf16.vlgmr.msra.gmra.mrb[0].mxu0 %vm730_vm3, %v5556_v54  ;;  %v2184_v6 = vor.u32 %v2183_v61, %v2180_v59  ;;  %v354_v8 = vshrl.u32 %v232_v53, 16  ;;  %v357_v9 = vshll.u32 %v232_v53, 16  ;;  %v266_v53 = vld [vmem:[%s6907_s8 + $0x38] sm:$0x1] }
  0x2d   : > { %v342_v1 = vsel %vm6926_vm2, %v337_v56, %v341_v41  ;;  %6269 = vmatpush3.bf16.msra.mxu0 %v6902_v4  ;;  %v2193_v11 = vrot.slane %v2191_v3, 4  ;;  %v2199_v12 = vrot.slane %v2197_v5, 5  ;;  %v363_v13 = vshll.u32 %v233_v62, 16  ;;  %6127 = vmatpush3.bf16.msra.mxu1 %v6720_v39  ;;  %v5515_v3 = vld [vmem:[%s6907_s8 + $0x3c] sm:$0xf] }
  0x2e   : > { %v352_v10 = vsel %vm6926_vm2, %v347_v0, %v351_v51  ;;  %v2185_v19 = vrot.slane %v2184_v6, 4  ;;  %v356_v20 = vrot.slane %v354_v8, 4  ;;  %v359_v21 = vrot.slane %v357_v9, 5  ;;  %6270 = vmatprep.subr.bf16.mxu0 %v6718_v63  ;;  %v5516_v8 = vld [vmem:[%s6907_s8 + $0x40] sm:$0xf] }
  0x2f   : > { %v5313_v18 = vcombine.low %v342_v1, %v352_v10  ;;  %v2194_v4 = vor.u32 %v2193_v11, %v2189_v2  ;;  %v365_v26 = vrot.slane %v363_v13, 5  ;;  %v367_v27 = vshrl.u32 %v233_v62, 16 }
  0x30   : > { %v373_v28 = vshll.u32 %v265_v7, 16  ;;  %v2190_v30 = vsel %vm6926_vm2, %v2185_v19, %v2189_v2  ;;  %v360_v31 = vor.u32 %v359_v21, %v356_v20  ;;  %v2202_v33 = vshrl.u32 %v5512_v16, 16  ;;  %v5517_v19 = vld [vmem:[%s6907_s8 + $0x44] sm:$0x1] }
  0x31   : > { %6096 = vmatprep.mubr.msk.bf16.mxu1 %vm730_vm3, %v5313_v18  ;;  %v2205_v34 = vshll.u32 %v5512_v16, 16  ;;  %v2195_v35 = vrot.slane %v2194_v4, 4  ;;  %v369_v36 = vrot.slane %v367_v27, 4  ;;  %v2211_v38 = vshll.u32 %v5513_v23, 16  ;;  %6271 = vmatpush3.bf16.msra.mxu0 %v6718_v63 }
  0x32   : > { %v375_v37 = vrot.slane %v373_v28, 5  ;;  %v361_v39 = vrot.slane %v360_v31, 4  ;;  %v2204_v40 = vrot.slane %v2202_v33, 4  ;;  %v2215_v42 = vshrl.u32 %v5513_v23, 16  ;;  %6304 = vmatprep.subr.bf16.mxu0 %v6722_v25 }
  0x33   : > { %v2207_v41 = vrot.slane %v2205_v34, 5  ;;  %v2200_v44 = vsel %vm6926_vm2, %v2195_v35, %v2199_v12  ;;  %v370_v45 = vor.u32 %v369_v36, %v365_v26  ;;  %v2213_v46 = vrot.slane %v2211_v38, 5 }
  0x34   : > { %v2221_v47 = vshll.u32 %v5514_v32, 16  ;;  %v5557_v49 = vcombine.low %v2190_v30, %v2200_v44  ;;  %v366_v50 = vsel %vm6926_vm2, %v361_v39, %v365_v26  ;;  %v2217_v52 = vrot.slane %v2215_v42, 4  ;;  %v236_v26 = vld [vmem:[%s6907_s8 + $0x3c] sm:$0xf]  ;;  %v237_v32 = vld [vmem:[%s6907_s8 + $0x40] sm:$0xf] }
  0x35   : > { %v2208_v51 = vor.u32 %v2207_v41, %v2204_v40  ;;  %v371_v54 = vrot.slane %v370_v45, 4  ;;  %v378_v59 = vshrl.u32 %v234_v43, 16  ;;  %v381_v61 = vshll.u32 %v234_v43, 16  ;;  %v267_v44 = vld [vmem:[%s6907_s8 + $0x44] sm:$0x1] }
  0x36   : > { %v2223_v56 = vrot.slane %v2221_v47, 5  ;;  %6240 = vmatprep.mubr.msk.bf16.mxu0 %vm730_vm3, %v5557_v49  ;;  %v2218_v63 = vor.u32 %v2217_v52, %v2213_v46  ;;  %v387_v0 = vshll.u32 %v235_v48, 16  ;;  %v391_v2 = vshrl.u32 %v235_v48, 16 }
  0x37   : > { %v2209_v62 = vrot.slane %v2208_v51, 4  ;;  %v376_v5 = vsel %vm6926_vm2, %v371_v54, %v375_v37  ;;  %v380_v1 = vrot.slane %v378_v59, 4  ;;  %v383_v6 = vrot.slane %v381_v61, 5  ;;  %v5519_v51 = vld [vmem:[%s6907_s8 + $0x4c] sm:$0xf] }
  0x38   : > { %v397_v7 = vshll.u32 %v266_v53, 16  ;;  %v5314_v9 = vcombine.low %v366_v50, %v376_v5  ;;  %v2219_v11 = vrot.slane %v2218_v63, 4  ;;  %v389_v12 = vrot.slane %v387_v0, 5 }
  0x39   : > { %v2214_v10 = vsel %vm6926_vm2, %v2209_v62, %v2213_v46  ;;  %v384_v13 = vor.u32 %v383_v6, %v380_v1  ;;  %v393_v16 = vrot.slane %v391_v2, 4  ;;  %v2226_v20 = vshrl.u32 %v5515_v3, 16  ;;  %v5518_v46 = vld [vmem:[%s6907_s8 + $0x48] sm:$0xf] }
  0x3a   : > { %v399_v18 = vrot.slane %v397_v7, 5  ;;  %6097 = vmatmul.mubr.msk.bf16.gmra.mrb[4].mxu1 %vm730_vm3, %v5314_v9  ;;  %v2224_v21 = vsel %vm6926_vm2, %v2219_v11, %v2223_v56  ;;  %v2229_v23 = vshll.u32 %v5515_v3, 16  ;;  %v2235_v25 = vshll.u32 %v5516_v8, 16  ;;  %v5520_v3 = vld [vmem:[%s6907_s8 + $0x50] sm:$0x1] }
  0x3b   : > { %v2239_v4 = vshrl.u32 %v5516_v8, 16  ;;  %v5558_v27 = vcombine.low %v2214_v10, %v2224_v21  ;;  %v385_v28 = vrot.slane %v384_v13, 4  ;;  %v394_v30 = vor.u32 %v393_v16, %v389_v12  ;;  %v238_v6 = vld [vmem:[%s6907_s8 + $0x48] sm:$0xf]  ;;  %v239_v11 = vld [vmem:[%s6907_s8 + $0x4c] sm:$0xf] }
  0x3c   : > { %v2228_v31 = vrot.slane %v2226_v20, 4  ;;  %v2231_v33 = vrot.slane %v2229_v23, 5  ;;  %v2237_v34 = vrot.slane %v2235_v25, 5  ;;  %v2245_v36 = vshll.u32 %v5517_v19, 16  ;;  %v268_v23 = vld [vmem:[%s6907_s8 + $0x50] sm:$0x1] }
  0x3d   : > { %v2241_v35 = vrot.slane %v2239_v4, 4  ;;  %6241 = vmatmul.mubr.msk.bf16.gmra.mrb[4].mxu0 %vm730_vm3, %v5558_v27  ;;  %v390_v37 = vsel %vm6926_vm2, %v385_v28, %v389_v12  ;;  %v395_v38 = vrot.slane %v394_v30, 4  ;;  %v402_v39 = vshrl.u32 %v236_v26, 16  ;;  %v5521_v30 = vld [vmem:[%s6907_s8 + $0x54] sm:$0xf] }
  0x3e   : > { %v405_v40 = vshll.u32 %v236_v26, 16  ;;  %v2232_v41 = vor.u32 %v2231_v33, %v2228_v31  ;;  %v2247_v43 = vrot.slane %v2245_v36, 5  ;;  %v411_v45 = vshll.u32 %v237_v32, 16 }
  0x3f   : > { %v2242_v42 = vor.u32 %v2241_v35, %v2237_v34  ;;  %v400_v47 = vsel %vm6926_vm2, %v395_v38, %v399_v18  ;;  %v404_v48 = vrot.slane %v402_v39, 4  ;;  %v415_v50 = vshrl.u32 %v237_v32, 16  ;;  %v5522_v39 = vld [vmem:[%s6907_s8 + $0x58] sm:$0xf] }
  0x40   : > { %v407_v49 = vrot.slane %v405_v40, 5  ;;  %v5315_v52 = vcombine.low %v390_v37, %v400_v47  ;;  %v2233_v53 = vrot.slane %v2232_v41, 4  ;;  %v413_v56 = vrot.slane %v411_v45, 5  ;;  %v5523_v47 = vld [vmem:[%s6907_s8 + $0x5c] sm:$0x1] }
  0x41   : > { %v2243_v54 = vrot.slane %v2242_v42, 4  ;;  %v417_v61 = vrot.slane %v415_v50, 4  ;;  %v421_v62 = vshll.u32 %v267_v44, 16  ;;  %v2250_v63 = vshrl.u32 %v5518_v46, 16 }
  0x42   : > { %v408_v59 = vor.u32 %v407_v49, %v404_v48  ;;  %6100 = vmatprep.mubr.msk.bf16.mxu1 %vm730_vm3, %v5315_v52  ;;  %v2238_v0 = vsel %vm6926_vm2, %v2233_v53, %v2237_v34  ;;  %v2253_v5 = vshll.u32 %v5518_v46, 16  ;;  %v2259_v1 = vshll.u32 %v5519_v51, 16  ;;  %v240_v53 = vld [vmem:[%s6907_s8 + $0x54] sm:$0xf] }
  0x43   : > { %v2248_v2 = vsel %vm6926_vm2, %v2243_v54, %v2247_v43  ;;  %v418_v9 = vor.u32 %v417_v61, %v413_v56  ;;  %v423_v10 = vrot.slane %v421_v62, 5  ;;  %v2252_v12 = vrot.slane %v2250_v63, 4  ;;  %v241_v62 = vld [vmem:[%s6907_s8 + $0x58] sm:$0xf] }
  0x44   : > { %v5559_v7 = vcombine.low %v2238_v0, %v2248_v2  ;;  %v409_v8 = vrot.slane %v408_v59, 4  ;;  %v2255_v13 = vrot.slane %v2253_v5, 5  ;;  %v2261_v16 = vrot.slane %v2259_v1, 5 }
  0x45   : > { %v2263_v18 = vshrl.u32 %v5519_v51, 16  ;;  %v419_v20 = vrot.slane %v418_v9, 4  ;;  %v2269_v21 = vshll.u32 %v5520_v3, 16  ;;  %v426_v25 = vshrl.u32 %v238_v6, 16 }
  0x46   : > { %6244 = vmatprep.mubr.msk.bf16.mxu0 %vm730_vm3, %v5559_v7  ;;  %v414_v19 = vsel %vm6926_vm2, %v409_v8, %v413_v56  ;;  %v2256_v4 = vor.u32 %v2255_v13, %v2252_v12  ;;  %v429_v27 = vshll.u32 %v238_v6, 16  ;;  %v435_v28 = vshll.u32 %v239_v11, 16  ;;  %v269_v7 = vld [vmem:[%s6907_s8 + $0x5c] sm:$0x1]  ;;  %v5524_v13 = vld [vmem:[%s6907_s8 + $0x60] sm:$0xf] }
  0x47   : > { %v2265_v26 = vrot.slane %v2263_v18, 4  ;;  %v424_v31 = vsel %vm6926_vm2, %v419_v20, %v423_v10  ;;  %v2271_v32 = vrot.slane %v2269_v21, 5  ;;  %v428_v33 = vrot.slane %v426_v25, 4  ;;  %v5525_v21 = vld [vmem:[%s6907_s8 + $0x64] sm:$0xf] }
  0x48   : > { %v439_v34 = vshrl.u32 %v239_v11, 16  ;;  %v5316_v35 = vcombine.low %v414_v19, %v424_v31  ;;  %v2257_v36 = vrot.slane %v2256_v4, 4  ;;  %v431_v38 = vrot.slane %v429_v27, 5 }
  0x49   : > { %v2266_v37 = vor.u32 %v2265_v26, %v2261_v16  ;;  %v437_v40 = vrot.slane %v435_v28, 5  ;;  %v445_v42 = vshll.u32 %v268_v23, 16  ;;  %v2274_v43 = vshrl.u32 %v5521_v30, 16 }
  0x4a   : > { %v441_v41 = vrot.slane %v439_v34, 4  ;;  %6101 = vmatmul.mubr.msk.bf16.gmra.mrb[8].mxu1 %vm730_vm3, %v5316_v35  ;;  %v2262_v44 = vsel %vm6926_vm2, %v2257_v36, %v2261_v16  ;;  %v432_v46 = vor.u32 %v431_v38, %v428_v33  ;;  %v2277_v48 = vshll.u32 %v5521_v30, 16  ;;  %v5526_v30 = vld [vmem:[%s6907_s8 + $0x68] sm:$0x1] }
  0x4b   : > { %v2267_v45 = vrot.slane %v2266_v37, 4  ;;  %v447_v50 = vrot.slane %v445_v42, 5  ;;  %v2276_v51 = vrot.slane %v2274_v43, 4  ;;  %v2283_v52 = vshll.u32 %v5522_v39, 16  ;;  %v242_v37 = vld [vmem:[%s6907_s8 + $0x60] sm:$0xf] }
  0x4c   : > { %v442_v49 = vor.u32 %v441_v41, %v437_v40  ;;  %v433_v56 = vrot.slane %v432_v46, 4  ;;  %v2279_v59 = vrot.slane %v2277_v48, 5  ;;  %v2287_v61 = vshrl.u32 %v5522_v39, 16  ;;  %v243_v42 = vld [vmem:[%s6907_s8 + $0x64] sm:$0xf] }
  0x4d   : > { %v2272_v54 = vsel %vm6926_vm2, %v2267_v45, %v2271_v32  ;;  %v2285_v2 = vrot.slane %v2283_v52, 5  ;;  %v2293_v3 = vshll.u32 %v5523_v47, 16  ;;  %v450_v8 = vshrl.u32 %v240_v53, 16  ;;  %v270_v47 = vld [vmem:[%s6907_s8 + $0x68] sm:$0x1] }
  0x4e   : > { %v5560_v63 = vcombine.low %v2262_v44, %v2272_v54  ;;  %v443_v0 = vrot.slane %v442_v49, 4  ;;  %v438_v5 = vsel %vm6926_vm2, %v433_v56, %v437_v40  ;;  %v2280_v1 = vor.u32 %v2279_v59, %v2276_v51  ;;  %v5527_v52 = vld [vmem:[%s6907_s8 + $0x6c] sm:$0xf] }
  0x4f   : > { %v2289_v6 = vrot.slane %v2287_v61, 4  ;;  %v2295_v10 = vrot.slane %v2293_v3, 5  ;;  %v453_v11 = vshll.u32 %v240_v53, 16  ;;  %v459_v12 = vshll.u32 %v241_v62, 16  ;;  %v5528_v61 = vld [vmem:[%s6907_s8 + $0x70] sm:$0xf] }
  0x50   : > { %6245 = vmatmul.mubr.msk.bf16.gmra.mrb[8].mxu0 %vm730_vm3, %v5560_v63  ;;  %v448_v9 = vsel %vm6926_vm2, %v443_v0, %v447_v50  ;;  %v2281_v18 = vrot.slane %v2280_v1, 4  ;;  %v452_v20 = vrot.slane %v450_v8, 4  ;;  %v463_v4 = vshrl.u32 %v241_v62, 16 }
  0x51   : > { %v5317_v16 = vcombine.low %v438_v5, %v448_v9  ;;  %v2290_v19 = vor.u32 %v2289_v6, %v2285_v2  ;;  %v455_v23 = vrot.slane %v453_v11, 5  ;;  %v461_v25 = vrot.slane %v459_v12, 5  ;;  %v7081_v11 = vld [vmem:[%s6907_s8 + $0x74] sm:$0x1] }
  0x52   : > { %v469_v26 = vshll.u32 %v269_v7, 16  ;;  %v2286_v27 = vsel %vm6926_vm2, %v2281_v18, %v2285_v2  ;;  %v2298_v31 = vshrl.u32 %v5524_v13, 16  ;;  %v2301_v32 = vshll.u32 %v5524_v13, 16 }
  0x53   : > { %6104 = vmatprep.mubr.msk.bf16.mxu1 %vm730_vm3, %v5317_v16  ;;  %v2291_v28 = vrot.slane %v2290_v19, 4  ;;  %v456_v33 = vor.u32 %v455_v23, %v452_v20  ;;  %v465_v34 = vrot.slane %v463_v4, 4  ;;  %v2307_v36 = vshll.u32 %v5525_v21, 16  ;;  %v244_v19 = vld [vmem:[%s6907_s8 + $0x6c] sm:$0xf] }
  0x54   : > { %v471_v35 = vrot.slane %v469_v26, 5  ;;  %v2300_v39 = vrot.slane %v2298_v31, 4  ;;  %v2303_v40 = vrot.slane %v2301_v32, 5  ;;  %v2311_v41 = vshrl.u32 %v5525_v21, 16 }
  0x55   : > { %v2296_v38 = vsel %vm6926_vm2, %v2291_v28, %v2295_v10  ;;  %v457_v44 = vrot.slane %v456_v33, 4  ;;  %v466_v45 = vor.u32 %v465_v34, %v461_v25  ;;  %v2309_v46 = vrot.slane %v2307_v36, 5 }
  0x56   : > { %v5561_v43 = vcombine.low %v2286_v27, %v2296_v38  ;;  %v2304_v48 = vor.u32 %v2303_v40, %v2300_v39  ;;  %v2313_v49 = vrot.slane %v2311_v41, 4  ;;  %v2317_v50 = vshll.u32 %v5526_v30, 16  ;;  %v245_v30 = vld [vmem:[%s6907_s8 + $0x70] sm:$0xf] }
  0x57   : > { %v474_v51 = vshrl.u32 %v242_v37, 16  ;;  %v462_v53 = vsel %vm6926_vm2, %v457_v44, %v461_v25  ;;  %v467_v54 = vrot.slane %v466_v45, 4  ;;  %v477_v56 = vshll.u32 %v242_v37, 16  ;;  %v5530_v44 = vld [vmem:[%s6907_s8 + $0x78] sm:$0xf] }
  0x58   : > { %6248 = vmatprep.mubr.msk.bf16.mxu0 %vm730_vm3, %v5561_v43  ;;  %v483_v59 = vshll.u32 %v243_v42, 16  ;;  %v2305_v62 = vrot.slane %v2304_v48, 4  ;;  %v2314_v63 = vor.u32 %v2313_v49, %v2309_v46  ;;  %v2319_v0 = vrot.slane %v2317_v50, 5  ;;  %v7097_v49 = vld [vmem:[%s6907_s8 + $0x7c] sm:$0xf]  ;;  %v7102_v50 = vld [vmem:[%s8850_s1 + $0x20] sm:$0xff]  }
  0x59   : > { %v476_v2 = vrot.slane %v474_v51, 4  ;;  %v472_v3 = vsel %vm6926_vm2, %v467_v54, %v471_v35  ;;  %v479_v5 = vrot.slane %v477_v56, 5  ;;  %v487_v6 = vshrl.u32 %v243_v42, 16  ;;  %v271_v42 = vld [vmem:[%s6907_s8 + $0x74] sm:$0x1]  ;;  %6160 = vmatprep.subr.bf16.mxu1 %v7102_v50 }
  0x5a   : > { %v485_v1 = vrot.slane %v483_v59, 5  ;;  %v5318_v7 = vcombine.low %v462_v53, %v472_v3  ;;  %v2310_v8 = vsel %vm6926_vm2, %v2305_v62, %v2309_v46  ;;  %v2315_v9 = vrot.slane %v2314_v63, 4 }
  0x5b   : > { %v493_v10 = vshll.u32 %v270_v47, 16  ;;  %v480_v12 = vor.u32 %v479_v5, %v476_v2  ;;  %v489_v13 = vrot.slane %v487_v6, 4  ;;  %v2322_v16 = vshrl.u32 %v5527_v52, 16  ;;  %v7111_v2 = vld [vmem:[%s6907_s8 + $0x80] sm:$0x1] }
  0x5c   : > { %v2325_v18 = vshll.u32 %v5527_v52, 16  ;;  %6105 = vmatmul.mubr.msk.bf16.gmra.mrb[12].mxu1 %vm730_vm3, %v5318_v7  ;;  %v2320_v20 = vsel %vm6926_vm2, %v2315_v9, %v2319_v0  ;;  %v2331_v23 = vshll.u32 %v5528_v61, 16  ;;  %v2335_v25 = vshrl.u32 %v5528_v61, 16 }
  0x5d   : > { %v495_v21 = vrot.slane %v493_v10, 5  ;;  %v5562_v4 = vcombine.low %v2310_v8, %v2320_v20  ;;  %v481_v26 = vrot.slane %v480_v12, 4  ;;  %v490_v27 = vor.u32 %v489_v13, %v485_v1  ;;  %v247_v10 = vld [vmem:[%s6907_s8 + $0x7c] sm:$0xf] }
  0x5e   : > { %v2324_v28 = vrot.slane %v2322_v16, 4  ;;  %v2327_v31 = vrot.slane %v2325_v18, 5  ;;  %v2333_v32 = vrot.slane %v2331_v23, 5  ;;  %v2337_v33 = vrot.slane %v2335_v25, 4  ;;  %v272_v23 = vld [vmem:[%s6907_s8 + $0x80] sm:$0x1] }
  0x5f   : > { %v2341_v34 = vshll.u32 %v7081_v11, 16  ;;  %6249 = vmatmul.mubr.msk.bf16.gmra.mrb[12].mxu0 %vm730_vm3, %v5562_v4  ;;  %v486_v35 = vsel %vm6926_vm2, %v481_v26, %v485_v1  ;;  %v491_v36 = vrot.slane %v490_v27, 4  ;;  %v498_v37 = vshrl.u32 %v244_v19, 16  ;;  %v246_v1 = vld [vmem:[%s6907_s8 + $0x78] sm:$0xf] }
  0x60   : > { %v501_v38 = vshll.u32 %v244_v19, 16  ;;  %v2328_v39 = vor.u32 %v2327_v31, %v2324_v28  ;;  %v2338_v40 = vor.u32 %v2337_v33, %v2333_v32  ;;  %v507_v43 = vshll.u32 %v245_v30, 16 }
  0x61   : > { %v2343_v41 = vrot.slane %v2341_v34, 5  ;;  %v496_v45 = vsel %vm6926_vm2, %v491_v36, %v495_v21  ;;  %v500_v46 = vrot.slane %v498_v37, 4  ;;  %v511_v48 = vshrl.u32 %v245_v30, 16  ;;  %v5533_v30 = vld [vmem:[%s6907_s8 + $0x84] sm:$0xf] }
  0x62   : > { %v503_v47 = vrot.slane %v501_v38, 5  ;;  %v5319_v51 = vcombine.low %v486_v35, %v496_v45  ;;  %v2329_v52 = vrot.slane %v2328_v39, 4  ;;  %v2339_v53 = vrot.slane %v2338_v40, 4  ;;  %v7126_v39 = vld [vmem:[%s6907_s8 + $0x88] sm:$0xf] }
  0x63   : > { %v509_v54 = vrot.slane %v507_v43, 5  ;;  %v513_v59 = vrot.slane %v511_v48, 4  ;;  %v517_v61 = vshll.u32 %v271_v42, 16  ;;  %v2346_v62 = vshrl.u32 %v5530_v44, 16  ;;  %v7129_v40 = vld [vmem:[%s6907_s8 + $0x8c] sm:$0x1] }
  0x64   : > { %v504_v56 = vor.u32 %v503_v47, %v500_v46  ;;  %6108 = vmatprep.mubr.msk.bf16.mxu1 %vm730_vm3, %v5319_v51  ;;  %v2334_v63 = vsel %vm6926_vm2, %v2329_v52, %v2333_v32  ;;  %v2344_v0 = vsel %vm6926_vm2, %v2339_v53, %v2343_v41  ;;  %v2349_v3 = vshll.u32 %v5530_v44, 16  ;;  %v7132_v45 = vld [vmem:[%s6907_s8 + $0x84] sm:$0xf] }
  0x65   : > { %v2355_v5 = vshll.u32 %v7097_v49, 16  ;;  %v5563_v6 = vcombine.low %v2334_v63, %v2344_v0  ;;  %v514_v8 = vor.u32 %v513_v59, %v509_v54  ;;  %v519_v9 = vrot.slane %v517_v61, 5  ;;  %v7139_v59 = vld [vmem:[%s6907_s8 + $0x88] sm:$0xf] }
  0x66   : > { %v505_v7 = vrot.slane %v504_v56, 4  ;;  %v2348_v12 = vrot.slane %v2346_v62, 4  ;;  %v2351_v13 = vrot.slane %v2349_v3, 5  ;;  %v2359_v18 = vshrl.u32 %v7097_v49, 16  ;;  %v273_v3 = vld [vmem:[%s6907_s8 + $0x8c] sm:$0x1] }
  0x67   : > { %v2357_v16 = vrot.slane %v2355_v5, 5  ;;  %6252 = vmatprep.mubr.msk.bf16.mxu0 %vm730_vm3, %v5563_v6  ;;  %v515_v20 = vrot.slane %v514_v8, 4  ;;  %v2365_v21 = vshll.u32 %v7111_v2, 16  ;;  %v522_v25 = vshrl.u32 %v246_v1, 16  ;;  %v5536_v8 = vld [vmem:[%s6907_s8 + $0x90] sm:$0xf] }
  0x68   : > { %v510_v19 = vsel %vm6926_vm2, %v505_v7, %v509_v54  ;;  %v2352_v4 = vor.u32 %v2351_v13, %v2348_v12  ;;  %v2361_v26 = vrot.slane %v2359_v18, 4  ;;  %v525_v27 = vshll.u32 %v246_v1, 16 }
  0x69   : > { %v531_v28 = vshll.u32 %v247_v10, 16  ;;  %v520_v31 = vsel %vm6926_vm2, %v515_v20, %v519_v9  ;;  %v2367_v32 = vrot.slane %v2365_v21, 5  ;;  %v524_v33 = vrot.slane %v522_v25, 4 }
  0x6a   : > { %v535_v34 = vshrl.u32 %v247_v10, 16  ;;  %v5320_v35 = vcombine.low %v510_v19, %v520_v31  ;;  %v2353_v36 = vrot.slane %v2352_v4, 4  ;;  %v2362_v37 = vor.u32 %v2361_v26, %v2357_v16 }
  0x6b   : > { %v527_v38 = vrot.slane %v525_v27, 5  ;;  %v533_v41 = vrot.slane %v531_v28, 5  ;;  %v541_v43 = vshll.u32 %v272_v23, 16  ;;  %v2370_v44 = vshrl.u32 %v5533_v30, 16 }
  0x6c   : > { %v537_v42 = vrot.slane %v535_v34, 4  ;;  %6109 = vmatmul.mubr.msk.bf16.gmra.mrb[16].mxu1 %vm730_vm3, %v5320_v35  ;;  %v2358_v46 = vsel %vm6926_vm2, %v2353_v36, %v2357_v16  ;;  %v2363_v47 = vrot.slane %v2362_v37, 4  ;;  %v2373_v51 = vshll.u32 %v5533_v30, 16  ;;  %v7151_v16 = vld [vmem:[%s6907_s8 + $0x94] sm:$0xf] }
  0x6d   : > { %v528_v48 = vor.u32 %v527_v38, %v524_v33  ;;  %v543_v53 = vrot.slane %v541_v43, 5  ;;  %v2372_v54 = vrot.slane %v2370_v44, 4  ;;  %v2379_v56 = vshll.u32 %v7126_v39, 16  ;;  %v7163_v33 = vld [vmem:[%s6907_s8 + $0x90] sm:$0xf] }
  0x6e   : > { %v538_v52 = vor.u32 %v537_v42, %v533_v41  ;;  %v2368_v61 = vsel %vm6926_vm2, %v2363_v47, %v2367_v32  ;;  %v2375_v63 = vrot.slane %v2373_v51, 5  ;;  %v2383_v0 = vshrl.u32 %v7126_v39, 16  ;;  %v7160_v32 = vld [vmem:[%s6907_s8 + $0x98] sm:$0x1]  ;;  %v7173_v51 = vld [vmem:[%s6907_s8 + $0x94] sm:$0xf] }
  0x6f   : > { %v529_v62 = vrot.slane %v528_v48, 4  ;;  %v5564_v5 = vcombine.low %v2358_v46, %v2368_v61  ;;  %v2381_v6 = vrot.slane %v2379_v56, 5  ;;  %v2389_v7 = vshll.u32 %v7129_v40, 16  ;;  %v274_v61 = vld [vmem:[%s6907_s8 + $0x98] sm:$0x1] }
  0x70   : > { %v539_v1 = vrot.slane %v538_v52, 4  ;;  %v2376_v10 = vor.u32 %v2375_v63, %v2372_v54  ;;  %v2385_v12 = vrot.slane %v2383_v0, 4  ;;  %v546_v13 = vshrl.u32 %v7132_v45, 16 }
  0x71   : > { %v534_v9 = vsel %vm6926_vm2, %v529_v62, %v533_v41  ;;  %6253 = vmatmul.mubr.msk.bf16.gmra.mrb[16].mxu0 %vm730_vm3, %v5564_v5  ;;  %v2391_v19 = vrot.slane %v2389_v7, 5  ;;  %v549_v20 = vshll.u32 %v7132_v45, 16  ;;  %v555_v21 = vshll.u32 %v7139_v59, 16  ;;  %v5539_v5 = vld [vmem:[%s6907_s8 + $0x9c] sm:$0xf] }
  0x72   : > { %v544_v18 = vsel %vm6926_vm2, %v539_v1, %v543_v53  ;;  %v2377_v25 = vrot.slane %v2376_v10, 4  ;;  %v2386_v4 = vor.u32 %v2385_v12, %v2381_v6  ;;  %v548_v26 = vrot.slane %v546_v13, 4 }
  0x73   : > { %v5321_v23 = vcombine.low %v534_v9, %v544_v18  ;;  %v551_v27 = vrot.slane %v549_v20, 5  ;;  %v557_v28 = vrot.slane %v555_v21, 5  ;;  %v559_v30 = vshrl.u32 %v7139_v59, 16  ;;  %v7185_v9 = vld [vmem:[%s6907_s8 + $0xa0] sm:$0xf] }
  0x74   : > { %v565_v31 = vshll.u32 %v273_v3, 16  ;;  %v2382_v34 = vsel %vm6926_vm2, %v2377_v25, %v2381_v6  ;;  %v2387_v35 = vrot.slane %v2386_v4, 4  ;;  %v2394_v36 = vshrl.u32 %v5536_v8, 16  ;;  %v7191_v25 = vld [vmem:[%s6907_s8 + $0xa4] sm:$0x1] }
  0x75   : > { %6112 = vmatprep.mubr.msk.bf16.mxu1 %vm730_vm3, %v5321_v23  ;;  %v2397_v37 = vshll.u32 %v5536_v8, 16  ;;  %v552_v38 = vor.u32 %v551_v27, %v548_v26  ;;  %v561_v41 = vrot.slane %v559_v30, 4  ;;  %v2403_v43 = vshll.u32 %v7151_v16, 16 }
  0x76   : > { %v567_v42 = vrot.slane %v565_v31, 5  ;;  %v2392_v44 = vsel %vm6926_vm2, %v2387_v35, %v2391_v19  ;;  %v2396_v46 = vrot.slane %v2394_v36, 4  ;;  %v2407_v48 = vshrl.u32 %v7151_v16, 16  ;;  %v7196_v36 = vld [vmem:[%s6907_s8 + $0x9c] sm:$0xf] }
  0x77   : > { %v2399_v47 = vrot.slane %v2397_v37, 5  ;;  %v5565_v52 = vcombine.low %v2382_v34, %v2392_v44  ;;  %v553_v53 = vrot.slane %v552_v38, 4  ;;  %v562_v54 = vor.u32 %v561_v41, %v557_v28 }
  0x78   : > { %v2405_v56 = vrot.slane %v2403_v43, 5  ;;  %v2409_v63 = vrot.slane %v2407_v48, 4  ;;  %v2413_v0 = vshll.u32 %v7160_v32, 16  ;;  %v570_v3 = vshrl.u32 %v7163_v33, 16  ;;  %v7204_v48 = vld [vmem:[%s6907_s8 + $0xa0] sm:$0xf] }
  0x79   : > { %v2400_v62 = vor.u32 %v2399_v47, %v2396_v46  ;;  %6256 = vmatprep.mubr.msk.bf16.mxu0 %vm730_vm3, %v5565_v52  ;;  %v558_v1 = vsel %vm6926_vm2, %v553_v53, %v557_v28  ;;  %v563_v6 = vrot.slane %v562_v54, 4  ;;  %v573_v7 = vshll.u32 %v7163_v33, 16 }
  0x7a   : > { %v579_v8 = vshll.u32 %v7173_v51, 16  ;;  %v2410_v12 = vor.u32 %v2409_v63, %v2405_v56  ;;  %v2415_v13 = vrot.slane %v2413_v0, 5  ;;  %v572_v18 = vrot.slane %v570_v3, 4 }
  0x7b   : > { %v2401_v10 = vrot.slane %v2400_v62, 4  ;;  %v568_v19 = vsel %vm6926_vm2, %v563_v6, %v567_v42  ;;  %v575_v20 = vrot.slane %v573_v7, 5  ;;  %v583_v23 = vshrl.u32 %v7173_v51, 16  ;;  %v5542_v62 = vld [vmem:[%s6907_s8 + $0xa8] sm:$0xf] }
  0x7c   : > { %v581_v21 = vrot.slane %v579_v8, 5  ;;  %v5322_v4 = vcombine.low %v558_v1, %v568_v19  ;;  %v2411_v27 = vrot.slane %v2410_v12, 4  ;;  %v589_v28 = vshll.u32 %v274_v61, 16  ;;  %v275_v61 = vld [vmem:[%s6907_s8 + $0xa4] sm:$0x1] }
  0x7d   : > { %v2406_v26 = vsel %vm6926_vm2, %v2401_v10, %v2405_v56  ;;  %v576_v30 = vor.u32 %v575_v20, %v572_v18  ;;  %v585_v31 = vrot.slane %v583_v23, 4  ;;  %v2418_v34 = vshrl.u32 %v5539_v5, 16  ;;  %v7216_v10 = vld [vmem:[%s6907_s8 + $0xac] sm:$0xf] }
  0x7e   : > { %v2421_v35 = vshll.u32 %v5539_v5, 16  ;;  %6113 = vmatmul.mubr.msk.bf16.gmra.mrb[20].mxu1 %vm730_vm3, %v5322_v4  ;;  %v2416_v37 = vsel %vm6926_vm2, %v2411_v27, %v2415_v13  ;;  %v591_v38 = vrot.slane %v589_v28, 5  ;;  %v2427_v41 = vshll.u32 %v7185_v9, 16  ;;  %v7225_v27 = vld [vmem:[%s6907_s8 + $0xa8] sm:$0xf] }
  0x7f   : > { %v2431_v42 = vshrl.u32 %v7185_v9, 16  ;;  %v5566_v43 = vcombine.low %v2406_v26, %v2416_v37  ;;  %v577_v44 = vrot.slane %v576_v30, 4  ;;  %v586_v46 = vor.u32 %v585_v31, %v581_v21  ;;  %v7222_v26 = vld [vmem:[%s6907_s8 + $0xb0] sm:$0x1] }
  0x80   : > { %v2420_v47 = vrot.slane %v2418_v34, 4  ;;  %v2423_v52 = vrot.slane %v2421_v35, 5  ;;  %v2429_v53 = vrot.slane %v2427_v41, 5  ;;  %v2437_v56 = vshll.u32 %v7191_v25, 16 }
  0x81   : > { %v2433_v54 = vrot.slane %v2431_v42, 4  ;;  %6257 = vmatmul.mubr.msk.bf16.gmra.mrb[20].mxu0 %vm730_vm3, %v5566_v43  ;;  %v582_v63 = vsel %vm6926_vm2, %v577_v44, %v581_v21  ;;  %v587_v0 = vrot.slane %v586_v46, 4  ;;  %v594_v3 = vshrl.u32 %v7196_v36, 16 }
  0x82   : > { %v597_v5 = vshll.u32 %v7196_v36, 16  ;;  %v2424_v1 = vor.u32 %v2423_v52, %v2420_v47  ;;  %v2439_v7 = vrot.slane %v2437_v56, 5  ;;  %v603_v8 = vshll.u32 %v7204_v48, 16  ;;  %v7234_v47 = vld [vmem:[%s6907_s8 + $0xac] sm:$0xf] }
  0x83   : > { %v2434_v6 = vor.u32 %v2433_v54, %v2429_v53  ;;  %v592_v12 = vsel %vm6926_vm2, %v587_v0, %v591_v38  ;;  %v596_v13 = vrot.slane %v594_v3, 4  ;;  %v607_v19 = vshrl.u32 %v7204_v48, 16 }
  0x84   : > { %v599_v18 = vrot.slane %v597_v5, 5  ;;  %v5323_v20 = vcombine.low %v582_v63, %v592_v12  ;;  %v2425_v21 = vrot.slane %v2424_v1, 4  ;;  %v605_v4 = vrot.slane %v603_v8, 5  ;;  %v7238_v63 = vld [vmem:[%s6907_s8 + $0xb0] sm:$0x1] }
  0x85   : > { %v2435_v23 = vrot.slane %v2434_v6, 4  ;;  %v609_v30 = vrot.slane %v607_v19, 4  ;;  %v613_v31 = vshll.u32 %v275_v61, 16  ;;  %v2442_v34 = vshrl.u32 %v5542_v62, 16 }
  0x86   : > { %v600_v28 = vor.u32 %v599_v18, %v596_v13  ;;  %6116 = vmatprep.mubr.msk.bf16.mxu1 %vm730_vm3, %v5323_v20  ;;  %v2430_v35 = vsel %vm6926_vm2, %v2425_v21, %v2429_v53  ;;  %v2445_v38 = vshll.u32 %v5542_v62, 16  ;;  %v2451_v41 = vshll.u32 %v7216_v10, 16  ;;  %v5545_v53 = vld [vmem:[%s6907_s8 + $0xb4] sm:$0xf]  ;;  %v7252_v20 = vld [vmem:[%s6907_s8 + $0xb8] sm:$0xf] }
  0x87   : > { %v2440_v37 = vsel %vm6926_vm2, %v2435_v23, %v2439_v7  ;;  %v610_v44 = vor.u32 %v609_v30, %v605_v4  ;;  %v615_v46 = vrot.slane %v613_v31, 5  ;;  %v2444_v52 = vrot.slane %v2442_v34, 4  ;;  %v7255_v30 = vld [vmem:[%s6907_s8 + $0xbc] sm:$0x1] }
  0x88   : > { %v5567_v42 = vcombine.low %v2430_v35, %v2440_v37  ;;  %v601_v43 = vrot.slane %v600_v28, 4  ;;  %v2447_v54 = vrot.slane %v2445_v38, 5  ;;  %v2453_v56 = vrot.slane %v2451_v41, 5  ;;  %v7259_v38 = vld [vmem:[%s6907_s8 + $0xb4] sm:$0xf] }
  0x89   : > { %v2455_v61 = vshrl.u32 %v7216_v10, 16  ;;  %v611_v0 = vrot.slane %v610_v44, 4  ;;  %v2461_v3 = vshll.u32 %v7222_v26, 16  ;;  %v618_v5 = vshrl.u32 %v7225_v27, 16 }
  0x8a   : > { %6260 = vmatprep.mubr.msk.bf16.mxu0 %vm730_vm3, %v5567_v42  ;;  %v606_v62 = vsel %vm6926_vm2, %v601_v43, %v605_v4  ;;  %v2448_v1 = vor.u32 %v2447_v54, %v2444_v52  ;;  %v621_v7 = vshll.u32 %v7225_v27, 16  ;;  %v627_v8 = vshll.u32 %v7234_v47, 16 }
  0x8b   : > { %v2457_v6 = vrot.slane %v2455_v61, 4  ;;  %v616_v12 = vsel %vm6926_vm2, %v611_v0, %v615_v46  ;;  %v2463_v13 = vrot.slane %v2461_v3, 5  ;;  %v620_v18 = vrot.slane %v618_v5, 4  ;;  %v7265_v46 = vld [vmem:[%s6907_s8 + $0xb8] sm:$0xf] }
  0x8c   : > { %v631_v19 = vshrl.u32 %v7234_v47, 16  ;;  %v5324_v21 = vcombine.low %v606_v62, %v616_v12  ;;  %v2449_v23 = vrot.slane %v2448_v1, 4  ;;  %v623_v28 = vrot.slane %v621_v7, 5 }
  0x8d   : > { %v2458_v4 = vor.u32 %v2457_v6, %v2453_v56  ;;  %v629_v31 = vrot.slane %v627_v8, 5  ;;  %v637_v35 = vshll.u32 %v7238_v63, 16  ;;  %v2466_v37 = vshrl.u32 %v5545_v53, 16  ;;  %v7272_v6 = vld [vmem:[%s6907_s8 + $0xbc] sm:$0x1] }
  0x8e   : > { %v633_v34 = vrot.slane %v631_v19, 4  ;;  %6117 = vmatmul.mubr.msk.bf16.gmra.mrb[24].mxu1 %vm730_vm3, %v5324_v21  ;;  %v2454_v41 = vsel %vm6926_vm2, %v2449_v23, %v2453_v56  ;;  %v624_v43 = vor.u32 %v623_v28, %v620_v18  ;;  %v2469_v44 = vshll.u32 %v5545_v53, 16  ;;  %8871 = vst [vmem:[#allocation3_spill] sm:$0xff] %v7272_v6 }
  0x8f   : > { %v2459_v42 = vrot.slane %v2458_v4, 4  ;;  %v639_v54 = vrot.slane %v637_v35, 5  ;;  %v2468_v61 = vrot.slane %v2466_v37, 4  ;;  %v2475_v62 = vshll.u32 %v7252_v20, 16 }
  0x90   : > { %v634_v52 = vor.u32 %v633_v34, %v629_v31  ;;  %v625_v3 = vrot.slane %v624_v43, 4  ;;  %v2471_v5 = vrot.slane %v2469_v44, 5  ;;  %v2479_v1 = vshrl.u32 %v7252_v20, 16  ;;  %v5548_v34 = vld [vmem:[%s6907_s8 + $0xc0] sm:$0xf] }
  0x91   : > { %v2464_v0 = vsel %vm6926_vm2, %v2459_v42, %v2463_v13  ;;  %v2477_v53 = vrot.slane %v2475_v62, 5  ;;  %v2485_v8 = vshll.u32 %v7255_v30, 16  ;;  %v642_v13 = vshrl.u32 %v7259_v38, 16  ;;  %v7285_v42 = vld [vmem:[%s6907_s8 + $0xc4] sm:$0xf] }
  0x92   : > { %v5568_v56 = vcombine.low %v2454_v41, %v2464_v0  ;;  %v635_v7 = vrot.slane %v634_v52, 4  ;;  %v630_v12 = vsel %vm6926_vm2, %v625_v3, %v629_v31  ;;  %v2472_v18 = vor.u32 %v2471_v5, %v2468_v61 }
  0x93   : > { %v2481_v19 = vrot.slane %v2479_v1, 4  ;;  %v2487_v23 = vrot.slane %v2485_v8, 5  ;;  %v645_v4 = vshll.u32 %v7259_v38, 16  ;;  %v651_v28 = vshll.u32 %v7265_v46, 16 }
  0x94   : > { %6261 = vmatmul.mubr.msk.bf16.gmra.mrb[24].mxu0 %vm730_vm3, %v5568_v56  ;;  %v640_v21 = vsel %vm6926_vm2, %v635_v7, %v639_v54  ;;  %v2473_v37 = vrot.slane %v2472_v18, 4  ;;  %v644_v31 = vrot.slane %v642_v13, 4  ;;  %v655_v52 = vshrl.u32 %v7265_v46, 16  ;;  %v7290_v54 = vld [vmem:[%s6907_s8 + $0xc8] sm:$0x1] }
  0x95   : > { %v5325_v35 = vcombine.low %v630_v12, %v640_v21  ;;  %v2482_v41 = vor.u32 %v2481_v19, %v2477_v53  ;;  %v647_v43 = vrot.slane %v645_v4, 5  ;;  %v653_v44 = vrot.slane %v651_v28, 5  ;;  %v5589_v12 = vld [vmem:[%s6907_s8 + $0xc] sm:$0xe]  ;;  %v5590_v4 = vld [vmem:[%s6907_s8 + $0x18] sm:$0xe] }
  0x96   : > { %v661_v61 = vshll.u32 %v7272_v6, 16  ;;  %v2478_v62 = vsel %vm6926_vm2, %v2473_v37, %v2477_v53  ;;  %v2490_v3 = vshrl.u32 %v5548_v34, 16  ;;  %v2493_v5 = vshll.u32 %v5548_v34, 16  ;;  %v5603_v6 = vld [vmem:[%s6907_s8 + $0xb4] sm:$0xe] }
  0x97   : > { %6120 = vmatprep.mubr.msk.bf16.mxu1 %vm730_vm3, %v5325_v35  ;;  %v2483_v0 = vrot.slane %v2482_v41, 4  ;;  %v648_v1 = vor.u32 %v647_v43, %v644_v31  ;;  %v657_v56 = vrot.slane %v655_v52, 4  ;;  %v2499_v8 = vshll.u32 %v7285_v42, 16 }
  0x98   : > { %v663_v7 = vrot.slane %v661_v61, 5  ;;  %v2492_v19 = vrot.slane %v2490_v3, 4  ;;  %v2495_v13 = vrot.slane %v2493_v5, 5  ;;  %v2503_v21 = vshrl.u32 %v7285_v42, 16  ;;  %v5591_v5 = vld [vmem:[%s6907_s8 + $0x24] sm:$0xe] }
  0x99   : > { %v2488_v18 = vsel %vm6926_vm2, %v2483_v0, %v2487_v23  ;;  %v649_v35 = vrot.slane %v648_v1, 4  ;;  %v658_v53 = vor.u32 %v657_v56, %v653_v44  ;;  %v2501_v37 = vrot.slane %v2499_v8, 5  ;;  %v6781_v56 = vld [vmem:[%s6907_s8] sm:$0xf]  ;;  %v7314_v8 = vld [vmem:[%s6907_s8 + $0x4] sm:$0xf] }
  0x9a   : > { %v5569_v28 = vcombine.low %v2478_v62, %v2488_v18  ;;  %v2496_v34 = vor.u32 %v2495_v13, %v2492_v19  ;;  %v2505_v41 = vrot.slane %v2503_v21, 4  ;;  %v2509_v31 = vshll.u32 %v7290_v54, 16 }
  0x9b   : > { %v654_v23 = vsel %vm6926_vm2, %v649_v35, %v653_v44  ;;  %v659_v43 = vrot.slane %v658_v53, 4  ;;  %v5605_v3 = vrot.slane %v5589_v12, 9  ;;  %v5345_v44 = vcombine.low %v6781_v56, %v7314_v8  ;;  %v6784_v53 = vld [vmem:[%s6907_s8 + $0x2c] sm:$0x1] }
  0x9c   : > { %6264 = vmatprep.mubr.msk.bf16.mxu0 %vm730_vm3, %v5569_v28  ;;  %v2497_v52 = vrot.slane %v2496_v34, 4  ;;  %v2506_v61 = vor.u32 %v2505_v41, %v2501_v37  ;;  %v2511_v62 = vrot.slane %v2509_v31, 5  ;;  %v2887_v18 = vrot.slane %v2885_v57, 4  ;;  %v6785_v34 = vld [vmem:[%s6907_s8 + $0x34] sm:$0xf] }
  0x9d   : > { %v664_v1 = vsel %vm6926_vm2, %v659_v43, %v663_v7  ;;  %v5606_v19 = vrot.slane %v5590_v4, 9  ;;  %v2886_v7 = vsel %vm7305_vm6, %v5605_v3, %v2885_v57  ;;  %v2896_v14 = vsel %vm7305_vm6, %v6965_v24, %v2895_v22  ;;  %v6786_v31 = vld [vmem:[%s6907_s8 + $0xc] sm:$0xf] }
  0x9e   : > { %v5326_v13 = vcombine.low %v654_v23, %v664_v1  ;;  %v2502_v21 = vsel %vm6926_vm2, %v2497_v52, %v2501_v37  ;;  %v2507_v12 = vrot.slane %v2506_v61, 4  ;;  %v2889_v28 = vsel %vm7305_vm6, %v2887_v18, %v2888_v58  ;;  %v5592_v37 = vld [vmem:[%s6907_s8 + $0x30] sm:$0xe]  ;;  %v6788_v52 = vld [vmem:[%s6907_s8 + $0x18] sm:$0xf] }
  0x9f   : > { %v2893_v4 = vsel %vm7305_vm6, %v5606_v19, %v2892_v17  ;;  %v5625_v57 = vcombine.low %v2886_v7, %v2889_v28  ;;  %v5607_v58 = vrot.slane %v5591_v5, 9  ;;  %v2899_v17 = vrot.slane %v6783_v60, 5  ;;  %v7350_v23 = vld [vmem:[%s6907_s8 + $0x10] sm:$0xf]  ;;  %v7355_v61 = vld [vmem:[%s6907_s8 + $0x1c] sm:$0xf] }
  0xa0   : > { %6121 = vmatmul.mubr.msk.bf16.gmra.mrb[28].mxu1 %vm730_vm3, %v5326_v13  ;;  %v2512_v15 = vsel %vm6926_vm2, %v2507_v12, %v2511_v62  ;;  %v5626_v55 = vcombine.low %v2893_v4, %v2896_v14  ;;  %v2902_v22 = vrot.slane %v6784_v53, 5  ;;  %v2906_v41 = vrot.slane %v6785_v34, 5  ;;  %v6790_v1 = vld [vmem:[%s6907_s8 + $0x40] sm:$0xf]  ;;  %v5593_v18 = vld [vmem:[%s6907_s8 + $0x3c] sm:$0xe] }
  0xa1   : > { %v5570_v35 = vcombine.low %v2502_v21, %v2512_v15  ;;  %6128 = vmatprep.mubr.msk.bf16.mxu1 %vm730_vm3, %v5345_v44  ;;  %v2901_v24 = vrot.slane %v2899_v17, 4  ;;  %v5346_v43 = vcombine.low %v6786_v31, %v7350_v23  ;;  %v5347_v62 = vcombine.low %v6788_v52, %v7355_v61  ;;  %v6740_v19 = vld [vmem:[%s8850_s1 + $0x28] sm:$0xff]   ;;  %v6791_v21 = vld [vmem:[%s6907_s8 + $0x38] sm:$0x1]  ;;  %v6794_v34 = vld [vmem:[%s6907_s8 + $0x50] sm:$0x1] }
  0xa2   : > { %v2900_v3 = vsel %vm7305_vm6, %v5607_v58, %v2899_v17  ;;  %v2913_v56 = vrot.slane %v6790_v1, 5  ;;  %v5608_v44 = vrot.slane %v5592_v37, 9  ;;  %v2908_v13 = vrot.slane %v2906_v41, 4  ;;  %v5594_v7 = vld [vmem:[%s6907_s8 + $0x48] sm:$0xe]  ;;  %v6796_v52 = vld [vmem:[%s8850_s1 + $0x60] sm:$0xff]  }
  0xa3   : > { %6265 = vmatmul.mubr.msk.bf16.gmra.mrb[28].mxu0 %vm730_vm3, %v5570_v35  ;;  %v2903_v5 = vsel %vm7305_vm6, %v2901_v24, %v2902_v22  ;;  %v2909_v12 = vrot.slane %v6791_v21, 5  ;;  %v6792_v28 = vld [vmem:[%s6907_s8 + $0x4c] sm:$0xf]  ;;  %v5609_v15 = vrot.slane %v5593_v18, 9  ;;  %v6793_v58 = vld [vmem:[%s6907_s8 + $0x44] sm:$0x1] }
  0xa4   : > { %6272 = vmatprep.mubr.msk.bf16.mxu0 %vm730_vm3, %v5625_v57  ;;  %v2920_v4 = vrot.slane %v6792_v28, 5  ;;  %v5627_v14 = vcombine.low %v2900_v3, %v2903_v5  ;;  %v2915_v57 = vrot.slane %v2913_v56, 4  ;;  %v2916_v35 = vrot.slane %v6793_v58, 5  ;;  %v6731_v60 = vld [vmem:[%s8850_s1 + $0x68] sm:$0xff]   ;;  %v5595_v22 = vld [vmem:[%s6907_s8 + $0x54] sm:$0xe] }
  0xa5   : > { %v7379_v17 = vsel %vm7305_vm6, %v5608_v44, %v2906_v41  ;;  %v5610_v53 = vrot.slane %v5594_v7, 9  ;;  %v7385_v24 = vld [vmem:[%s8850_s1 + $0x30] sm:$0xff]   ;;  %v2923_v41 = vrot.slane %v6794_v34, 5  ;;  %v6795_v31 = vld [vmem:[%s6907_s8 + $0x58] sm:$0xf]  ;;  %v2914_v18 = vsel %vm7305_vm6, %v5609_v15, %v2913_v56 }
  0xa6   : > { %v2922_v37 = vrot.slane %v2920_v4, 4  ;;  %v7398_v3 = vld [vmem:[%s6907_s8 + $0x28] sm:$0xf]  ;;  %v6799_v5 = vld [vmem:[%s6907_s8 + $0x30] sm:$0xf]  ;;  %v5611_v21 = vrot.slane %v5595_v22, 9 }
  0xa7   : > { %v7403_v1 = vld [vmem:[%s6907_s8 + $0x34] sm:$0xf]  ;;  %v7418_v56 = vsel %vm7305_vm6, %v5610_v53, %v2920_v4  ;;  %v7421_v28 = vld [vmem:[%s6907_s8 + $0x60] sm:$0xe]  ;;  %v6801_v15 = vld [vmem:[%s6907_s8 + $0x5c] sm:$0x1] }
  0xa8   : > { %6129 = vmatmul.mubr.msk.bf16.vlgmr.msra.gmra.mrb[0].mxu1 %vm730_vm3, %v5346_v43  ;;  %v2927_v43 = vrot.slane %v6795_v31, 5  ;;  %v5349_v44 = vcombine.low %v6799_v5, %v7403_v1  ;;  %v7430_v58 = vld [vmem:[%s6907_s8 + $0x64] sm:$0xf]  ;;  %v6803_v53 = vld [vmem:[%s6907_s8 + $0x3c] sm:$0xf] }
  0xa9   : > { %6132 = vmatprep.mubr.msk.bf16.mxu1 %vm730_vm3, %v5347_v62  ;;  %6161 = vmatpush3.bf16.msra.mxu1 %v7102_v50  ;;  %v2910_v50 = vsel %vm7305_vm6, %v2908_v13, %v2909_v12  ;;  %v6797_v62 = vld [vmem:[%s6907_s8 + $0x24] sm:$0xf]  ;;  %v2917_v13 = vsel %vm7305_vm6, %v2915_v57, %v2916_v35  ;;  %v7413_v12 = vld [vmem:[%s8850_s1 + $0x70] sm:$0xff]   ;;  %v2930_v57 = vrot.slane %v6801_v15, 5  ;;  %v2934_v4 = vrot.slane %v7430_v58, 5 }
  0xaa   : > { %6162 = vmatprep.subr.bf16.mxu1 %v6740_v19  ;;  %v5628_v7 = vcombine.low %v7379_v17, %v2910_v50  ;;  %v5600_v35 = vld [vmem:[%s6907_s8 + $0x90] sm:$0xe]  ;;  %v5629_v17 = vcombine.low %v2914_v18, %v2917_v13  ;;  %v7437_v22 = vld [vmem:[%s6907_s8 + $0x40] sm:$0xf]  ;;  %v7442_v34 = vld [vmem:[%s6907_s8 + $0x4c] sm:$0xf] }
  0xab   : > { %6273 = vmatmul.mubr.msk.bf16.vlgmr.msra.gmra.mrb[0].mxu0 %vm730_vm3, %v5626_v55  ;;  %v5348_v55 = vcombine.low %v6797_v62, %v7398_v3  ;;  %v5350_v50 = vcombine.low %v6803_v53, %v7437_v22  ;;  %v7446_v31 = vld [vmem:[%s6907_s8 + $0x6c] sm:$0xe]  ;;  %v2928_v62 = vsel %vm7305_vm6, %v5611_v21, %v2927_v43  ;;  %v7456_v5 = vld [vmem:[%s6907_s8 + $0x58] sm:$0xf]  ;;  %v5612_v13 = vrot.slane %v7421_v28, 9 }
  0xac   : > { %6305 = vmatpush3.bf16.msra.mxu0 %v6796_v52  ;;  %6276 = vmatprep.mubr.msk.bf16.mxu0 %vm730_vm3, %v5627_v14  ;;  %v2929_v14 = vrot.slane %v2927_v43, 4  ;;  %v5601_v52 = vld [vmem:[%s6907_s8 + $0x9c] sm:$0xe]  ;;  %v6809_v15 = vld [vmem:[%s6907_s8 + $0x68] sm:$0x1]  ;;  %v2962_v43 = vrot.slane %v7151_v16, 5 }
  0xad   : > { %6306 = vmatprep.subr.bf16.mxu0 %v6731_v60  ;;  %6163 = vmatpush3.bf16.msra.mxu1 %v6740_v19  ;;  %v7426_v19 = vsel %vm7305_vm6, %v2922_v37, %v2923_v41  ;;  %v6805_v37 = vld [vmem:[%s6907_s8 + $0x48] sm:$0xf]  ;;  %v2937_v53 = vrot.slane %v6809_v15, 5  ;;  %v2965_v21 = vrot.slane %v7160_v32, 5  ;;  %v2936_v28 = vrot.slane %v2934_v4, 4 }
  0xae   : > { %6196 = vmatprep.subr.bf16.mxu1 %v7385_v24  ;;  %v5351_v41 = vcombine.low %v6805_v37, %v7442_v34  ;;  %v5602_v37 = vld [vmem:[%s6907_s8 + $0xa8] sm:$0xe]  ;;  %v2931_v18 = vsel %vm7305_vm6, %v2929_v14, %v2930_v57  ;;  %v5613_v15 = vrot.slane %v7446_v31, 9  ;;  %v5617_v29 = vrot.slane %v5601_v52, 9 }
  0xaf   : > { %v2944_v14 = vrot.slane %v7081_v11, 5  ;;  %v2972_v57 = vrot.slane %v7191_v25, 5  ;;  %v2976_v31 = vrot.slane %v7216_v10, 5 }
  0xb0   : > { %6133 = vmatmul.mubr.msk.bf16.gmra.mrb[4].mxu1 %vm730_vm3, %v5348_v55  ;;  %6307 = vmatpush3.bf16.msra.mxu0 %v6731_v60  ;;  %v7453_v55 = vld [vmem:[%s6907_s8 + $0x54] sm:$0xf]  ;;  %v5630_v60 = vcombine.low %v7418_v56, %v7426_v19  ;;  %v6810_v56 = vld [vmem:[%s6907_s8 + $0x70] sm:$0xf]  ;;  %v2969_v19 = vrot.slane %v7185_v9, 5  ;;  %v5631_v9 = vcombine.low %v2928_v62, %v2931_v18  ;;  %v2986_v62 = vrot.slane %v7255_v30, 5 }
  0xb1   : > { %6136 = vmatprep.mubr.msk.bf16.mxu1 %vm730_vm3, %v5349_v44  ;;  %6340 = vmatprep.subr.bf16.mxu0 %v7413_v12  ;;  %v5616_v44 = vrot.slane %v5600_v35, 9  ;;  %v2941_v16 = vrot.slane %v6810_v56, 5  ;;  %v5618_v35 = vrot.slane %v5602_v37, 9  ;;  %v5604_v56 = vld [vmem:[%s6907_s8 + $0xc0] sm:$0xe]  ;;  %v2978_v10 = vrot.slane %v2976_v31, 4 }
  0xb3   : > { %6277 = vmatmul.mubr.msk.bf16.gmra.mrb[4].mxu0 %vm730_vm3, %v5628_v7  ;;  %v7479_v32 = vsel %vm7305_vm6, %v5616_v44, %v2962_v43  ;;  %v2964_v7 = vrot.slane %v2962_v43, 4  ;;  %v2971_v44 = vrot.slane %v2969_v19, 4  ;;  %v2979_v43 = vrot.slane %v7222_v26, 5 }
  0xb4   : > { %6280 = vmatprep.mubr.msk.bf16.mxu0 %vm730_vm3, %v5629_v17  ;;  %v7491_v17 = vsel %vm7305_vm6, %v5617_v29, %v2969_v19  ;;  %v7499_v25 = vsel %vm7305_vm6, %v5618_v35, %v2976_v31  ;;  %v5619_v29 = vrot.slane %v5603_v6, 9  ;;  %v2983_v26 = vrot.slane %v7252_v20, 5  ;;  %v6811_v35 = vld [vmem:[%s6907_s8 + $0x60] sm:$0xf]  ;;  %v7531_v31 = vld [vmem:[%s6907_s8 + $0x64] sm:$0xf] }
  0xb5   : > { %v7487_v52 = vsel %vm7305_vm6, %v2964_v7, %v2965_v21  ;;  %v7504_v21 = vsel %vm7305_vm6, %v2971_v44, %v2972_v57  ;;  %v2943_v18 = vrot.slane %v2941_v16, 4  ;;  %v5620_v7 = vrot.slane %v5604_v56, 9  ;;  %v5599_v56 = vld [vmem:[%s6907_s8 + $0x84] sm:$0xe] }
  0xb6   : > { %v5636_v11 = vcombine.low %v7479_v32, %v7487_v52  ;;  %v5637_v37 = vcombine.low %v7491_v17, %v7504_v21  ;;  %v7519_v20 = vsel %vm7305_vm6, %v5619_v29, %v2983_v26  ;;  %v2985_v30 = vrot.slane %v2983_v26, 4 }
  0xb7   : > { %v2935_v19 = vsel %vm7305_vm6, %v5612_v13, %v2934_v4  ;;  %v2938_v57 = vsel %vm7305_vm6, %v2936_v28, %v2937_v53  ;;  %v5353_v44 = vcombine.low %v6811_v35, %v7531_v31  ;;  %v2942_v53 = vsel %vm7305_vm6, %v5613_v15, %v2941_v16  ;;  %v7580_v35 = vld [vmem:[%s6907_s8 + $0x7c] sm:$0xf] }
  0xb8   : > { %6137 = vmatmul.mubr.msk.bf16.gmra.mrb[8].mxu1 %vm730_vm3, %v5350_v50  ;;  %v7513_v50 = vsel %vm7305_vm6, %v2978_v10, %v2979_v43  ;;  %v2993_v43 = vrot.slane %v7290_v54, 5  ;;  %v7540_v58 = vsel %vm7305_vm6, %v2985_v30, %v2986_v62  ;;  %v2945_v54 = vsel %vm7305_vm6, %v2943_v18, %v2944_v14  ;;  %v6813_v30 = vld [vmem:[%s6907_s8 + $0x6c] sm:$0xf] }
  0xb9   : > { %6140 = vmatprep.mubr.msk.bf16.mxu1 %vm730_vm3, %v5351_v41  ;;  %v5638_v6 = vcombine.low %v7499_v25, %v7513_v50  ;;  %v2990_v41 = vrot.slane %v7285_v42, 5  ;;  %v5598_v42 = vld [vmem:[%s6907_s8 + $0x78] sm:$0xe]  ;;  %v2955_v28 = vrot.slane %v7126_v39, 5  ;;  %v5632_v10 = vcombine.low %v2935_v19, %v2938_v57  ;;  %v1244_v25 = vld [vmem:[%s6907_s8 + $0x24] sm:$0xe] }
  0xba   : > { %v5614_v29 = vrot.slane %v5598_v42, 9  ;;  %v8874_v16 = vcombine.low %v7453_v55, %v7456_v5  ;;  %v5633_v39 = vcombine.low %v2942_v53, %v2945_v54  ;;  %v2951_v26 = vrot.slane %v7111_v2, 5  ;;  %v7571_v55 = vld [vmem:[%s6907_s8 + $0x70] sm:$0xf]  ;;  %v6815_v57 = vld [vmem:[%s6907_s8 + $0x78] sm:$0xf] }
  0xbb   : > { %6281 = vmatmul.mubr.msk.bf16.gmra.mrb[8].mxu0 %vm730_vm3, %v5630_v60  ;;  %v2948_v60 = vrot.slane %v7097_v49, 5  ;;  %v7544_v4 = vsel %vm7305_vm6, %v5620_v7, %v2990_v41  ;;  %v2992_v13 = vrot.slane %v2990_v41, 4  ;;  %v5639_v49 = vcombine.low %v7519_v20, %v7540_v58  ;;  %v1245_v20 = vld [vmem:[%s6907_s8 + $0x30] sm:$0xe]  ;;  %v1246_v58 = vld [vmem:[%s6907_s8 + $0x3c] sm:$0xe] }
  0xbc   : > { %6284 = vmatprep.mubr.msk.bf16.mxu0 %vm730_vm3, %v5631_v9  ;;  %v5615_v62 = vrot.slane %v5599_v56, 9  ;;  %v2957_v18 = vrot.slane %v2955_v28, 4  ;;  %v2958_v7 = vrot.slane %v7129_v40, 5  ;;  %v5354_v41 = vcombine.low %v6813_v30, %v7571_v55 }
  0xbd   : > { %v7556_v9 = vsel %vm7305_vm6, %v2992_v13, %v2993_v43  ;;  %v2950_v14 = vrot.slane %v2948_v60, 4  ;;  %v2949_v19 = vsel %vm7305_vm6, %v5614_v29, %v2948_v60  ;;  %v5355_v40 = vcombine.low %v6815_v57, %v7580_v35  ;;  %v1248_v57 = vld [vmem:[%s6907_s8 + $0x54] sm:$0xe] }
  0xbe   : > { %v5640_v15 = vcombine.low %v7544_v4, %v7556_v9  ;;  %v2959_v43 = vsel %vm7305_vm6, %v2957_v18, %v2958_v7  ;;  %v5356_v13 = vcombine.low %v7132_v45, %v7139_v59  ;;  %v5357_v53 = vcombine.low %v7163_v33, %v7173_v51  ;;  %v1242_v33 = vld [vmem:[%s6907_s8 + $0xc] sm:$0xe]  ;;  %v6817_v51 = vld [vmem:[%s6907_s8 + $0x8] sm:$0x1] }
  0xbf   : > { %v2952_v2 = vsel %vm7305_vm6, %v2950_v14, %v2951_v26  ;;  %v1294_v54 = vrot.slane %v7314_v8, 5  ;;  %v1301_v56 = vrot.slane %v7350_v23, 5  ;;  %v5358_v45 = vcombine.low %v7196_v36, %v7204_v48 }
  0xc0   : > { %6141 = vmatmul.mubr.msk.bf16.gmra.mrb[12].mxu1 %vm730_vm3, %v8874_v16  ;;  %v5634_v42 = vcombine.low %v2949_v19, %v2952_v2  ;;  %v5359_v59 = vcombine.low %v7225_v27, %v7234_v47  ;;  %v1297_v8 = vrot.slane %v6817_v51, 5  ;;  %v1308_v23 = vrot.slane %v7355_v61, 5  ;;  %v1247_v19 = vld [vmem:[%s6907_s8 + $0x48] sm:$0xe] }
  0xc1   : > { %6144 = vmatprep.mubr.msk.bf16.mxu1 %vm730_vm3, %v5353_v44  ;;  %v2956_v44 = vsel %vm7305_vm6, %v5615_v62, %v2955_v28  ;;  %v1241_v28 = vld [vmem:[%s6907_s8] sm:$0xe]  ;;  %v1296_v52 = vrot.slane %v1294_v54, 4  ;;  %v5380_v17 = vrot.slane %v1242_v33, 9  ;;  %v1303_v21 = vrot.slane %v1301_v56, 4 }
  0xc2   : > { %v5635_v60 = vcombine.low %v2956_v44, %v2959_v43  ;;  %v5379_v32 = vrot.slane %v1241_v28, 9  ;;  %v1310_v61 = vrot.slane %v1308_v23, 4  ;;  %v1315_v62 = vrot.slane %v7398_v3, 5  ;;  %v6821_v3 = vld [vmem:[%s6907_s8 + $0x38] sm:$0x1] }
  0xc3   : > { %6285 = vmatmul.mubr.msk.bf16.gmra.mrb[12].mxu0 %vm730_vm3, %v5632_v10  ;;  %v6818_v10 = vld [vmem:[%s6907_s8 + $0x14] sm:$0x1]  ;;  %v1298_v27 = vsel %vm7305_vm6, %v1296_v52, %v1297_v8  ;;  %v7636_v14 = vsel %vm7305_vm6, %v5380_v17, %v1301_v56  ;;  %v1322_v18 = vrot.slane %v7403_v1, 5  ;;  %v1329_v7 = vrot.slane %v7437_v22, 5  ;;  %v1249_v22 = vld [vmem:[%s6907_s8 + $0x60] sm:$0xe] }
  0xc4   : > { %6288 = vmatprep.mubr.msk.bf16.mxu0 %vm730_vm3, %v5633_v39  ;;  %v1304_v29 = vrot.slane %v6818_v10, 5  ;;  %v1295_v48 = vsel %vm7305_vm6, %v5379_v32, %v1294_v54  ;;  %v5360_v39 = vcombine.low %v7259_v38, %v7265_v46  ;;  %v6741_v38 = vld [vmem:[%s6907_s8 + $0x18] sm:$0xff]   ;;  %v1336_v2 = vrot.slane %v7442_v34, 5  ;;  %v6823_v8 = vld [vmem:[%s6907_s8 + $0x50] sm:$0x1] }
  0xc5   : > { %v5399_v50 = vcombine.low %v1295_v48, %v1298_v27  ;;  %v5383_v43 = vrot.slane %v1245_v20, 9  ;;  %v5384_v1 = vrot.slane %v1246_v58, 9  ;;  %v1350_v34 = vrot.slane %v7531_v31, 5 }
  0xc6   : > { %v7640_v26 = vsel %vm7305_vm6, %v1303_v21, %v1304_v29  ;;  %v1357_v54 = vrot.slane %v7571_v55, 5  ;;  %v1317_v28 = vrot.slane %v1315_v62, 4  ;;  %v1324_v56 = vrot.slane %v1322_v18, 4  ;;  %v6824_v55 = vld [vmem:[%s6907_s8 + $0x5c] sm:$0x1] }
  0xc7   : > { %v5400_v30 = vcombine.low %v7636_v14, %v7640_v26  ;;  %v5385_v51 = vrot.slane %v1247_v19, 9  ;;  %v1339_v32 = vrot.slane %v6823_v8, 5  ;;  %v5386_v31 = vrot.slane %v1248_v57, 9  ;;  %v7785_v8 = vld [vmem:[%s8850_s1 + $0x80] sm:$0xff]  }
  0xc8   : > { %6145 = vmatmul.mubr.msk.bf16.gmra.mrb[16].mxu1 %vm730_vm3, %v5354_v41  ;;  %v5382_v41 = vrot.slane %v1244_v25, 9  ;;  %v1346_v52 = vrot.slane %v6824_v55, 5  ;;  %v1352_v4 = vrot.slane %v1350_v34, 4  ;;  %v1359_v9 = vrot.slane %v1357_v54, 4 }
  0xc9   : > { %6148 = vmatprep.mubr.msk.bf16.mxu1 %vm730_vm3, %v5355_v40  ;;  %v6820_v40 = vld [vmem:[%s6907_s8 + $0x2c] sm:$0x1]  ;;  %v7689_v48 = vsel %vm7305_vm6, %v5383_v43, %v1322_v18  ;;  %v7693_v27 = vsel %vm7305_vm6, %v5384_v1, %v1329_v7  ;;  %v6751_v18 = vld [vmem:[%s8850_s1 + $0x78] sm:$0xff]   ;;  %v1253_v43 = vld [vmem:[%s6907_s8 + $0x90] sm:$0xe] }
  0xca   : > { %v1318_v44 = vrot.slane %v6820_v40, 5  ;;  %v6828_v40 = vld [vmem:[%s6907_s8 + $0x88] sm:$0xf] }
  0xcb   : > { %6289 = vmatmul.mubr.msk.bf16.gmra.mrb[16].mxu0 %vm730_vm3, %v5634_v42  ;;  %v1325_v42 = vrot.slane %v6821_v3, 5 }
  0xcc   : > { %6292 = vmatprep.mubr.msk.bf16.mxu0 %vm730_vm3, %v5635_v60  ;;  %v1319_v14 = vsel %vm7305_vm6, %v1317_v28, %v1318_v44  ;;  %v1371_v44 = vrot.slane %v6828_v40, 5  ;;  %v5730_v28 = vld [vmem:[%s6907_s8 + $0x1c] sm:$0xf] }
  0xcd   : > { %v7705_v26 = vsel %vm7305_vm6, %v1324_v56, %v1325_v42  ;;  %v5732_v56 = vld [vmem:[%s6907_s8 + $0x24] sm:$0xf] }
  0xce   : > { %v5403_v42 = vcombine.low %v7689_v48, %v7705_v26  ;;  %v1373_v55 = vrot.slane %v1371_v44, 4 }
  0xd0   : > { %6149 = vmatmul.mubr.msk.bf16.gmra.mrb[20].mxu1 %vm730_vm3, %v5356_v13  ;;  %v1343_v13 = vrot.slane %v7456_v5, 5  ;;  %v1338_v5 = vrot.slane %v1336_v2, 4 }
  0xd1   : > { %6152 = vmatprep.mubr.msk.bf16.mxu1 %vm730_vm3, %v5357_v53  ;;  %v1250_v53 = vld [vmem:[%s6907_s8 + $0x6c] sm:$0xe] }
  0xd2   : > { %v5388_v29 = vrot.slane %v1250_v53, 9  ;;  %v1345_v17 = vrot.slane %v1343_v13, 4  ;;  %v7723_v20 = vsel %vm7305_vm6, %v5386_v31, %v1343_v13 }
  0xd3   : > { %6293 = vmatmul.mubr.msk.bf16.gmra.mrb[20].mxu0 %vm730_vm3, %v5636_v11  ;;  %v1243_v11 = vld [vmem:[%s6907_s8 + $0x18] sm:$0xe] }
  0xd4   : > { %6296 = vmatprep.mubr.msk.bf16.mxu0 %vm730_vm3, %v5637_v37  ;;  %v5381_v36 = vrot.slane %v1243_v11, 9  ;;  %v6819_v37 = vld [vmem:[%s6907_s8 + $0x20] sm:$0x1]  ;;  %v5387_v11 = vrot.slane %v1249_v22, 9  ;;  %v7763_v22 = vld [vmem:[%s6907_s8 + $0x9c] sm:$0xe] }
  0xd5   : > { %v1311_v16 = vrot.slane %v6819_v37, 5  ;;  %v1364_v37 = vrot.slane %v7580_v35, 5  ;;  %v7713_v35 = vsel %vm7305_vm6, %v5385_v51, %v1336_v2  ;;  %v6827_v2 = vld [vmem:[%s6907_s8 + $0x80] sm:$0x1]  ;;  %v6830_v51 = vld [vmem:[%s6907_s8 + $0x94] sm:$0xf] }
  0xd6   : > { %v7727_v58 = vsel %vm7305_vm6, %v5387_v11, %v1350_v34  ;;  %v1367_v57 = vrot.slane %v6827_v2, 5 }
  0xd7   : > { %v1366_v19 = vrot.slane %v1364_v37, 4 }
  0xd8   : > { %6153 = vmatmul.mubr.msk.bf16.gmra.mrb[24].mxu1 %vm730_vm3, %v5358_v45  ;;  %v1331_v45 = vrot.slane %v1329_v7, 4 }
  0xd9   : > { %6156 = vmatprep.mubr.msk.bf16.mxu1 %vm730_vm3, %v5359_v59  ;;  %v6822_v59 = vld [vmem:[%s6907_s8 + $0x44] sm:$0x1]  ;;  %v7790_v31 = vsel %vm7305_vm6, %v1366_v19, %v1367_v57  ;;  %v5731_v57 = vld [vmem:[%s6907_s8 + $0x20] sm:$0x1] }
  0xda   : > { %v1332_v33 = vrot.slane %v6822_v59, 5 }
  0xdb   : > { %6297 = vmatmul.mubr.msk.bf16.gmra.mrb[24].mxu0 %vm730_vm3, %v5638_v6  ;;  %v7645_v6 = vsel %vm7305_vm6, %v5381_v36, %v1308_v23  ;;  %v6825_v23 = vld [vmem:[%s6907_s8 + $0x68] sm:$0x1]  ;;  %v7685_v36 = vsel %vm7305_vm6, %v5382_v41, %v1315_v62  ;;  %v1252_v41 = vld [vmem:[%s6907_s8 + $0x84] sm:$0xe] }
  0xdc   : > { %6300 = vmatprep.mubr.msk.bf16.mxu0 %vm730_vm3, %v5639_v49  ;;  %v7652_v49 = vsel %vm7305_vm6, %v1310_v61, %v1311_v16  ;;  %v1353_v10 = vrot.slane %v6825_v23, 5  ;;  %v1251_v61 = vld [vmem:[%s6907_s8 + $0x78] sm:$0xe]  ;;  %v7709_v25 = vsel %vm7305_vm6, %v1331_v45, %v1332_v33  ;;  %v5402_v3 = vcombine.low %v7685_v36, %v1319_v14  ;;  %v6829_v45 = vld [vmem:[%s6907_s8 + $0x8c] sm:$0x1]  ;;  %v6745_v23 = vld [vmem:[%s6907_s8 + $0x3c] sm:$0xff]  }
  0xdd   : > { %v5401_v60 = vcombine.low %v7645_v6, %v7652_v49  ;;  %v6760_v16 = vld [vmem:[%s8850_s1 + $0x38] sm:$0xff]   ;;  %v7719_v6 = vsel %vm7305_vm6, %v1338_v5, %v1339_v32  ;;  %v7736_v49 = vsel %vm7305_vm6, %v1345_v17, %v1346_v52  ;;  %v1374_v59 = vrot.slane %v6829_v45, 5  ;;  %v5733_v32 = vld [vmem:[%s6907_s8 + $0x28] sm:$0xf]  ;;  %v6832_v14 = vld [vmem:[%s6907_s8 + $0xa0] sm:$0xf] }
  0xde   : > { %v7740_v62 = vsel %vm7305_vm6, %v1352_v4, %v1353_v10  ;;  %v5405_v1 = vcombine.low %v7713_v35, %v7719_v6  ;;  %v5406_v13 = vcombine.low %v7723_v20, %v7736_v49  ;;  %v5391_v33 = vrot.slane %v1253_v43, 9 }
  0xdf   : > { %v5407_v34 = vcombine.low %v7727_v58, %v7740_v62  ;;  %v1378_v5 = vrot.slane %v6830_v51, 5  ;;  %v3730_v10 = vshll.u32 %v5730_v28, 16  ;;  %v3745_v17 = vshrl.u32 %v5732_v56, 16 }
  0xe0   : > { %6157 = vmatmul.mubr.msk.bf16.gmra.mrb[28].mxu1 %vm730_vm3, %v5360_v39  ;;  %v6743_v39 = vld [vmem:[%s6907_s8 + $0x24] sm:$0xff]   ;;  %v3748_v4 = vshll.u32 %v5732_v56, 16  ;;  %v5392_v36 = vrot.slane %v7763_v22, 9  ;;  %v3754_v48 = vshll.u32 %v5733_v32, 16  ;;  %v1385_v26 = vrot.slane %v6832_v14, 5 }
  0xe1   : > { %6164 = vmatprep.mubr.msk.bf16.mxu1 %vm730_vm3, %v5399_v50  ;;  %v6744_v50 = vld [vmem:[%s6907_s8 + $0x30] sm:$0xff]   ;;  %v7818_v40 = vrot.slane %v3730_v10, 5  ;;  %v3747_v43 = vrot.slane %v3745_v17, 4 }
  0xe2   : > { %v7822_v22 = vrot.slane %v3754_v48, 5  ;;  %v7826_v56 = vsel %vm7305_vm6, %v5392_v36, %v1385_v26  ;;  %v1387_v45 = vrot.slane %v1385_v26, 4  ;;  %v6747_v10 = vld [vmem:[%s6907_s8 + $0x54] sm:$0xff]   ;;  %v5738_v48 = vld [vmem:[%s6907_s8 + $0x3c] sm:$0xf] }
  0xe3   : > { %6301 = vmatmul.mubr.msk.bf16.gmra.mrb[28].mxu0 %vm730_vm3, %v5640_v15  ;;  %v6826_v15 = vld [vmem:[%s6907_s8 + $0x74] sm:$0x1] }
  0xe4   : > { %6308 = vmatprep.mubr.msk.bf16.mxu0 %vm730_vm3, %v6741_v38  ;;  %v1360_v21 = vrot.slane %v6826_v15, 5  ;;  %v7731_v38 = vsel %vm7305_vm6, %v5388_v29, %v1357_v54  ;;  %v5390_v54 = vrot.slane %v1252_v41, 9  ;;  %v3734_v29 = vshrl.u32 %v5730_v28, 16  ;;  %v6831_v15 = vld [vmem:[%s6907_s8 + $0x98] sm:$0x1] }
  0xe5   : > { %v1255_v41 = vld [vmem:[%s6907_s8 + $0xa8] sm:$0xe] }
  0xe6   : > { %v7747_v7 = vsel %vm7305_vm6, %v1359_v9, %v1360_v21  ;;  %v6746_v9 = vld [vmem:[%s6907_s8 + $0x48] sm:$0xff]   ;;  %v1381_v21 = vrot.slane %v6831_v15, 5  ;;  %v5393_v51 = vrot.slane %v1255_v41, 9 }
  0xe7   : > { %v5408_v53 = vcombine.low %v7731_v38, %v7747_v7 }
  0xe8   : > { %6165 = vmatmul.mubr.msk.bf16.vlgmr.msra.gmra.mrb[0].mxu1 %vm730_vm3, %v5400_v30  ;;  %v5389_v30 = vrot.slane %v1251_v61, 9  ;;  %v3758_v61 = vshrl.u32 %v5733_v32, 16  ;;  %v1392_v32 = vrot.slane %v7234_v47, 5  ;;  %v6748_v47 = vld [vmem:[%s6907_s8 + $0x60] sm:$0xff]  }
  0xe9   : > { %6168 = vmatprep.mubr.msk.bf16.mxu1 %vm730_vm3, %v5401_v60  ;;  %6197 = vmatpush3.bf16.msra.mxu1 %v7385_v24  ;;  %v5404_v24 = vcombine.low %v7693_v27, %v7709_v25  ;;  %v5729_v60 = vld [vmem:[%s6907_s8 + $0x18] sm:$0xf] }
  0xea   : > { %6198 = vmatprep.subr.bf16.mxu1 %v6760_v16  ;;  %v3721_v52 = vshrl.u32 %v5729_v60, 16  ;;  %v3724_v11 = vshll.u32 %v5729_v60, 16  ;;  %v3760_v60 = vrot.slane %v3758_v61, 4 }
  0xeb   : > { %6309 = vmatmul.mubr.msk.bf16.vlgmr.msra.gmra.mrb[0].mxu0 %vm730_vm3, %v6743_v39  ;;  %v7806_v39 = vsel %vm7305_vm6, %v5391_v33, %v1378_v5 }
  0xec   : > { %6341 = vmatpush3.bf16.msra.mxu0 %v7413_v12  ;;  %6312 = vmatprep.mubr.msk.bf16.mxu0 %vm730_vm3, %v6744_v50  ;;  %v7778_v12 = vsel %vm7305_vm6, %v5389_v30, %v1364_v37  ;;  %v5735_v50 = vld [vmem:[%s6907_s8 + $0x30] sm:$0xf]  ;;  %v1380_v30 = vrot.slane %v1378_v5, 4  ;;  %v3723_v19 = vrot.slane %v3721_v52, 4  ;;  %v3726_v2 = vrot.slane %v3724_v11, 5 }
  0xed   : > { %6342 = vmatprep.subr.bf16.mxu0 %v6751_v18  ;;  %6199 = vmatpush3.bf16.msra.mxu1 %v6760_v16  ;;  %v5409_v37 = vcombine.low %v7778_v12, %v7790_v31  ;;  %v7802_v16 = vsel %vm7305_vm6, %v5390_v54, %v1371_v44  ;;  %v3736_v44 = vrot.slane %v3734_v29, 4  ;;  %v3769_v54 = vshrl.u32 %v5735_v50, 16  ;;  %v1256_v5 = vld [vmem:[%s6907_s8 + $0xb4] sm:$0xe]  ;;  %v7992_v31 = vld [vmem:[%s6907_s8 + $0x70] sm:$0xf] }
  0xee   : > { %v3772_v28 = vshll.u32 %v5735_v50, 16  ;;  %v1399_v52 = vrot.slane %v7265_v46, 5  ;;  %v3727_v11 = vor.u32 %v3726_v2, %v3723_v19  ;;  %v3761_v46 = vor.u32 %v3760_v60, %v7822_v22  ;;  %v8875_v50 = vld [vmem:[#allocation3_spill] sm:$0xff] }
  0xef   : > { %v3737_v17 = vor.u32 %v3736_v44, %v7818_v40  ;;  %v3771_v15 = vrot.slane %v3769_v54, 4  ;;  %v7853_v61 = vsel %vm7305_vm6, %v1380_v30, %v1381_v21  ;;  %v5394_v14 = vrot.slane %v1256_v5, 9  ;;  %v7861_v44 = vld [vmem:[%s6907_s8 + $0x38] sm:$0x1] }
  0xf0   : > { %6169 = vmatmul.mubr.msk.bf16.gmra.mrb[4].mxu1 %vm730_vm3, %v5402_v3  ;;  %6343 = vmatpush3.bf16.msra.mxu0 %v6751_v18  ;;  %v7813_v18 = vsel %vm7305_vm6, %v1373_v55, %v1374_v59  ;;  %v3750_v3 = vrot.slane %v3748_v4, 5  ;;  %v6833_v59 = vld [vmem:[%s6907_s8 + $0xa4] sm:$0x1]  ;;  %v1395_v55 = vrot.slane %v7238_v63, 5  ;;  %v3740_v4 = vshll.u32 %v5731_v57, 16 }
  0xf1   : > { %6172 = vmatprep.mubr.msk.bf16.mxu1 %vm730_vm3, %v5403_v42  ;;  %6376 = vmatprep.subr.bf16.mxu0 %v7785_v8  ;;  %v5734_v42 = vld [vmem:[%s6907_s8 + $0x2c] sm:$0x1]  ;;  %v1388_v33 = vrot.slane %v6833_v59, 5  ;;  %v5410_v29 = vcombine.low %v7802_v16, %v7813_v18  ;;  %v3774_v36 = vrot.slane %v3772_v28, 5  ;;  %v1401_v26 = vrot.slane %v1399_v52, 4 }
  0xf2   : > { %v3751_v63 = vor.u32 %v3750_v3, %v3747_v43  ;;  %v1402_v41 = vrot.slane %v8875_v50, 5  ;;  %v3728_v19 = vrot.slane %v3727_v11, 4  ;;  %v3738_v35 = vrot.slane %v3737_v17, 4  ;;  %v7874_v28 = vld [vmem:[%s6907_s8 + $0x40] sm:$0xf]  ;;  %v6749_v11 = vld [vmem:[%s6907_s8 + $0x6c] sm:$0xff]  }
  0xf3   : > { %6313 = vmatmul.mubr.msk.bf16.gmra.mrb[4].mxu0 %vm730_vm3, %v6745_v23  ;;  %v7834_v23 = vld [vmem:[%s6907_s8 + $0x34] sm:$0xf]  ;;  %v3742_v6 = vrot.slane %v3740_v4, 5  ;;  %v3796_v2 = vshll.u32 %v5738_v48, 16  ;;  %v3762_v30 = vrot.slane %v3761_v46, 4  ;;  %v3775_v43 = vor.u32 %v3774_v36, %v3771_v15  ;;  %v6750_v4 = vld [vmem:[%s6907_s8 + $0x78] sm:$0xff]  }
  0xf4   : > { %6316 = vmatprep.mubr.msk.bf16.mxu0 %vm730_vm3, %v6746_v9  ;;  %v3764_v9 = vshll.u32 %v5734_v42, 16  ;;  %v3778_v27 = vshll.u32 %v7834_v23, 16  ;;  %v3782_v25 = vshrl.u32 %v7834_v23, 16  ;;  %v3752_v21 = vrot.slane %v3751_v63, 4  ;;  %v5741_v46 = vld [vmem:[%s6907_s8 + $0x48] sm:$0xf] }
  0xf5   : > { %v7865_v3 = vsel %vm7305_vm6, %v1387_v45, %v1388_v33  ;;  %v7869_v42 = vsel %vm7305_vm6, %v5393_v51, %v1392_v32  ;;  %v7882_v5 = vsel %vm7305_vm6, %v5394_v14, %v1399_v52  ;;  %v7886_v45 = vsel %vm7305_vm6, %v1401_v26, %v1402_v41  ;;  %v7922_v15 = vld [vmem:[%s6907_s8 + $0x4c] sm:$0xf]  ;;  %v7939_v26 = vld [vmem:[%s6907_s8 + $0x58] sm:$0xf]  ;;  %v8015_v36 = vld [vmem:[%s6907_s8 + $0x7c] sm:$0xf] }
  0xf6   : > { %v3766_v57 = vrot.slane %v3764_v9, 5  ;;  %v7871_v60 = vrot.slane %v3778_v27, 5  ;;  %v3784_v54 = vrot.slane %v3782_v25, 4  ;;  %v3733_v51 = vsel %vm6926_vm2, %v3728_v19, %v7818_v40 }
  0xf7   : > { %v3798_v52 = vrot.slane %v3796_v2, 5  ;;  %v3757_v40 = vsel %vm6926_vm2, %v3752_v21, %v7822_v22  ;;  %v3802_v63 = vshll.u32 %v7874_v28, 16  ;;  %v3817_v25 = vshrl.u32 %v5741_v46, 16 }
  0xf8   : > { %6173 = vmatmul.mubr.msk.bf16.gmra.mrb[8].mxu1 %vm730_vm3, %v5404_v24  ;;  %v1394_v24 = vrot.slane %v1392_v32, 4  ;;  %v7892_v32 = vld [vmem:[%s6907_s8 + $0x44] sm:$0x1]  ;;  %v3767_v9 = vsel %vm6926_vm2, %v3762_v30, %v3766_v57  ;;  %v3785_v49 = vor.u32 %v3784_v54, %v7871_v60  ;;  %v3820_v19 = vshll.u32 %v5741_v46, 16 }
  0xf9   : > { %6176 = vmatprep.mubr.msk.bf16.mxu1 %vm730_vm3, %v5405_v1  ;;  %v3793_v1 = vshrl.u32 %v5738_v48, 16  ;;  %v3812_v22 = vshll.u32 %v7892_v32, 16  ;;  %v7933_v48 = vcombine.low %v3757_v40, %v3767_v9  ;;  %v7946_v41 = vrot.slane %v3802_v63, 5  ;;  %v7956_v57 = vld [vmem:[%s6907_s8 + $0x64] sm:$0xf] }
  0xfa   : > { %v7878_v59 = vsel %vm7305_vm6, %v1394_v24, %v1395_v55  ;;  %v3743_v55 = vsel %vm6926_vm2, %v3738_v35, %v3742_v6  ;;  %v5744_v24 = vld [vmem:[%s6907_s8 + $0x54] sm:$0xf]  ;;  %v3826_v35 = vshll.u32 %v7922_v15, 16  ;;  %v5747_v6 = vld [vmem:[%s6907_s8 + $0x60] sm:$0xf]  ;;  %v3830_v30 = vshrl.u32 %v7922_v15, 16 }
  0xfb   : > { %6317 = vmatmul.mubr.msk.bf16.gmra.mrb[8].mxu0 %vm730_vm3, %v6747_v10  ;;  %v3788_v10 = vshll.u32 %v7861_v44, 16  ;;  %v3795_v17 = vrot.slane %v3793_v1, 4  ;;  %v7950_v1 = vrot.slane %v3785_v49, 4  ;;  %v7952_v21 = vrot.slane %v3812_v22, 5  ;;  %v5750_v22 = vld [vmem:[%s6907_s8 + $0x6c] sm:$0xf] }
  0xfc   : > { %6320 = vmatprep.mubr.msk.bf16.mxu0 %vm730_vm3, %v6748_v47  ;;  %v7908_v47 = vrot.slane %v3775_v43, 4  ;;  %v7959_v43 = vld [vmem:[%s6907_s8 + $0x50] sm:$0x1]  ;;  %v3841_v54 = vshrl.u32 %v5744_v24, 16  ;;  %v3865_v40 = vshrl.u32 %v5747_v6, 16  ;;  %v3868_v9 = vshll.u32 %v5747_v6, 16 }
  0xfd   : > { %v7935_v14 = vrot.slane %v3788_v10, 5  ;;  %v3799_v27 = vor.u32 %v3798_v52, %v3795_v17  ;;  %v6752_v10 = vld [vmem:[%s6907_s8 + $0x84] sm:$0xff]   ;;  %v6753_v17 = vld [vmem:[%s6907_s8 + $0x90] sm:$0xff]   ;;  %v3822_v63 = vrot.slane %v3820_v19, 5  ;;  %v7971_v46 = vrot.slane %v3826_v35, 5 }
  0xfe   : > { %v3874_v49 = vshll.u32 %v7956_v57, 16  ;;  %v3870_v6 = vrot.slane %v3868_v9, 5  ;;  %v3889_v62 = vshrl.u32 %v5750_v22, 16  ;;  %v3892_v50 = vshll.u32 %v5750_v22, 16 }
  0xff   : > { %v7965_v52 = vrot.slane %v3799_v27, 4  ;;  %v3836_v27 = vshll.u32 %v7959_v43, 16  ;;  %v3898_v9 = vshll.u32 %v7992_v31, 16 }
 0x100   : > { %6177 = vmatmul.mubr.msk.bf16.gmra.mrb[12].mxu1 %vm730_vm3, %v5406_v13  ;;  %v3806_v13 = vshrl.u32 %v7874_v28, 16  ;;  %v3894_v58 = vrot.slane %v3892_v50, 5 }
 0x101   : > { %6180 = vmatprep.mubr.msk.bf16.mxu1 %vm730_vm3, %v5407_v34  ;;  %v7930_v34 = vcombine.low %v3733_v51, %v3743_v55  ;;  %v3844_v51 = vshll.u32 %v5744_v24, 16  ;;  %v3854_v55 = vshrl.u32 %v7939_v26, 16  ;;  %v3843_v24 = vrot.slane %v3841_v54, 4 }
 0x102   : > { %v3808_v2 = vrot.slane %v3806_v13, 4  ;;  %v3878_v13 = vshrl.u32 %v7956_v57, 16  ;;  %v8031_v16 = vrot.slane %v3898_v9, 5 }
 0x103   : > { %6321 = vmatmul.mubr.msk.bf16.gmra.mrb[12].mxu0 %vm730_vm3, %v6749_v11  ;;  %v3850_v11 = vshll.u32 %v7939_v26, 16  ;;  %v3846_v19 = vrot.slane %v3844_v51, 5  ;;  %v3856_v12 = vrot.slane %v3854_v55, 4  ;;  %v8001_v51 = vrot.slane %v3874_v49, 5 }
 0x104   : > { %6324 = vmatprep.mubr.msk.bf16.mxu0 %vm730_vm3, %v6750_v4  ;;  %v3819_v4 = vrot.slane %v3817_v25, 4  ;;  %v3809_v7 = vor.u32 %v3808_v2, %v7946_v41  ;;  %v7987_v25 = vld [vmem:[%s6907_s8 + $0x5c] sm:$0x1]  ;;  %v5753_v2 = vld [vmem:[%s6907_s8 + $0x78] sm:$0xf] }
 0x105   : > { %v7989_v35 = vrot.slane %v3850_v11, 5  ;;  %v3880_v11 = vrot.slane %v3878_v13, 4  ;;  %v3847_v38 = vor.u32 %v3846_v19, %v3843_v24  ;;  %v3838_v24 = vrot.slane %v3836_v27, 5 }
 0x106   : > { %v3823_v54 = vor.u32 %v3822_v63, %v3819_v4  ;;  %v8010_v22 = vrot.slane %v3809_v7, 4  ;;  %v3916_v4 = vshll.u32 %v5753_v2, 16  ;;  %v6754_v63 = vld [vmem:[%s6907_s8 + $0x9c] sm:$0xff]   ;;  %v6755_v7 = vld [vmem:[%s6907_s8 + $0xa8] sm:$0xff]   ;;  %v3922_v27 = vshll.u32 %v8015_v36, 16 }
 0x107   : > { %v3857_v49 = vor.u32 %v3856_v12, %v7989_v35  ;;  %v3881_v19 = vor.u32 %v3880_v11, %v8001_v51  ;;  %v8877_v12 = vcombine.low %v7806_v39, %v7853_v61  ;;  %v5756_v11 = vld [vmem:[%s6907_s8 + $0x84] sm:$0xf]  ;;  %v3848_v39 = vrot.slane %v3847_v38, 4 }
 0x108   : > { %6181 = vmatmul.mubr.msk.bf16.gmra.mrb[16].mxu1 %vm730_vm3, %v5408_v53  ;;  %v3832_v53 = vrot.slane %v3830_v30, 4  ;;  %v3913_v30 = vshrl.u32 %v5753_v2, 16  ;;  %v3824_v20 = vrot.slane %v3823_v54, 4  ;;  %v3926_v54 = vshrl.u32 %v8015_v36, 16 }
 0x109   : > { %6184 = vmatprep.mubr.msk.bf16.mxu1 %vm730_vm3, %v5409_v37  ;;  %v3867_v37 = vrot.slane %v3865_v40, 4  ;;  %v8006_v40 = vld [vmem:[%s6907_s8 + $0x68] sm:$0x1]  ;;  %v3858_v61 = vrot.slane %v3857_v49, 4  ;;  %v3937_v49 = vshrl.u32 %v5756_v11, 16 }
 0x10a   : > { %v3833_v55 = vor.u32 %v3832_v53, %v7971_v46  ;;  %v3891_v53 = vrot.slane %v3889_v62, 4  ;;  %v3884_v2 = vshll.u32 %v8006_v40, 16  ;;  %v3829_v9 = vsel %vm6926_vm2, %v3824_v20, %v7971_v46  ;;  %v6756_v46 = vld [vmem:[%s6907_s8 + $0xb4] sm:$0xff]  }
 0x10b   : > { %6325 = vmatmul.mubr.msk.bf16.gmra.mrb[16].mxu0 %vm730_vm3, %v6752_v10  ;;  %v3860_v10 = vshll.u32 %v7987_v25, 16  ;;  %v3871_v13 = vor.u32 %v3870_v6, %v3867_v37  ;;  %v8029_v37 = vld [vmem:[%s6907_s8 + $0x74] sm:$0x1]  ;;  %v3918_v6 = vrot.slane %v3916_v4, 5  ;;  %v3928_v20 = vrot.slane %v3926_v54, 4 }
 0x10c   : > { %6328 = vmatprep.mubr.msk.bf16.mxu0 %vm730_vm3, %v6753_v17  ;;  %v3902_v17 = vshrl.u32 %v7992_v31, 16  ;;  %v3834_v62 = vrot.slane %v3833_v55, 4  ;;  %v3886_v4 = vrot.slane %v3884_v2, 5 }
 0x10d   : > { %v3862_v50 = vrot.slane %v3860_v10, 5  ;;  %v3872_v55 = vrot.slane %v3871_v13, 4  ;;  %v3895_v10 = vor.u32 %v3894_v58, %v3891_v53  ;;  %v3908_v58 = vshll.u32 %v8029_v37, 16 }
 0x10e   : > { %v3904_v18 = vrot.slane %v3902_v17, 4  ;;  %v3882_v17 = vrot.slane %v3881_v19, 4  ;;  %v3940_v13 = vshll.u32 %v5756_v11, 16  ;;  %v8055_v53 = vrot.slane %v3922_v27, 5  ;;  %v8091_v11 = vld [vmem:[%s6907_s8 + $0x90] sm:$0xf] }
 0x10f   : > { %v3863_v19 = vsel %vm6926_vm2, %v3858_v61, %v3862_v50  ;;  %v3877_v2 = vsel %vm6926_vm2, %v3872_v55, %v8001_v51  ;;  %v8879_v51 = vcombine.low %v7869_v42, %v7878_v59  ;;  %v8086_v27 = vrot.slane %v3937_v49, 4  ;;  %v6761_v49 = vld [vmem:[%s6907_s8 + $0xc] sm:$0xff]  }
 0x110   : > { %6185 = vmatmul.mubr.msk.bf16.gmra.mrb[20].mxu1 %vm730_vm3, %v5410_v29  ;;  %v3915_v29 = vrot.slane %v3913_v30, 4  ;;  %v3815_v30 = vsel %vm6926_vm2, %v8010_v22, %v7952_v21  ;;  %v3905_v38 = vor.u32 %v3904_v18, %v8031_v16  ;;  %v3839_v21 = vsel %vm6926_vm2, %v3834_v62, %v3838_v24  ;;  %v6757_v62 = vld [vmem:[%s6907_s8 + $0xc0] sm:$0xff]  }
 0x111   : > { %6188 = vmatprep.mubr.msk.bf16.mxu1 %vm730_vm3, %v8877_v12  ;;  %v8046_v12 = vld [vmem:[%s6907_s8 + $0x88] sm:$0xf]  ;;  %v8066_v18 = vrot.slane %v3895_v10, 4  ;;  %v8878_v24 = vcombine.low %v7826_v56, %v7865_v3  ;;  %v8084_v3 = vrot.slane %v3908_v58, 5  ;;  %v8088_v54 = vrot.slane %v3940_v13, 5 }
 0x112   : > { %v3919_v22 = vor.u32 %v3918_v6, %v3915_v29  ;;  %v3887_v29 = vsel %vm6926_vm2, %v3882_v17, %v3886_v4  ;;  %v3946_v50 = vshll.u32 %v8046_v12, 16  ;;  %v3950_v6 = vshrl.u32 %v8046_v12, 16  ;;  %v8310_v13 = vld [vmem:[%s6907_s8 + $0xb0] sm:$0x1] }
 0x113   : > { %6329 = vmatmul.mubr.msk.bf16.gmra.mrb[20].mxu0 %vm730_vm3, %v6754_v63  ;;  %v8051_v63 = vld [vmem:[%s6907_s8 + $0x80] sm:$0x1]  ;;  %v8082_v56 = vrot.slane %v3905_v38, 4  ;;  %v8881_v42 = vsel %vm6926_vm2, %v7908_v47, %v7871_v60  ;;  %v8882_v61 = vsel %vm6926_vm2, %v7965_v52, %v7946_v41  ;;  %v8117_v17 = vcombine.low %v3829_v9, %v3839_v21  ;;  %v8128_v52 = vld [vmem:[%s6907_s8 + $0x8c] sm:$0x1] }
 0x114   : > { %6332 = vmatprep.mubr.msk.bf16.mxu0 %vm730_vm3, %v6755_v7  ;;  %v3853_v7 = vsel %vm6926_vm2, %v3848_v39, %v7989_v35  ;;  %v3932_v35 = vshll.u32 %v8051_v63, 16  ;;  %v8880_v39 = vsel %vm6926_vm2, %v7950_v1, %v7935_v14  ;;  %v8110_v55 = vcombine.low %v8882_v61, %v3815_v30  ;;  %v5817_v1 = vld [vmem:[%s6907_s8 + $0x30] sm:$0xe]  ;;  %v8138_v38 = vld [vmem:[%s6907_s8 + $0x94] sm:$0xf] }
 0x115   : > { %v8103_v59 = vcombine.low %v8881_v42, %v8880_v39  ;;  %v8112_v10 = vrot.slane %v3919_v22, 4  ;;  %v3929_v14 = vor.u32 %v3928_v20, %v8055_v53  ;;  %v8119_v60 = vcombine.low %v3853_v7, %v3863_v19  ;;  %v8296_v41 = vld [vmem:[%s6907_s8 + $0xac] sm:$0xf] }
 0x116   : > { %v8121_v47 = vcombine.low %v3877_v2, %v3887_v29  ;;  %v8131_v30 = vrot.slane %v3932_v35, 5  ;;  %v8133_v9 = vrot.slane %v3946_v50, 5  ;;  %v8135_v4 = vrot.slane %v3950_v6, 4  ;;  %v6759_v29 = vld [vmem:[%s6907_s8 + $0xcc] sm:$0xff]   ;;  %v8313_v2 = vld [vmem:[%s6907_s8 + $0xb8] sm:$0xf] }
 0x117   : > { %v3961_v58 = vshrl.u32 %v8091_v11, 16  ;;  %v5833_v22 = vrot.slane %v5817_v1, 9  ;;  %v4490_v20 = vrot.slane %v7834_v23, 5  ;;  %v8154_v19 = vrot.slane %v3929_v14, 4  ;;  %v5820_v14 = vld [vmem:[%s6907_s8 + $0x54] sm:$0xe] }
 0x118   : > { %6189 = vmatmul.mubr.msk.bf16.gmra.mrb[24].mxu1 %vm730_vm3, %v8878_v24  ;;  %v4493_v24 = vrot.slane %v7861_v44, 5  ;;  %v4497_v61 = vrot.slane %v7874_v28, 5  ;;  %v4560_v44 = vrot.slane %v8296_v41, 5  ;;  %v4563_v21 = vrot.slane %v8310_v13, 5  ;;  %v8346_v23 = vld [vmem:[%s6907_s8 + $0xd0] sm:$0xf] }
 0x119   : > { %6192 = vmatprep.mubr.msk.bf16.mxu1 %vm730_vm3, %v8879_v51  ;;  %v8164_v50 = vsel %vm7305_vm6, %v5833_v22, %v4490_v20  ;;  %v4492_v6 = vrot.slane %v4490_v20, 4  ;;  %v8883_v51 = vcombine.low %v7882_v5, %v7886_v45  ;;  %v8172_v39 = vrot.slane %v3961_v58, 4  ;;  %v5821_v20 = vld [vmem:[%s6907_s8 + $0x60] sm:$0xe]  ;;  %v6763_v58 = vld [vmem:[%s6907_s8 + $0x18] sm:$0xff]  }
 0x11a   : > { %v4500_v45 = vrot.slane %v7892_v32, 5  ;;  %v4511_v32 = vrot.slane %v7939_v26, 5  ;;  %v6764_v26 = vld [vmem:[%s6907_s8 + $0x24] sm:$0xff]  }
 0x11b   : > { %6333 = vmatmul.mubr.msk.bf16.gmra.mrb[24].mxu0 %vm730_vm3, %v6756_v46  ;;  %v5818_v46 = vld [vmem:[%s6907_s8 + $0x3c] sm:$0xe]  ;;  %v8180_v5 = vsel %vm7305_vm6, %v4492_v6, %v4493_v24  ;;  %v4507_v24 = vrot.slane %v7959_v43, 5  ;;  %v5836_v6 = vrot.slane %v5820_v14, 9  ;;  %v4518_v14 = vrot.slane %v7956_v57, 5 }
 0x11c   : > { %6336 = vmatprep.mubr.msk.bf16.mxu0 %vm730_vm3, %v6757_v62  ;;  %v5819_v62 = vld [vmem:[%s6907_s8 + $0x48] sm:$0xe]  ;;  %v5834_v42 = vrot.slane %v5818_v46, 9  ;;  %v4504_v46 = vrot.slane %v7922_v15, 5 }
 0x11d   : > { %v5835_v22 = vrot.slane %v5819_v62, 9  ;;  %v4514_v62 = vrot.slane %v7987_v25, 5 }
 0x11e   : > { %v8188_v28 = vsel %vm7305_vm6, %v5834_v42, %v4497_v61  ;;  %v4506_v43 = vrot.slane %v4504_v46, 4 }
 0x11f   : > { %v8205_v15 = vsel %vm7305_vm6, %v5835_v22, %v4504_v46  ;;  %v4521_v22 = vrot.slane %v8006_v40, 5  ;;  %v5823_v46 = vld [vmem:[%s6907_s8 + $0x78] sm:$0xe] }
 0x120   : > { %6193 = vmatmul.mubr.msk.bf16.gmra.mrb[28].mxu1 %vm730_vm3, %v8883_v51  ;;  %v5822_v51 = vld [vmem:[%s6907_s8 + $0x6c] sm:$0xe] }
 0x121   : > { %6200 = vmatprep.mubr.msk.bf16.mxu1 %vm730_vm3, %v6761_v49  ;;  %v4499_v49 = vrot.slane %v4497_v61, 4  ;;  %v8212_v61 = vsel %vm7305_vm6, %v5836_v6, %v4511_v32 }
 0x123   : > { %6337 = vmatmul.mubr.msk.bf16.gmra.mrb[28].mxu0 %vm730_vm3, %v6759_v29  ;;  %v8201_v42 = vsel %vm7305_vm6, %v4499_v49, %v4500_v45  ;;  %v5837_v29 = vrot.slane %v5821_v20, 9  ;;  %v8217_v45 = vsel %vm7305_vm6, %v4506_v43, %v4507_v24  ;;  %v5838_v49 = vrot.slane %v5822_v51, 9  ;;  %v6771_v43 = vld [vmem:[%s8850_s1 + $0x88] sm:$0xff]  }
 0x124   : > { %6344 = vmatprep.mubr.msk.bf16.mxu0 %vm730_vm3, %v7930_v34  ;;  %v4513_v34 = vrot.slane %v4511_v32, 4  ;;  %v4525_v20 = vrot.slane %v7992_v31, 5  ;;  %v4520_v24 = vrot.slane %v4518_v14, 4  ;;  %v5824_v32 = vld [vmem:[%s6907_s8 + $0x84] sm:$0xe]  ;;  %v4539_v31 = vrot.slane %v8046_v12, 5 }
 0x125   : > { %v8230_v57 = vsel %vm7305_vm6, %v5837_v29, %v4518_v14  ;;  %v5839_v29 = vrot.slane %v5823_v46, 9  ;;  %v4535_v14 = vrot.slane %v8051_v63, 5  ;;  %v8266_v63 = vld [vmem:[%s6907_s8 + $0xa0] sm:$0xf]  ;;  %v4542_v12 = vrot.slane %v8128_v52, 5 }
 0x126   : > { %v8226_v6 = vsel %vm7305_vm6, %v4513_v34, %v4514_v62  ;;  %v8238_v40 = vsel %vm7305_vm6, %v5838_v49, %v4525_v20  ;;  %v4527_v51 = vrot.slane %v4525_v20, 4  ;;  %v4528_v62 = vrot.slane %v8029_v37, 5  ;;  %v5825_v49 = vld [vmem:[%s6907_s8 + $0x90] sm:$0xe]  ;;  %v6766_v37 = vld [vmem:[%s6907_s8 + $0x3c] sm:$0xff]  }
 0x127   : > { %v4532_v34 = vrot.slane %v8015_v36, 5  ;;  %v5840_v20 = vrot.slane %v5824_v32, 9  ;;  %v8263_v36 = vld [vmem:[%s6907_s8 + $0x98] sm:$0x1]  ;;  %v8280_v32 = vld [vmem:[%s6907_s8 + $0xa4] sm:$0x1]  ;;  %v8906_v0 = vcombine.low %v8212_v61, %v8226_v6 }
 0x128   : > { %6201 = vmatmul.mubr.msk.bf16.vlgmr.msra.gmra.mrb[0].mxu1 %vm730_vm3, %v6763_v58  ;;  %v8247_v58 = vsel %vm7305_vm6, %v4520_v24, %v4521_v22  ;;  %v5826_v22 = vld [vmem:[%s6907_s8 + $0x9c] sm:$0xe]  ;;  %v4546_v46 = vrot.slane %v8138_v38, 5  ;;  %v4553_v7 = vrot.slane %v8266_v63, 5  ;;  %v6779_v61 = vld [vmem:[%s8852_s3] sm:$0xff]  }
 0x129   : > { %6204 = vmatprep.mubr.msk.bf16.mxu1 %vm730_vm3, %v6764_v26  ;;  %v8256_v26 = vsel %vm7305_vm6, %v4527_v51, %v4528_v62  ;;  %v8272_v24 = vsel %vm7305_vm6, %v5839_v29, %v4532_v34  ;;  %v4534_v51 = vrot.slane %v4532_v34, 4  ;;  %v8284_v62 = vsel %vm7305_vm6, %v5840_v20, %v4539_v31  ;;  %v5827_v20 = vld [vmem:[%s6907_s8 + $0xa8] sm:$0xe]  ;;  %6412 = vmatprep.subr.bf16.mxu1 %v6779_v61 }
 0x12a   : > { %8884 = vst [vmem:[#allocation3_spill] sm:$0xff] %v8272_v24  ;;  %8885 = vst [vmem:[#allocation2_spill] sm:$0xff] %v8284_v62  ;;  %v4541_v29 = vrot.slane %v4539_v31, 4  ;;  %v5841_v34 = vrot.slane %v5825_v49, 9  ;;  %v5842_v25 = vrot.slane %v5826_v22, 9  ;;  %6413 = vmatpush3.bf16.msra.mxu1 %v6779_v61 }
 0x12b   : > { %6345 = vmatmul.mubr.msk.bf16.vlgmr.msra.gmra.mrb[0].mxu0 %vm730_vm3, %v7933_v48  ;;  %v6765_v48 = vld [vmem:[%s6907_s8 + $0x30] sm:$0xff]  }
 0x12c   : > { %6377 = vmatpush3.bf16.msra.mxu0 %v7785_v8  ;;  %6348 = vmatprep.mubr.msk.bf16.mxu0 %vm730_vm3, %v8103_v59  ;;  %v8290_v8 = vsel %vm7305_vm6, %v4534_v51, %v4535_v14  ;;  %v4549_v59 = vrot.slane %v8263_v36, 5  ;;  %v8302_v49 = vsel %vm7305_vm6, %v4541_v29, %v4542_v12  ;;  %v8306_v14 = vsel %vm7305_vm6, %v5841_v34, %v4546_v46  ;;  %v5828_v22 = vld [vmem:[%s6907_s8 + $0xb4] sm:$0xe] }
 0x12d   : > { %6378 = vmatprep.subr.bf16.mxu0 %v6771_v43  ;;  %8886 = vst [vmem:[#allocation4_spill] sm:$0xff] %v8290_v8  ;;  %8887 = vst [vmem:[#allocation5_spill] sm:$0xff] %v8302_v49  ;;  %v4548_v51 = vrot.slane %v4546_v46, 4  ;;  %v8319_v31 = vsel %vm7305_vm6, %v5842_v25, %v4553_v7  ;;  %v4555_v12 = vrot.slane %v4553_v7, 4  ;;  %v4556_v29 = vrot.slane %v8280_v32, 5 }
 0x12e   : > { %8888 = vst [vmem:[#allocation6_spill] sm:$0xff] %v8306_v14  ;;  %8889 = vst [vmem:[#allocation7_spill] sm:$0xff] %v8319_v31  ;;  %v5843_v34 = vrot.slane %v5827_v20, 9  ;;  %v5829_v25 = vld [vmem:[%s6907_s8 + $0xc0] sm:$0xe]  ;;  %v4581_v14 = vrot.slane %v8346_v23, 5 }
 0x12f   : > { %v8325_v46 = vsel %vm7305_vm6, %v4548_v51, %v4549_v59  ;;  %v8332_v7 = vld [vmem:[%s6907_s8 + $0xbc] sm:$0x1]  ;;  %v4567_v59 = vrot.slane %v8313_v2, 5  ;;  %v5830_v20 = vld [vmem:[%s6907_s8 + $0xcc] sm:$0xe] }
 0x130   : > { %6205 = vmatmul.mubr.msk.bf16.gmra.mrb[4].mxu1 %vm730_vm3, %v6765_v48  ;;  %6379 = vmatpush3.bf16.msra.mxu0 %v6771_v43  ;;  %8890 = vst [vmem:[#allocation8_spill] sm:$0xff] %v8325_v46  ;;  %v8338_v43 = vsel %vm7305_vm6, %v4555_v12, %v4556_v29  ;;  %v5844_v48 = vrot.slane %v5828_v22, 9  ;;  %v8343_v51 = vld [vmem:[%s6907_s8 + $0xc4] sm:$0xf]  ;;  %v8352_v1 = vsel %vm7305_vm6, %v5843_v34, %v4560_v44  ;;  %v4562_v12 = vrot.slane %v4560_v44, 4  ;;  %v6767_v44 = vld [vmem:[%s6907_s8 + $0x48] sm:$0xff]  }
 0x131   : > { %6208 = vmatprep.mubr.msk.bf16.mxu1 %vm730_vm3, %v6766_v37  ;;  %8891 = vst [vmem:[#allocation9_spill] sm:$0xff] %v8338_v43  ;;  %8892 = vst [vmem:[#allocation10_spill] sm:$0xff] %v8352_v1  ;;  %v4570_v22 = vrot.slane %v8332_v7, 5  ;;  %v8358_v29 = vld [vmem:[%s6907_s8 + $0xc8] sm:$0x1]  ;;  %v4569_v37 = vrot.slane %v4567_v59, 4 }
 0x132   : > { %v8362_v35 = vsel %vm7305_vm6, %v5844_v48, %v4567_v59  ;;  %v5845_v43 = vrot.slane %v5829_v25, 9  ;;  %v4574_v31 = vrot.slane %v8343_v51, 5  ;;  %v8370_v34 = vsel %vm7305_vm6, %v4562_v12, %v4563_v21  ;;  %v6768_v48 = vld [vmem:[%s6907_s8 + $0x54] sm:$0xff]   ;;  %v5762_v49 = vld [vmem:[%s6907_s8 + $0x9c] sm:$0xf] }
 0x133   : > { %6349 = vmatmul.mubr.msk.bf16.gmra.mrb[4].mxu0 %vm730_vm3, %v8110_v55  ;;  %8893 = vst [vmem:[#allocation11_spill] sm:$0xff] %v8370_v34  ;;  %v4577_v55 = vrot.slane %v8358_v29, 5  ;;  %v5846_v46 = vrot.slane %v5830_v20, 9  ;;  %v8377_v59 = vld [vmem:[%s6907_s8 + $0xd4] sm:$0x1]  ;;  %v4583_v8 = vrot.slane %v4581_v14, 4 }
 0x134   : > { %6352 = vmatprep.mubr.msk.bf16.mxu0 %vm730_vm3, %v8117_v17  ;;  %v8383_v17 = vsel %vm7305_vm6, %v4569_v37, %v4570_v22  ;;  %v8387_v21 = vsel %vm7305_vm6, %v5845_v43, %v4574_v31  ;;  %v4576_v12 = vrot.slane %v4574_v31, 4  ;;  %v4584_v24 = vrot.slane %v8377_v59, 5  ;;  %v5765_v1 = vld [vmem:[%s6907_s8 + $0xa8] sm:$0xf]  ;;  %v8913_v6 = vld [vmem:[#allocation5_spill] sm:$0xff] }
 0x135   : > { %v8393_v62 = vsel %vm7305_vm6, %v5846_v46, %v4581_v14  ;;  %v8894_v25 = vshll.u32 %v8091_v11, 16  ;;  %v8895_v37 = vshll.u32 %v8138_v38, 16  ;;  %v8896_v43 = vshrl.u32 %v8138_v38, 16 }
 0x136   : > { %v8407_v20 = vsel %vm7305_vm6, %v4576_v12, %v4577_v55  ;;  %v3985_v14 = vshrl.u32 %v5762_v49, 16  ;;  %v3988_v46 = vshll.u32 %v5762_v49, 16  ;;  %v8897_v38 = vor.u32 %v8088_v54, %v8086_v27 }
 0x137   : > { %v3966_v34 = vrot.slane %v8894_v25, 5  ;;  %v8400_v22 = vrot.slane %v8895_v37, 5  ;;  %v3976_v31 = vrot.slane %v8896_v43, 4  ;;  %v8414_v25 = vsel %vm7305_vm6, %v4583_v8, %v4584_v24 }
 0x138   : > { %6209 = vmatmul.mubr.msk.bf16.gmra.mrb[8].mxu1 %vm730_vm3, %v6767_v44  ;;  %v3944_v37 = vrot.slane %v8897_v38, 4  ;;  %v8898_v55 = vor.u32 %v8135_v4, %v8133_v9  ;;  %v8899_v49 = vshll.u32 %v8128_v52, 16  ;;  %v5866_v43 = vcombine.low %v8393_v62, %v8414_v25 }
 0x139   : > { %6212 = vmatprep.mubr.msk.bf16.mxu1 %vm730_vm3, %v6768_v48  ;;  %v3994_v24 = vshll.u32 %v8266_v63, 16  ;;  %v3998_v8 = vshrl.u32 %v8266_v63, 16  ;;  %v4009_v48 = vshrl.u32 %v5765_v1, 16  ;;  %v4012_v11 = vshll.u32 %v5765_v1, 16  ;;  %v6769_v63 = vld [vmem:[%s6907_s8 + $0x60] sm:$0xff]  }
 0x13a   : > { %v3954_v44 = vrot.slane %v8898_v55, 4  ;;  %v3958_v12 = vrot.slane %v8899_v49, 5  ;;  %v3935_v27 = vsel %vm6926_vm2, %v8154_v19, %v8131_v30  ;;  %v3980_v54 = vshll.u32 %v8263_v36, 16 }
 0x13b   : > { %6353 = vmatmul.mubr.msk.bf16.gmra.mrb[8].mxu0 %vm730_vm3, %v8119_v60  ;;  %v4018_v52 = vshll.u32 %v8296_v41, 16  ;;  %v4022_v4 = vshrl.u32 %v8296_v41, 16  ;;  %v3967_v1 = vor.u32 %v3966_v34, %v8172_v39  ;;  %v3977_v60 = vor.u32 %v3976_v31, %v8400_v22 }
 0x13c   : > { %6356 = vmatprep.mubr.msk.bf16.mxu0 %vm730_vm3, %v8121_v47  ;;  %v3987_v38 = vrot.slane %v3985_v14, 4  ;;  %v3990_v55 = vrot.slane %v3988_v46, 5  ;;  %v8900_v30 = vsel %vm6926_vm2, %v8082_v56, %v8084_v3  ;;  %v8901_v41 = vsel %vm6926_vm2, %v8066_v18, %v8031_v16  ;;  %v6770_v47 = vld [vmem:[%s6907_s8 + $0x6c] sm:$0xff]  }
 0x13d   : > { %v5788_v19 = vcombine.low %v8901_v41, %v8900_v30  ;;  %v3949_v39 = vsel %vm6926_vm2, %v3944_v37, %v8133_v9  ;;  %v3959_v36 = vsel %vm6926_vm2, %v3954_v44, %v3958_v12  ;;  %v8459_v34 = vrot.slane %v3994_v24, 5  ;;  %v5768_v9 = vld [vmem:[%s6907_s8 + $0xb4] sm:$0xf] }
 0x13e   : > { %v4000_v31 = vrot.slane %v3998_v8, 4  ;;  %v4011_v14 = vrot.slane %v4009_v48, 4  ;;  %v4014_v46 = vrot.slane %v4012_v11, 5  ;;  %v8902_v56 = vsel %vm6926_vm2, %v8112_v10, %v8055_v53 }
 0x13f   : > { %v5789_v16 = vcombine.low %v8902_v56, %v3935_v27  ;;  %v3982_v18 = vrot.slane %v3980_v54, 5  ;;  %v8466_v3 = vrot.slane %v4018_v52, 5  ;;  %v4024_v49 = vrot.slane %v4022_v4, 4  ;;  %v5771_v27 = vld [vmem:[%s6907_s8 + $0xc0] sm:$0xf] }
 0x140   : > { %6213 = vmatmul.mubr.msk.bf16.gmra.mrb[12].mxu1 %vm730_vm3, %v6769_v63  ;;  %v3968_v37 = vrot.slane %v3967_v1, 4  ;;  %v3978_v44 = vrot.slane %v3977_v60, 4  ;;  %v3991_v12 = vor.u32 %v3990_v55, %v3987_v38  ;;  %v4004_v11 = vshll.u32 %v8280_v32, 16  ;;  %v6772_v63 = vld [vmem:[%s6907_s8 + $0x78] sm:$0xff]   ;;  %v6773_v55 = vld [vmem:[%s6907_s8 + $0x84] sm:$0xff]  }
 0x141   : > { %6216 = vmatprep.mubr.msk.bf16.mxu1 %vm730_vm3, %v6770_v47  ;;  %v5790_v24 = vcombine.low %v3949_v39, %v3959_v36  ;;  %v4001_v53 = vor.u32 %v4000_v31, %v8459_v34  ;;  %v4015_v10 = vor.u32 %v4014_v46, %v4011_v14  ;;  %v4028_v8 = vshll.u32 %v8310_v13, 16 }
 0x142   : > { %v4033_v48 = vshrl.u32 %v5768_v9, 16  ;;  %v4025_v54 = vor.u32 %v4024_v49, %v8466_v3  ;;  %v4036_v52 = vshll.u32 %v5768_v9, 16  ;;  %v4042_v4 = vshll.u32 %v8313_v2, 16 }
 0x143   : > { %6357 = vmatmul.mubr.msk.bf16.gmra.mrb[12].mxu0 %vm730_vm3, %v5788_v19  ;;  %v4046_v32 = vshrl.u32 %v8313_v2, 16  ;;  %v3973_v1 = vsel %vm6926_vm2, %v3968_v37, %v8400_v22  ;;  %v3983_v13 = vsel %vm6926_vm2, %v3978_v44, %v3982_v18  ;;  %v3992_v60 = vrot.slane %v3991_v12, 4 }
 0x144   : > { %6360 = vmatprep.mubr.msk.bf16.mxu0 %vm730_vm3, %v5789_v16  ;;  %v4006_v38 = vrot.slane %v4004_v11, 5  ;;  %v4057_v30 = vshrl.u32 %v5771_v27, 16  ;;  %v4060_v41 = vshll.u32 %v5771_v27, 16  ;;  %v4066_v19 = vshll.u32 %v8343_v51, 16  ;;  %v6774_v27 = vld [vmem:[%s6907_s8 + $0x90] sm:$0xff]  }
 0x145   : > { %v4070_v47 = vshrl.u32 %v8343_v51, 16  ;;  %v4002_v2 = vrot.slane %v4001_v53, 4  ;;  %v4016_v39 = vrot.slane %v4015_v10, 4  ;;  %v4030_v36 = vrot.slane %v4028_v8, 5  ;;  %v5774_v51 = vld [vmem:[%s6907_s8 + $0xcc] sm:$0xf] }
 0x146   : > { %v4035_v31 = vrot.slane %v4033_v48, 4  ;;  %v4026_v14 = vrot.slane %v4025_v54, 4  ;;  %v4038_v46 = vrot.slane %v4036_v52, 5  ;;  %v4044_v22 = vrot.slane %v4042_v4, 5 }
 0x147   : > { %v4048_v56 = vrot.slane %v4046_v32, 4  ;;  %v5791_v16 = vcombine.low %v3973_v1, %v3983_v13  ;;  %v4059_v18 = vrot.slane %v4057_v30, 4  ;;  %v4062_v49 = vrot.slane %v4060_v41, 5  ;;  %v6775_v32 = vld [vmem:[%s6907_s8 + $0x9c] sm:$0xff]  }
 0x148   : > { %6217 = vmatmul.mubr.msk.bf16.gmra.mrb[16].mxu1 %vm730_vm3, %v6772_v63  ;;  %v4068_v9 = vrot.slane %v4066_v19, 5  ;;  %v4072_v37 = vrot.slane %v4070_v47, 4  ;;  %v3997_v44 = vsel %vm6926_vm2, %v3992_v60, %v8459_v34  ;;  %v4007_v12 = vsel %vm6926_vm2, %v4002_v2, %v4006_v38 }
 0x149   : > { %6220 = vmatprep.mubr.msk.bf16.mxu1 %vm730_vm3, %v6773_v55  ;;  %v4021_v11 = vsel %vm6926_vm2, %v4016_v39, %v8466_v3  ;;  %v4031_v53 = vsel %vm6926_vm2, %v4026_v14, %v4030_v36  ;;  %v4039_v10 = vor.u32 %v4038_v46, %v4035_v31  ;;  %v4049_v8 = vor.u32 %v4048_v56, %v4044_v22  ;;  %v6776_v39 = vld [vmem:[%s6907_s8 + $0xa8] sm:$0xff]   ;;  %v6777_v56 = vld [vmem:[%s6907_s8 + $0xb4] sm:$0xff]  }
 0x14a   : > { %v4052_v48 = vshll.u32 %v8332_v7, 16  ;;  %v4081_v34 = vshrl.u32 %v5774_v51, 16  ;;  %v4084_v54 = vshll.u32 %v5774_v51, 16  ;;  %v4090_v52 = vshll.u32 %v8346_v23, 16 }
 0x14b   : > { %6361 = vmatmul.mubr.msk.bf16.gmra.mrb[16].mxu0 %vm730_vm3, %v5790_v24  ;;  %v4094_v4 = vshrl.u32 %v8346_v23, 16  ;;  %v4063_v3 = vor.u32 %v4062_v49, %v4059_v18  ;;  %v4073_v63 = vor.u32 %v4072_v37, %v4068_v9  ;;  %v4076_v24 = vshll.u32 %v8358_v29, 16  ;;  %v6834_v49 = vld [vmem:[%s6907_s8 + $0x1c] sm:$0xf]  ;;  %v5815_v37 = vld [vmem:[%s6907_s8 + $0x18] sm:$0xe] }
 0x14c   : > { %6364 = vmatprep.mubr.msk.bf16.mxu0 %vm730_vm3, %v5791_v16  ;;  %v5792_v1 = vcombine.low %v3997_v44, %v4007_v12  ;;  %v5793_v13 = vcombine.low %v4021_v11, %v4031_v53  ;;  %v4040_v60 = vrot.slane %v4039_v10, 4  ;;  %v4050_v38 = vrot.slane %v4049_v8, 4  ;;  %v6835_v10 = vld [vmem:[%s6907_s8 + $0x20] sm:$0x1] }
 0x14d   : > { %v4054_v7 = vrot.slane %v4052_v48, 5  ;;  %v4083_v55 = vrot.slane %v4081_v34, 4  ;;  %v4086_v30 = vrot.slane %v4084_v54, 5  ;;  %v4092_v41 = vrot.slane %v4090_v52, 5  ;;  %v6778_v48 = vld [vmem:[%s6907_s8 + $0xc0] sm:$0xff]  }
 0x14e   : > { %v4096_v19 = vrot.slane %v4094_v4, 4  ;;  %v4064_v23 = vrot.slane %v4063_v3, 4  ;;  %v4074_v47 = vrot.slane %v4073_v63, 4  ;;  %v4078_v29 = vrot.slane %v4076_v24, 5  ;;  %v6836_v54 = vld [vmem:[%s6907_s8 + $0x28] sm:$0xf] }
 0x14f   : > { %v4045_v2 = vsel %vm6926_vm2, %v4040_v60, %v4044_v22  ;;  %v4055_v36 = vsel %vm6926_vm2, %v4050_v38, %v4054_v7  ;;  %v4087_v31 = vor.u32 %v4086_v30, %v4083_v55  ;;  %v4100_v46 = vshll.u32 %v8377_v59, 16  ;;  %v5816_v3 = vld [vmem:[%s6907_s8 + $0x24] sm:$0xe]  ;;  %v6837_v60 = vld [vmem:[%s6907_s8 + $0x2c] sm:$0x1] }
 0x150   : > { %6221 = vmatmul.mubr.msk.bf16.gmra.mrb[20].mxu1 %vm730_vm3, %v6774_v27  ;;  %v4097_v14 = vor.u32 %v4096_v19, %v4092_v41  ;;  %v4069_v16 = vsel %vm6926_vm2, %v4064_v23, %v4068_v9  ;;  %v4079_v18 = vsel %vm6926_vm2, %v4074_v47, %v4078_v29  ;;  %v4476_v22 = vrot.slane %v6834_v49, 5  ;;  %v8918_v23 = vld [vmem:[#allocation7_spill] sm:$0xff]  ;;  %v8919_v47 = vld [vmem:[#allocation9_spill] sm:$0xff] }
 0x151   : > { %6224 = vmatprep.mubr.msk.bf16.mxu1 %vm730_vm3, %v6775_v32  ;;  %v5794_v51 = vcombine.low %v4045_v2, %v4055_v36  ;;  %v5795_v44 = vcombine.low %v4069_v16, %v4079_v18  ;;  %v4088_v12 = vrot.slane %v4087_v31, 4  ;;  %v4102_v59 = vrot.slane %v4100_v46, 5  ;;  %v8921_v2 = vld [vmem:[#allocation10_spill] sm:$0xff]  ;;  %v6780_v46 = vld [vmem:[%s8852_s3 + $0x8] sm:$0xff]  }
 0x152   : > { %v4098_v11 = vrot.slane %v4097_v14, 4  ;;  %v5831_v53 = vrot.slane %v5815_v37, 9  ;;  %v4478_v9 = vrot.slane %v4476_v22, 4  ;;  %v4479_v8 = vrot.slane %v6835_v10, 5  ;;  %6414 = vmatprep.subr.bf16.mxu1 %v6780_v46 }
 0x153   : > { %6365 = vmatmul.mubr.msk.bf16.gmra.mrb[20].mxu0 %vm730_vm3, %v5792_v1  ;;  %v4093_v27 = vsel %vm6926_vm2, %v4088_v12, %v4092_v41  ;;  %v4483_v52 = vrot.slane %v6836_v54, 5  ;;  %v5832_v1 = vrot.slane %v5816_v3, 9  ;;  %v4486_v38 = vrot.slane %v6837_v60, 5  ;;  %6415 = vmatpush3.bf16.msra.mxu1 %v6780_v46 }
 0x154   : > { %6368 = vmatprep.mubr.msk.bf16.mxu0 %vm730_vm3, %v5793_v13  ;;  %v4103_v34 = vsel %vm6926_vm2, %v4098_v11, %v4102_v59  ;;  %v4477_v4 = vsel %vm7305_vm6, %v5831_v53, %v4476_v22  ;;  %v4480_v32 = vsel %vm7305_vm6, %v4478_v9, %v4479_v8  ;;  %v8903_v30 = vcombine.low %v8164_v50, %v8180_v5 }
 0x155   : > { %v5796_v63 = vcombine.low %v4093_v27, %v4103_v34  ;;  %v5851_v24 = vcombine.low %v4477_v4, %v4480_v32  ;;  %v4485_v13 = vrot.slane %v4483_v52, 4  ;;  %v4484_v33 = vsel %vm7305_vm6, %v5832_v1, %v4483_v52 }
 0x156   : > { %v8904_v41 = vcombine.low %v8188_v28, %v8201_v42  ;;  %v8905_v19 = vcombine.low %v8205_v15, %v8217_v45  ;;  %v8907_v50 = vcombine.low %v8230_v57, %v8247_v58  ;;  %v8908_v5 = vcombine.low %v8238_v40, %v8256_v26  ;;  %v8909_v28 = vld [vmem:[#allocation3_spill] sm:$0xff]  ;;  %v8910_v42 = vld [vmem:[#allocation4_spill] sm:$0xff]  ;;  %v8912_v45 = vld [vmem:[#allocation2_spill] sm:$0xff] }
 0x157   : > { %v4487_v7 = vsel %vm7305_vm6, %v4485_v13, %v4486_v38  ;;  %v8911_v15 = vcombine.low %v8909_v28, %v8910_v42  ;;  %v8914_v57 = vcombine.low %v8912_v45, %v8913_v6  ;;  %v8915_v58 = vld [vmem:[#allocation6_spill] sm:$0xff]  ;;  %v8916_v40 = vld [vmem:[#allocation8_spill] sm:$0xff]  ;;  %v8920_v29 = vcombine.low %v8918_v23, %v8919_v47 }
 0x158   : > { %6225 = vmatmul.mubr.msk.bf16.gmra.mrb[24].mxu1 %vm730_vm3, %v6776_v39  ;;  %v5852_v55 = vcombine.low %v4484_v33, %v4487_v7  ;;  %v8917_v26 = vcombine.low %v8915_v58, %v8916_v40  ;;  %v8922_v39 = vld [vmem:[#allocation11_spill] sm:$0xff]  ;;  %v8924_v31 = vcombine.low %v8362_v35, %v8383_v17  ;;  %v8925_v14 = vcombine.low %v8387_v21, %v8407_v20  ;;  %v8665_v13 = vld [vmem:[%s8851_s2] ss:$0 sm:$0xff] }
 0x159   : > { %6228 = vmatprep.mubr.msk.bf16.mxu1 %vm730_vm3, %v6777_v56  ;;  %v8923_v36 = vcombine.low %v8921_v2, %v8922_v39 }
 0x15b   : > { %6369 = vmatmul.mubr.msk.bf16.gmra.mrb[24].mxu0 %vm730_vm3, %v5794_v51 }
 0x15c   : > { %6372 = vmatprep.mubr.msk.bf16.mxu0 %vm730_vm3, %v5795_v44 }
 0x160   : > { %6229 = vmatmul.mubr.msk.bf16.gmra.mrb[28].mxu1 %vm730_vm3, %v6778_v48 }
 0x163   : > { %6373 = vmatmul.mubr.msk.bf16.gmra.mrb[28].mxu0 %vm730_vm3, %v5796_v63 }
 0x164   : > { %6380 = vmatprep.mubr.msk.bf16.mxu0 %vm730_vm3, %v5851_v24 }
 0x16b   : > { %6381 = vmatmul.mubr.msk.bf16.vlgmr.msra.gmra.mrb[0].mxu0 %vm730_vm3, %v5852_v55 }
 0x16c   : > { %6384 = vmatprep.mubr.msk.bf16.mxu0 %vm730_vm3, %v8903_v30 }
 0x173   : > { %6385 = vmatmul.mubr.msk.bf16.gmra.mrb[4].mxu0 %vm730_vm3, %v8904_v41 }
 0x174   : > { %6388 = vmatprep.mubr.msk.bf16.mxu0 %vm730_vm3, %v8905_v19 }
 0x17b   : > { %6389 = vmatmul.mubr.msk.bf16.gmra.mrb[8].mxu0 %vm730_vm3, %v8906_v0 }
 0x17c   : > { %6392 = vmatprep.mubr.msk.bf16.mxu0 %vm730_vm3, %v8907_v50 }
 0x183   : > { %6393 = vmatmul.mubr.msk.bf16.gmra.mrb[12].mxu0 %vm730_vm3, %v8908_v5 }
 0x184   : > { %6396 = vmatprep.mubr.msk.bf16.mxu0 %vm730_vm3, %v8911_v15 }
 0x18b   : > { %6397 = vmatmul.mubr.msk.bf16.gmra.mrb[16].mxu0 %vm730_vm3, %v8914_v57 }
 0x18c   : > { %6400 = vmatprep.mubr.msk.bf16.mxu0 %vm730_vm3, %v8917_v26 }
 0x193   : > { %6401 = vmatmul.mubr.msk.bf16.gmra.mrb[20].mxu0 %vm730_vm3, %v8920_v29 }
 0x194   : > { %6404 = vmatprep.mubr.msk.bf16.mxu0 %vm730_vm3, %v8923_v36 }
 0x19b   : > { %6405 = vmatmul.mubr.msk.bf16.gmra.mrb[24].mxu0 %vm730_vm3, %v8924_v31 }
 0x19c   : > { %6408 = vmatprep.mubr.msk.bf16.mxu0 %vm730_vm3, %v8925_v14 }
 0x1a3   : > { %6409 = vmatmul.mubr.msk.bf16.gmra.mrb[28].mxu0 %vm730_vm3, %v5866_v43 }
 0x1fb   : > { %v6202_v56 = vpop.f32.mrb[0].mxu1 }
 0x1fc   : > { %v1922_v35 = vpop.f32.mrb[1].mxu1 }
 0x1fd   : > { %v6203_v17 = vpop.f32.mrb[2].mxu1 }
 0x1fe   : > { %v1925_v16 = vpop.f32.mrb[3].mxu1 }
 0x203   : > { %v6206_v18 = vpop.f32.mrb[4].mxu1 }
 0x204   : > { %v1938_v49 = vpop.f32.mrb[5].mxu1 }
 0x205   : > { %v6207_v21 = vpop.f32.mrb[6].mxu1 }
 0x206   : > { %v1941_v20 = vpop.f32.mrb[7].mxu1 }
 0x20b   : > { %v8614_v22 = vpop.f32.mrb[8].mxu1 }
 0x20c   : > { %v8616_v37 = vpop.f32.mrb[9].mxu1 }
 0x20d   : > { %v8618_v62 = vpop.f32.mrb[10].mxu1 }
 0x20e   : > { %v8620_v25 = vpop.f32.mrb[11].mxu1 }
 0x213   : > { %v8622_v43 = vpop.f32.mrb[12].mxu1 }
 0x214   : > { %v8624_v51 = vpop.f32.mrb[13].mxu1 }
 0x215   : > { %v8626_v44 = vpop.f32.mrb[14].mxu1 }
 0x216   : > { %v8628_v12 = vpop.f32.mrb[15].mxu1 }
 0x21b   : > { %v8630_v11 = vpop.f32.mrb[16].mxu1 }
 0x21c   : > { %v8632_v59 = vpop.f32.mrb[17].mxu1 }
 0x21d   : > { %v8634_v53 = vpop.f32.mrb[18].mxu1 }
 0x21e   : > { %v8636_v9 = vpop.f32.mrb[19].mxu1 }
 0x223   : > { %v8638_v10 = vpop.f32.mrb[20].mxu1 }
 0x224   : > { %v8640_v8 = vpop.f32.mrb[21].mxu1 }
 0x225   : > { %v8642_v48 = vpop.f32.mrb[22].mxu1 }
 0x226   : > { %v8644_v27 = vpop.f32.mrb[23].mxu1 }
 0x22b   : > { %v8646_v34 = vpop.f32.mrb[24].mxu1 }
 0x22c   : > { %v8648_v54 = vpop.f32.mrb[25].mxu1 }
 0x22d   : > { %v8650_v52 = vpop.f32.mrb[26].mxu1 }
 0x22e   : > { %v8652_v4 = vpop.f32.mrb[27].mxu1 }
 0x233   : > { %v8654_v32 = vpop.f32.mrb[28].mxu1 }
 0x234   : > { %v8656_v3 = vpop.f32.mrb[29].mxu1 }
 0x235   : > { %v8658_v63 = vpop.f32.mrb[30].mxu1 }
 0x236   : > { %v8660_v24 = vpop.f32.mrb[31].mxu1 }
 0x23e   : > { %v6382_v1 = vpop.f32.mrb[0].mxu0 }
 0x23f   : > { %v6448_v60 = vadd.f32 %v6382_v1, %v6202_v56  ;;  %v4733_v38 = vpop.f32.mrb[1].mxu0 }
 0x240   : > { %v6449_v33 = vadd.f32 %v4733_v38, %v1922_v35  ;;  %v6383_v7 = vpop.f32.mrb[2].mxu0 }
 0x241   : > { %v4901_v55 = vadd.f32 %v6448_v60, %v8665_v13  ;;  %v6450_v30 = vadd.f32 %v6383_v7, %v6203_v17  ;;  %v4736_v41 = vpop.f32.mrb[3].mxu0 }
 0x242   : > { %v4899_v19 = vadd.f32 %v6449_v33, %v8665_v13  ;;  %v6451_v0 = vadd.f32 %v4736_v41, %v1925_v16 }
 0x243   : > { %v4902_v50 = vadd.f32 %v6450_v30, %v8665_v13  ;;  %v4933_v28 = vmax.f32 %v4901_v55, 0.0 }
 0x244   : > { %v4900_v5 = vadd.f32 %v6451_v0, %v8665_v13  ;;  %v4931_v15 = vmax.f32 %v4899_v19, 0.0 }
 0x245   : > { %v4934_v42 = vmax.f32 %v4902_v50, 0.0 }
 0x246   : > { %v4932_v61 = vmax.f32 %v4900_v5, 0.0  ;;  %v6386_v45 = vpop.f32.mrb[4].mxu0 }
 0x247   : > { %v4964_v6 = vpack.c.bf16 %v4934_v42, %v4933_v28  ;;  %v6452_v57 = vadd.f32 %v6386_v45, %v6206_v18  ;;  %v4749_v58 = vpop.f32.mrb[5].mxu0 }
 0x248   : > { %v4963_v40 = vpack.c.bf16 %v4932_v61, %v4931_v15  ;;  %v6453_v26 = vadd.f32 %v4749_v58, %v1938_v49  ;;  %v6387_v23 = vpop.f32.mrb[6].mxu0 }
 0x249   : > { %v4905_v47 = vadd.f32 %v6452_v57, %v8665_v13  ;;  %v6454_v29 = vadd.f32 %v6387_v23, %v6207_v21  ;;  %v4752_v2 = vpop.f32.mrb[7].mxu0 }
 0x24a   : > { %v4903_v39 = vadd.f32 %v6453_v26, %v8665_v13  ;;  %v6455_v36 = vadd.f32 %v4752_v2, %v1941_v20  ;;  %6416 = vmatprep.mubr.msk.bf16.mxu1 %vm730_vm3, %v4963_v40 }
 0x24b   : > { %v4906_v31 = vadd.f32 %v6454_v29, %v8665_v13  ;;  %6417 = vmatmul.mubr.msk.bf16.vlgmr.msra.gmra.mrb[32].mxu1 %vm730_vm3, %v4964_v6  ;;  %v4937_v46 = vmax.f32 %v4905_v47, 0.0 }
 0x24c   : > { %v4904_v14 = vadd.f32 %v6455_v36, %v8665_v13  ;;  %v4935_v35 = vmax.f32 %v4903_v39, 0.0 }
 0x24d   : > { %v4938_v56 = vmax.f32 %v4906_v31, 0.0 }
 0x24e   : > { %v4936_v17 = vmax.f32 %v4904_v14, 0.0  ;;  %v6390_v16 = vpop.f32.mrb[8].mxu0 }
 0x24f   : > { %v4966_v18 = vpack.c.bf16 %v4938_v56, %v4937_v46  ;;  %v6456_v49 = vadd.f32 %v6390_v16, %v8614_v22  ;;  %v4765_v21 = vpop.f32.mrb[9].mxu0 }
 0x250   : > { %v4965_v1 = vpack.c.bf16 %v4936_v17, %v4935_v35  ;;  %v6457_v20 = vadd.f32 %v4765_v21, %v8616_v37  ;;  %v6391_v60 = vpop.f32.mrb[10].mxu0 }
 0x251   : > { %v4909_v38 = vadd.f32 %v6456_v49, %v8665_v13  ;;  %v6458_v33 = vadd.f32 %v6391_v60, %v8618_v62  ;;  %v4768_v7 = vpop.f32.mrb[11].mxu0 }
 0x252   : > { %v4907_v55 = vadd.f32 %v6457_v20, %v8665_v13  ;;  %v6459_v30 = vadd.f32 %v4768_v7, %v8620_v25  ;;  %6420 = vmatprep.mubr.msk.bf16.mxu1 %vm730_vm3, %v4965_v1 }
 0x253   : > { %v4910_v41 = vadd.f32 %v6458_v33, %v8665_v13  ;;  %6421 = vmatmul.mubr.msk.bf16.gmra.mrb[36].mxu1 %vm730_vm3, %v4966_v18  ;;  %v4941_v19 = vmax.f32 %v4909_v38, 0.0 }
 0x254   : > { %v4908_v22 = vadd.f32 %v6459_v30, %v8665_v13  ;;  %v4939_v0 = vmax.f32 %v4907_v55, 0.0 }
 0x255   : > { %v4942_v37 = vmax.f32 %v4910_v41, 0.0 }
 0x256   : > { %v4940_v50 = vmax.f32 %v4908_v22, 0.0  ;;  %v6394_v5 = vpop.f32.mrb[12].mxu0 }
 0x257   : > { %v4968_v28 = vpack.c.bf16 %v4942_v37, %v4941_v19  ;;  %v6460_v62 = vadd.f32 %v6394_v5, %v8622_v43  ;;  %v4781_v42 = vpop.f32.mrb[13].mxu0 }
 0x258   : > { %v4967_v15 = vpack.c.bf16 %v4940_v50, %v4939_v0  ;;  %v6461_v25 = vadd.f32 %v4781_v42, %v8624_v51  ;;  %v6395_v61 = vpop.f32.mrb[14].mxu0 }
 0x259   : > { %v4913_v45 = vadd.f32 %v6460_v62, %v8665_v13  ;;  %v6462_v6 = vadd.f32 %v6395_v61, %v8626_v44  ;;  %v4784_v57 = vpop.f32.mrb[15].mxu0 }
 0x25a   : > { %v4911_v58 = vadd.f32 %v6461_v25, %v8665_v13  ;;  %v6463_v40 = vadd.f32 %v4784_v57, %v8628_v12  ;;  %6424 = vmatprep.mubr.msk.bf16.mxu1 %vm730_vm3, %v4967_v15 }
 0x25b   : > { %v4914_v26 = vadd.f32 %v6462_v6, %v8665_v13  ;;  %6425 = vmatmul.mubr.msk.bf16.gmra.mrb[40].mxu1 %vm730_vm3, %v4968_v28  ;;  %v4945_v23 = vmax.f32 %v4913_v45, 0.0 }
 0x25c   : > { %v4912_v43 = vadd.f32 %v6463_v40, %v8665_v13  ;;  %v4943_v47 = vmax.f32 %v4911_v58, 0.0 }
 0x25d   : > { %v4946_v51 = vmax.f32 %v4914_v26, 0.0 }
 0x25e   : > { %v4944_v29 = vmax.f32 %v4912_v43, 0.0  ;;  %v6398_v2 = vpop.f32.mrb[16].mxu0 }
 0x25f   : > { %v4970_v39 = vpack.c.bf16 %v4946_v51, %v4945_v23  ;;  %v6464_v44 = vadd.f32 %v6398_v2, %v8630_v11  ;;  %v4797_v36 = vpop.f32.mrb[17].mxu0 }
 0x260   : > { %v4969_v31 = vpack.c.bf16 %v4944_v29, %v4943_v47  ;;  %v6465_v12 = vadd.f32 %v4797_v36, %v8632_v59  ;;  %v6399_v14 = vpop.f32.mrb[18].mxu0 }
 0x261   : > { %v4917_v46 = vadd.f32 %v6464_v44, %v8665_v13  ;;  %v6466_v56 = vadd.f32 %v6399_v14, %v8634_v53  ;;  %v4800_v35 = vpop.f32.mrb[19].mxu0 }
 0x262   : > { %v4915_v17 = vadd.f32 %v6465_v12, %v8665_v13  ;;  %v6467_v16 = vadd.f32 %v4800_v35, %v8636_v9  ;;  %6428 = vmatprep.mubr.msk.bf16.mxu1 %vm730_vm3, %v4969_v31 }
 0x263   : > { %v4918_v18 = vadd.f32 %v6466_v56, %v8665_v13  ;;  %6429 = vmatmul.mubr.msk.bf16.gmra.mrb[44].mxu1 %vm730_vm3, %v4970_v39  ;;  %v4949_v49 = vmax.f32 %v4917_v46, 0.0 }
 0x264   : > { %v4916_v11 = vadd.f32 %v6467_v16, %v8665_v13  ;;  %v4947_v21 = vmax.f32 %v4915_v17, 0.0 }
 0x265   : > { %v4950_v59 = vmax.f32 %v4918_v18, 0.0 }
 0x266   : > { %v4948_v1 = vmax.f32 %v4916_v11, 0.0  ;;  %v6402_v20 = vpop.f32.mrb[20].mxu0 }
 0x267   : > { %v4972_v60 = vpack.c.bf16 %v4950_v59, %v4949_v49  ;;  %v6468_v53 = vadd.f32 %v6402_v20, %v8638_v10  ;;  %v4813_v38 = vpop.f32.mrb[21].mxu0 }
 0x268   : > { %v4971_v33 = vpack.c.bf16 %v4948_v1, %v4947_v21  ;;  %v6469_v9 = vadd.f32 %v4813_v38, %v8640_v8  ;;  %v6403_v7 = vpop.f32.mrb[22].mxu0 }
 0x269   : > { %v4921_v55 = vadd.f32 %v6468_v53, %v8665_v13  ;;  %v6470_v30 = vadd.f32 %v6403_v7, %v8642_v48  ;;  %v4816_v41 = vpop.f32.mrb[23].mxu0 }
 0x26a   : > { %v4919_v22 = vadd.f32 %v6469_v9, %v8665_v13  ;;  %v6471_v19 = vadd.f32 %v4816_v41, %v8644_v27  ;;  %6432 = vmatprep.mubr.msk.bf16.mxu1 %vm730_vm3, %v4971_v33 }
 0x26b   : > { %v4922_v37 = vadd.f32 %v6470_v30, %v8665_v13  ;;  %6433 = vmatmul.mubr.msk.bf16.gmra.mrb[48].mxu1 %vm730_vm3, %v4972_v60  ;;  %v4953_v0 = vmax.f32 %v4921_v55, 0.0 }
 0x26c   : > { %v4920_v10 = vadd.f32 %v6471_v19, %v8665_v13  ;;  %v4951_v50 = vmax.f32 %v4919_v22, 0.0 }
 0x26d   : > { %v4954_v8 = vmax.f32 %v4922_v37, 0.0 }
 0x26e   : > { %v4952_v5 = vmax.f32 %v4920_v10, 0.0  ;;  %v6406_v28 = vpop.f32.mrb[24].mxu0 }
 0x26f   : > { %v4974_v62 = vpack.c.bf16 %v4954_v8, %v4953_v0  ;;  %v6472_v48 = vadd.f32 %v6406_v28, %v8646_v34  ;;  %v4829_v42 = vpop.f32.mrb[25].mxu0 }
 0x270   : > { %v4973_v15 = vpack.c.bf16 %v4952_v5, %v4951_v50  ;;  %v6473_v27 = vadd.f32 %v4829_v42, %v8648_v54  ;;  %v6407_v25 = vpop.f32.mrb[26].mxu0 }
 0x271   : > { %v4925_v61 = vadd.f32 %v6472_v48, %v8665_v13  ;;  %v6474_v45 = vadd.f32 %v6407_v25, %v8650_v52  ;;  %v4832_v6 = vpop.f32.mrb[27].mxu0 }
 0x272   : > { %v4923_v57 = vadd.f32 %v6473_v27, %v8665_v13  ;;  %v6475_v58 = vadd.f32 %v4832_v6, %v8652_v4  ;;  %6436 = vmatprep.mubr.msk.bf16.mxu1 %vm730_vm3, %v4973_v15 }
 0x273   : > { %v4926_v40 = vadd.f32 %v6474_v45, %v8665_v13  ;;  %6437 = vmatmul.mubr.msk.bf16.gmra.mrb[52].mxu1 %vm730_vm3, %v4974_v62  ;;  %v4957_v26 = vmax.f32 %v4925_v61, 0.0 }
 0x274   : > { %v4924_v34 = vadd.f32 %v6475_v58, %v8665_v13  ;;  %v4955_v43 = vmax.f32 %v4923_v57, 0.0 }
 0x275   : > { %v4958_v54 = vmax.f32 %v4926_v40, 0.0 }
 0x276   : > { %v4956_v23 = vmax.f32 %v4924_v34, 0.0  ;;  %v6410_v51 = vpop.f32.mrb[28].mxu0 }
 0x277   : > { %v4976_v47 = vpack.c.bf16 %v4958_v54, %v4957_v26  ;;  %v6476_v52 = vadd.f32 %v6410_v51, %v8654_v32  ;;  %v4845_v29 = vpop.f32.mrb[29].mxu0 }
 0x278   : > { %v4975_v2 = vpack.c.bf16 %v4956_v23, %v4955_v43  ;;  %v6477_v4 = vadd.f32 %v4845_v29, %v8656_v3  ;;  %v6411_v39 = vpop.f32.mrb[30].mxu0 }
 0x279   : > { %v4929_v44 = vadd.f32 %v6476_v52, %v8665_v13  ;;  %v6478_v36 = vadd.f32 %v6411_v39, %v8658_v63  ;;  %v4848_v31 = vpop.f32.mrb[31].mxu0 }
 0x27a   : > { %v4927_v12 = vadd.f32 %v6477_v4, %v8665_v13  ;;  %v6479_v14 = vadd.f32 %v4848_v31, %v8660_v24  ;;  %6440 = vmatprep.mubr.msk.bf16.mxu1 %vm730_vm3, %v4975_v2  ;;  %v8743_v24 = vld [vmem:[%s8853_s4] ss:$0 sm:$0xff] }
 0x27b   : > { %v4930_v46 = vadd.f32 %v6478_v36, %v8665_v13  ;;  %6441 = vmatmul.mubr.msk.bf16.gmra.mrb[56].mxu1 %vm730_vm3, %v4976_v47  ;;  %v4961_v3 = vmax.f32 %v4929_v44, 0.0 }
 0x27c   : > { %v4928_v32 = vadd.f32 %v6479_v14, %v8665_v13  ;;  %v4959_v35 = vmax.f32 %v4927_v12, 0.0 }
 0x27d   : > { %v4962_v56 = vmax.f32 %v4930_v46, 0.0 }
 0x27e   : > { %v4960_v17 = vmax.f32 %v4928_v32, 0.0 }
 0x27f   : > { %v4978_v16 = vpack.c.bf16 %v4962_v56, %v4961_v3 }
 0x280   : > { %v4977_v63 = vpack.c.bf16 %v4960_v17, %v4959_v35 }
 0x282   : > { %6444 = vmatprep.mubr.msk.bf16.mxu1 %vm730_vm3, %v4977_v63 }
 0x283   : > { %6445 = vmatmul.mubr.msk.bf16.gmra.mrb[60].mxu1 %vm730_vm3, %v4978_v16 }
 0x31e   : > { %v6418_v13 = vpop.f32.mrb[32].mxu1 }
 0x31f   : > { %v5093_v18 = vadd.f32 %v6418_v13, %v8743_v24  ;;  %v5084_v11 = vpop.f32.mrb[33].mxu1 }
 0x320   : > { %v5085_v49 = vadd.f32 %v8743_v24, %v5084_v11  ;;  %v6419_v59 = vpop.f32.mrb[34].mxu1 }
 0x321   : > { %5214 = vst.msk [vmem:[%s8748_s27 + $0x10] sm:$0xff] %vm5211_vm7, %v5093_v18  ;;  %v5096_v21 = vadd.f32 %v6419_v59, %v8743_v24  ;;  %v5087_v1 = vpop.f32.mrb[35].mxu1 }
 0x322   : > { %5212 = vst.msk [vmem:[%s8748_s27] sm:$0xff] %vm5211_vm7, %v5085_v49  ;;  %v5088_v20 = vadd.f32 %v8743_v24, %v5087_v1 }
 0x323   : > { %5215 = vst.msk [vmem:[%s8748_s27 + $0x18] sm:$0xff] %vm5211_vm7, %v5096_v21 }
 0x324   : > { %5213 = vst.msk [vmem:[%s8748_s27 + $0x8] sm:$0xff] %vm5211_vm7, %v5088_v20 }
 0x326   : > { %v6422_v60 = vpop.f32.mrb[36].mxu1 }
 0x327   : > { %v5109_v53 = vadd.f32 %v6422_v60, %v8743_v24  ;;  %v5100_v38 = vpop.f32.mrb[37].mxu1 }
 0x328   : > { %v5101_v33 = vadd.f32 %v8743_v24, %v5100_v38  ;;  %v6423_v9 = vpop.f32.mrb[38].mxu1 }
 0x329   : > { %5218 = vst.msk [vmem:[%s8748_s27 + $0x30] sm:$0xff] %vm5211_vm7, %v5109_v53  ;;  %v5112_v7 = vadd.f32 %v6423_v9, %v8743_v24  ;;  %v5103_v55 = vpop.f32.mrb[39].mxu1 }
 0x32a   : > { %5216 = vst.msk [vmem:[%s8748_s27 + $0x20] sm:$0xff] %vm5211_vm7, %v5101_v33  ;;  %v5104_v30 = vadd.f32 %v8743_v24, %v5103_v55 }
 0x32b   : > { %5219 = vst.msk [vmem:[%s8748_s27 + $0x38] sm:$0xff] %vm5211_vm7, %v5112_v7 }
 0x32c   : > { %5217 = vst.msk [vmem:[%s8748_s27 + $0x28] sm:$0xff] %vm5211_vm7, %v5104_v30 }
 0x32e   : > { %v6426_v41 = vpop.f32.mrb[40].mxu1 }
 0x32f   : > { %v5125_v22 = vadd.f32 %v6426_v41, %v8743_v24  ;;  %v5116_v19 = vpop.f32.mrb[41].mxu1 }
 0x330   : > { %v5117_v37 = vadd.f32 %v8743_v24, %v5116_v19  ;;  %v6427_v10 = vpop.f32.mrb[42].mxu1 }
 0x331   : > { %5222 = vst.msk [vmem:[%s8748_s27 + $0x50] sm:$0xff] %vm5211_vm7, %v5125_v22  ;;  %v5128_v0 = vadd.f32 %v6427_v10, %v8743_v24  ;;  %v5119_v8 = vpop.f32.mrb[43].mxu1 }
 0x332   : > { %5220 = vst.msk [vmem:[%s8748_s27 + $0x40] sm:$0xff] %vm5211_vm7, %v5117_v37  ;;  %v5120_v50 = vadd.f32 %v8743_v24, %v5119_v8 }
 0x333   : > { %5223 = vst.msk [vmem:[%s8748_s27 + $0x58] sm:$0xff] %vm5211_vm7, %v5128_v0 }
 0x334   : > { %5221 = vst.msk [vmem:[%s8748_s27 + $0x48] sm:$0xff] %vm5211_vm7, %v5120_v50 }
 0x336   : > { %v6430_v5 = vpop.f32.mrb[44].mxu1 }
 0x337   : > { %v5141_v28 = vadd.f32 %v6430_v5, %v8743_v24  ;;  %v5132_v62 = vpop.f32.mrb[45].mxu1 }
 0x338   : > { %v5133_v48 = vadd.f32 %v8743_v24, %v5132_v62  ;;  %v6431_v42 = vpop.f32.mrb[46].mxu1 }
 0x339   : > { %5226 = vst.msk [vmem:[%s8748_s27 + $0x70] sm:$0xff] %vm5211_vm7, %v5141_v28  ;;  %v5144_v15 = vadd.f32 %v6431_v42, %v8743_v24  ;;  %v5135_v27 = vpop.f32.mrb[47].mxu1 }
 0x33a   : > { %5224 = vst.msk [vmem:[%s8748_s27 + $0x60] sm:$0xff] %vm5211_vm7, %v5133_v48  ;;  %v5136_v25 = vadd.f32 %v8743_v24, %v5135_v27 }
 0x33b   : > { %5227 = vst.msk [vmem:[%s8748_s27 + $0x78] sm:$0xff] %vm5211_vm7, %v5144_v15 }
 0x33c   : > { %5225 = vst.msk [vmem:[%s8748_s27 + $0x68] sm:$0xff] %vm5211_vm7, %v5136_v25 }
 0x33e   : > { %v6434_v61 = vpop.f32.mrb[48].mxu1 }
 0x33f   : > { %v5157_v45 = vadd.f32 %v6434_v61, %v8743_v24  ;;  %v5148_v6 = vpop.f32.mrb[49].mxu1 }
 0x340   : > { %v5149_v57 = vadd.f32 %v8743_v24, %v5148_v6  ;;  %v6435_v58 = vpop.f32.mrb[50].mxu1 }
 0x341   : > { %5230 = vst.msk [vmem:[%s8748_s27 + $0x90] sm:$0xff] %vm5211_vm7, %v5157_v45  ;;  %v5160_v40 = vadd.f32 %v6435_v58, %v8743_v24  ;;  %v5151_v34 = vpop.f32.mrb[51].mxu1 }
 0x342   : > { %5228 = vst.msk [vmem:[%s8748_s27 + $0x80] sm:$0xff] %vm5211_vm7, %v5149_v57  ;;  %v5152_v26 = vadd.f32 %v8743_v24, %v5151_v34 }
 0x343   : > { %5231 = vst.msk [vmem:[%s8748_s27 + $0x98] sm:$0xff] %vm5211_vm7, %v5160_v40 }
 0x344   : > { %5229 = vst.msk [vmem:[%s8748_s27 + $0x88] sm:$0xff] %vm5211_vm7, %v5152_v26 }
 0x346   : > { %v6438_v54 = vpop.f32.mrb[52].mxu1 }
 0x347   : > { %v5173_v43 = vadd.f32 %v6438_v54, %v8743_v24  ;;  %v5164_v23 = vpop.f32.mrb[53].mxu1 }
 0x348   : > { %v5165_v51 = vadd.f32 %v8743_v24, %v5164_v23  ;;  %v6439_v47 = vpop.f32.mrb[54].mxu1 }
 0x349   : > { %5234 = vst.msk [vmem:[%s8748_s27 + $0xb0] sm:$0xff] %vm5211_vm7, %v5173_v43  ;;  %v5176_v52 = vadd.f32 %v6439_v47, %v8743_v24  ;;  %v5167_v29 = vpop.f32.mrb[55].mxu1 }
 0x34a   : > { %5232 = vst.msk [vmem:[%s8748_s27 + $0xa0] sm:$0xff] %vm5211_vm7, %v5165_v51  ;;  %v5168_v2 = vadd.f32 %v8743_v24, %v5167_v29 }
 0x34b   : > { %5235 = vst.msk [vmem:[%s8748_s27 + $0xb8] sm:$0xff] %vm5211_vm7, %v5176_v52 }
 0x34c   : > { %5233 = vst.msk [vmem:[%s8748_s27 + $0xa8] sm:$0xff] %vm5211_vm7, %v5168_v2 }
 0x34e   : > { %v6442_v4 = vpop.f32.mrb[56].mxu1 }
 0x34f   : > { %v5189_v39 = vadd.f32 %v6442_v4, %v8743_v24  ;;  %v5180_v44 = vpop.f32.mrb[57].mxu1 }
 0x350   : > { %v5181_v36 = vadd.f32 %v8743_v24, %v5180_v44  ;;  %v6443_v31 = vpop.f32.mrb[58].mxu1 }
 0x351   : > { %5238 = vst.msk [vmem:[%s8748_s27 + $0xd0] sm:$0xff] %vm5211_vm7, %v5189_v39  ;;  %v5192_v12 = vadd.f32 %v6443_v31, %v8743_v24  ;;  %v5183_v14 = vpop.f32.mrb[59].mxu1 }
 0x352   : > { %5236 = vst.msk [vmem:[%s8748_s27 + $0xc0] sm:$0xff] %vm5211_vm7, %v5181_v36  ;;  %v5184_v46 = vadd.f32 %v8743_v24, %v5183_v14 }
 0x353   : > { %5239 = vst.msk [vmem:[%s8748_s27 + $0xd8] sm:$0xff] %vm5211_vm7, %v5192_v12 }
 0x354   : > { %5237 = vst.msk [vmem:[%s8748_s27 + $0xc8] sm:$0xff] %vm5211_vm7, %v5184_v46 }
 0x356   : > { %v6446_v32 = vpop.f32.mrb[60].mxu1 }
 0x357   : > { %v5205_v3 = vadd.f32 %v6446_v32, %v8743_v24  ;;  %v5196_v56 = vpop.f32.mrb[61].mxu1 }
 0x358   : > { %v5197_v35 = vadd.f32 %v8743_v24, %v5196_v56  ;;  %v6447_v17 = vpop.f32.mrb[62].mxu1 }
 0x359   : > { %5242 = vst.msk [vmem:[%s8748_s27 + $0xf0] sm:$0xff] %vm5211_vm7, %v5205_v3  ;;  %v5208_v16 = vadd.f32 %v6447_v17, %v8743_v24  ;;  %v5199_v63 = vpop.f32.mrb[63].mxu1 }
 0x35a   : > { %5240 = vst.msk [vmem:[%s8748_s27 + $0xe0] sm:$0xff] %vm5211_vm7, %v5197_v35  ;;  %v5200_v13 = vadd.f32 %v8743_v24, %v5199_v63 }
 0x35b   : > { %5243 = vst.msk [vmem:[%s8748_s27 + $0xf8] sm:$0xff] %vm5211_vm7, %v5208_v16 }
 0x35c   : > { %5241 = vst.msk [vmem:[%s8748_s27 + $0xe8] sm:$0xff] %vm5211_vm7, %v5200_v13 }
 0x35d PF: > { %s15_s18 = sadd.s32 1, %s6844_s18  }
 0x35e   : > { %p12_p4 = scmp.ge.s32.totalorder %s15_s18, 4  }
 0x360   :  { %14 = sbr.rel (!%p12_p4) target bundleno = 1 (0x1), region = 80 }

// kernel: generalized_rcnn_inference.5
= control target key start
LH: loop header
LB: loop body
LE: loop exit
PB: predicated region body
PF: predicated region fallthrough
CT: control target
= control target key end

     0   :  { %v751_v34 = vmov 0.0   ;;  %vm752_vm0 = vmmov 0   ;;  %vm438_vm1 = vcmask 523264   ;;  %vm569_vm2 = vcmask 211968   ;;  %s942_s1 = inlined_call_operand.vmem [shape: bf16[512,64], index: 1, kind: input, shape index: {}]   ;;  %s943_s0 = inlined_call_operand.vmem [shape: bf16[16,512], index: 0, kind: input, shape index: {}]   ;;  %s944_s3 = inlined_call_operand.vmem [shape: bf16[64,64], index: 3, kind: input, shape index: {}]   ;;  %s945_s5 = inlined_call_operand.vmem [shape: bf16[64,26], index: 5, kind: input, shape index: {}]   ;;  %s946_s2 = inlined_call_operand.vmem [shape: f32[1,64], index: 2, kind: input, shape index: {}]   ;;  %s947_s4 = inlined_call_operand.vmem [shape: f32[1,64], index: 4, kind: input, shape index: {}]   ;;  %s948_s6 = inlined_call_operand.vmem [shape: f32[1,26], index: 6, kind: input, shape index: {}]   ;;  %s949_s7 = inlined_call_operand.vmem [shape: f32[16,26], index: 7, kind: output, shape index: {}]  }
   0x1   :  { %v705_v0 = vld [vmem:[%s942_s1 + $0x40] sm:$0xff]   ;;  %v709_v4 = vld [vmem:[%s942_s1 + $0x48] sm:$0xff]   ;;  %v713_v8 = vld [vmem:[%s942_s1 + $0x50] sm:$0xff]  }
   0x2   :  { %v706_v1 = vld [vmem:[%s942_s1 + $0xc0] sm:$0xff]   ;;  %625 = vmatprep.subr.bf16.mxu0 %v705_v0  ;;  %v710_v5 = vld [vmem:[%s942_s1 + $0xc8] sm:$0xff]   ;;  %v714_v9 = vld [vmem:[%s942_s1 + $0xd0] sm:$0xff]  }
   0x3   :  { %v707_v2 = vld [vmem:[%s942_s1] sm:$0xff]   ;;  %647 = vmatprep.subr.bf16.mxu1 %v706_v1  ;;  %v711_v6 = vld [vmem:[%s942_s1 + $0x8] sm:$0xff]   ;;  %v715_v10 = vld [vmem:[%s942_s1 + $0x10] sm:$0xff]  }
   0x4   :  { %v708_v3 = vld [vmem:[%s942_s1 + $0x80] sm:$0xff]   ;;  %626 = vmatpush3.bf16.msra.mxu0 %v707_v2  ;;  %v712_v7 = vld [vmem:[%s942_s1 + $0x88] sm:$0xff]   ;;  %v716_v11 = vld [vmem:[%s942_s1 + $0x90] sm:$0xff]  }
   0x5   :  { %648 = vmatpush3.bf16.msra.mxu1 %v708_v3  ;;  %627 = vmatprep.subr.bf16.mxu0 %v709_v4  ;;  %v717_v12 = vld [vmem:[%s942_s1 + $0x58] sm:$0xff]   ;;  %v721_v16 = vld [vmem:[%s942_s1 + $0x60] sm:$0xff]   ;;  %v725_v20 = vld [vmem:[%s942_s1 + $0x68] sm:$0xff]  }
   0x6   :  { %649 = vmatprep.subr.bf16.mxu1 %v710_v5  ;;  %v718_v13 = vld [vmem:[%s942_s1 + $0xd8] sm:$0xff]   ;;  %v722_v17 = vld [vmem:[%s942_s1 + $0xe0] sm:$0xff]   ;;  %v726_v21 = vld [vmem:[%s942_s1 + $0xe8] sm:$0xff]  }
   0x7   :  { %v719_v14 = vld [vmem:[%s942_s1 + $0x18] sm:$0xff]   ;;  %v723_v18 = vld [vmem:[%s942_s1 + $0x20] sm:$0xff]   ;;  %v727_v22 = vld [vmem:[%s942_s1 + $0x28] sm:$0xff]  }
   0x8   :  { %628 = vmatpush3.bf16.msra.mxu0 %v711_v6  ;;  %v720_v15 = vld [vmem:[%s942_s1 + $0x98] sm:$0xff]   ;;  %v724_v19 = vld [vmem:[%s942_s1 + $0xa0] sm:$0xff]   ;;  %v728_v23 = vld [vmem:[%s942_s1 + $0xa8] sm:$0xff]  }
   0x9   :  { %650 = vmatpush3.bf16.msra.mxu1 %v712_v7  ;;  %629 = vmatprep.subr.bf16.mxu0 %v713_v8  ;;  %v729_v24 = vld [vmem:[%s942_s1 + $0x70] sm:$0xff]   ;;  %v733_v28 = vld [vmem:[%s942_s1 + $0x78] sm:$0xff]   ;;  %v743_v37 = vld [vmem:[%s944_s3] sm:$0xff]  }
   0xa   :  { %651 = vmatprep.subr.bf16.mxu1 %v714_v9  ;;  %v730_v25 = vld [vmem:[%s942_s1 + $0xf0] sm:$0xff]   ;;  %v734_v29 = vld [vmem:[%s942_s1 + $0xf8] sm:$0xff]   ;;  %v744_v38 = vld [vmem:[%s944_s3 + $0x8] sm:$0xff]  }
   0xb   :  { %v731_v26 = vld [vmem:[%s942_s1 + $0x30] sm:$0xff]   ;;  %v735_v30 = vld [vmem:[%s942_s1 + $0x38] sm:$0xff]   ;;  %v747_v41 = vld [vmem:[%s945_s5] sm:$0xff]  }
   0xc   :  { %630 = vmatpush3.bf16.msra.mxu0 %v715_v10  ;;  %v732_v27 = vld [vmem:[%s942_s1 + $0xb0] sm:$0xff]   ;;  %v736_v31 = vld [vmem:[%s942_s1 + $0xb8] sm:$0xff]   ;;  %v748_v42 = vld [vmem:[%s945_s5 + $0x8] sm:$0xff]  }
   0xd   :  { %652 = vmatpush3.bf16.msra.mxu1 %v716_v11  ;;  %631 = vmatprep.subr.bf16.mxu0 %v717_v12  ;;  %v737_v32 = vld [vmem:[%s943_s0] ss:$16 sps:$4 sm:$0xff]   ;;  %v739_v33 = vld [vmem:[%s943_s0 + $0x4] ss:$16 sps:$4 sm:$0xff]   ;;  %v740_v35 = vld [vmem:[%s943_s0 + $0x8] ss:$16 sps:$4 sm:$0xff]  }
   0xe   :  { %653 = vmatprep.subr.bf16.mxu1 %v718_v13  ;;  %v742_v36 = vld [vmem:[%s943_s0 + $0xc] ss:$16 sps:$4 sm:$0xff]   ;;  %346 = vmatprep.mubr.bf16.mxu0 %v739_v33  ;;  %v745_v39 = vld [vmem:[%s944_s3 + $0x10] sm:$0xff]   ;;  %v576_v45 = vld [vmem:[%s946_s2] ss:$0 sm:$0xff] }
   0xf   :  { %387 = vmatprep.mubr.bf16.mxu1 %v742_v36  ;;  %v746_v40 = vld [vmem:[%s944_s3 + $0x18] sm:$0xff]   ;;  %v749_v63 = vld [vmem:[%s945_s5 + $0x10] sm:$0xff]   ;;  %v613_v1 = vld [vmem:[%s947_s4] ss:$0 sm:$0xff] }
  0x10   :  { %632 = vmatpush3.bf16.msra.mxu0 %v719_v14  ;;  %v750_v0 = vld [vmem:[%s945_s5 + $0x18] sm:$0xff]   ;;  %v619_v11 = vld [vmem:[%s948_s6] ss:$0 sm:$0xff] }
  0x11   :  { %654 = vmatpush3.bf16.msra.mxu1 %v720_v15  ;;  %633 = vmatprep.subr.bf16.mxu0 %v721_v16 }
  0x12   :  { %655 = vmatprep.subr.bf16.mxu1 %v722_v17 }
  0x14   :  { %634 = vmatpush3.bf16.msra.mxu0 %v723_v18 }
  0x15   :  { %656 = vmatpush3.bf16.msra.mxu1 %v724_v19  ;;  %635 = vmatprep.subr.bf16.mxu0 %v725_v20 }
  0x16   :  { %657 = vmatprep.subr.bf16.mxu1 %v726_v21 }
  0x18   :  { %636 = vmatpush3.bf16.msra.mxu0 %v727_v22 }
  0x19   :  { %658 = vmatpush3.bf16.msra.mxu1 %v728_v23  ;;  %637 = vmatprep.subr.bf16.mxu0 %v729_v24 }
  0x1a   :  { %659 = vmatprep.subr.bf16.mxu1 %v730_v25 }
  0x1c   :  { %638 = vmatpush3.bf16.msra.mxu0 %v731_v26 }
  0x1d   :  { %660 = vmatpush3.bf16.msra.mxu1 %v732_v27  ;;  %639 = vmatprep.subr.bf16.mxu0 %v733_v28 }
  0x1e   :  { %661 = vmatprep.subr.bf16.mxu1 %v734_v29 }
  0x20   :  { %640 = vmatpush3.bf16.msra.mxu0 %v735_v30 }
  0x21   :  { %662 = vmatpush3.bf16.msra.mxu1 %v736_v31  ;;  %679 = vmatprep.subr.bf16.mxu0 %v751_v34 }
  0x22   :  { %691 = vmatprep.subr.bf16.mxu1 %v751_v34 }
  0x23   :  { %347 = vmatmul.mubr.bf16.vlgmr.msra.gmra.mrb[0].mxu0 %v737_v32 }
  0x24   :  { %388 = vmatmul.mubr.bf16.vlgmr.msra.gmra.mrb[0].mxu1 %v740_v35  ;;  %680 = vmatpush3.bf16.msra.mxu0 %v743_v37 }
  0x25   :  { %681 = vmatprep.subr.bf16.mxu0 %v751_v34  ;;  %687 = vmatprep.mubr.msk.bf16.mxu0 %vm752_vm0, %v751_v34 }
  0x26   :  { %699 = vmatprep.mubr.msk.bf16.mxu1 %vm752_vm0, %v751_v34  ;;  %692 = vmatpush3.bf16.msra.mxu1 %v747_v41 }
  0x27   :  { %693 = vmatprep.subr.bf16.mxu1 %v751_v34 }
  0x28   :  { %682 = vmatpush3.bf16.msra.mxu0 %v744_v38 }
  0x29   :  { %683 = vmatprep.subr.bf16.mxu0 %v751_v34 }
  0x2a   :  { %694 = vmatpush3.bf16.msra.mxu1 %v748_v42 }
  0x2b   :  { %695 = vmatprep.subr.bf16.mxu1 %v751_v34 }
  0x2c   :  { %684 = vmatpush3.bf16.msra.mxu0 %v745_v39 }
  0x2d   :  { %685 = vmatprep.subr.bf16.mxu0 %v751_v34 }
  0x2e   :  { %696 = vmatpush3.bf16.msra.mxu1 %v749_v63 }
  0x2f   :  { %697 = vmatprep.subr.bf16.mxu1 %v751_v34 }
  0x30   :  { %686 = vmatpush3.bf16.msra.mxu0 %v746_v40 }
  0x32   :  { %698 = vmatpush3.bf16.msra.mxu1 %v750_v0 }
  0xf6   :  { %v641_v43 = vpop.f32.mrb[0].mxu0 }
  0xf7   :  { %v663_v44 = vpop.f32.mrb[0].mxu1  ;;  %v642_v46 = vpop.f32.mrb[1].mxu0 }
  0xf8   :  { %v643_v47 = vadd.f32 %v642_v46, %v641_v43  ;;  %v664_v48 = vpop.f32.mrb[1].mxu1  ;;  %v644_v49 = vpop.f32.mrb[2].mxu0 }
  0xf9   :  { %v665_v50 = vadd.f32 %v664_v48, %v663_v44  ;;  %v666_v51 = vpop.f32.mrb[2].mxu1  ;;  %v645_v52 = vpop.f32.mrb[3].mxu0 }
  0xfa   :  { %v349_v53 = vadd.f32 %v643_v47, %v576_v45  ;;  %v646_v54 = vadd.f32 %v645_v52, %v644_v49  ;;  %v667_v55 = vpop.f32.mrb[3].mxu1 }
  0xfb   :  { %v668_v56 = vadd.f32 %v667_v55, %v666_v51 }
  0xfc   :  { %v390_v57 = vadd.f32 %v665_v50, %v349_v53  ;;  %v352_v58 = vadd.f32 %v646_v54, %v576_v45 }
  0xfe   :  { %v393_v59 = vadd.f32 %v668_v56, %v352_v58  ;;  %v396_v60 = vmax.f32 %v390_v57, 0.0 }
 0x100   :  { %v397_v61 = vmax.f32 %v393_v59, 0.0 }
 0x102   :  { %v398_v62 = vpack.c.bf16 %v397_v61, %v396_v60 }
 0x104   :  { %688 = vmatmul.mubr.msk.bf16.vlgmr.msra.gmra.mrb[4].mxu0 %vm438_vm1, %v398_v62 }
 0x1d7   :  { %v476_v2 = vpop.f32.mrb[4].mxu0 }
 0x1d8   :  { %v477_v3 = vadd.f32 %v613_v1, %v476_v2  ;;  %v689_v4 = vpop.f32.mrb[5].mxu0 }
 0x1d9   :  { %v479_v5 = vpop.f32.mrb[6].mxu0 }
 0x1da   :  { %v480_v6 = vadd.f32 %v613_v1, %v479_v5  ;;  %v690_v7 = vpop.f32.mrb[7].mxu0  ;;  %v483_v8 = vmax.f32 %v477_v3, 0.0 }
 0x1dc   :  { %v484_v9 = vmax.f32 %v480_v6, 0.0 }
 0x1de   :  { %v485_v10 = vpack.c.bf16 %v484_v9, %v483_v8 }
 0x1e0   :  { %700 = vmatmul.mubr.msk.bf16.vlgmr.msra.gmra.mrb[4].mxu1 %vm438_vm1, %v485_v10 }
 0x2b3   :  { %v562_v12 = vpop.f32.mrb[4].mxu1 }
 0x2b4   :  { %v563_v13 = vadd.f32 %v619_v11, %v562_v12  ;;  %v701_v14 = vpop.f32.mrb[5].mxu1 }
 0x2b5   :  { %v565_v15 = vpop.f32.mrb[6].mxu1 }
 0x2b6   :  { %570 = vst.msk [vmem:[%s949_s7] sm:$0xff] %vm569_vm2, %v563_v13  ;;  %v566_v16 = vadd.f32 %v619_v11, %v565_v15  ;;  %v702_v17 = vpop.f32.mrb[7].mxu1 }
 0x2b8   :  { %571 = vst.msk [vmem:[%s949_s7 + $0x8] sm:$0xff] %vm569_vm2, %v566_v16 }

</bundles_post_ra>
